<compile_context>
chip_gen: v7x
topology: tpu7x:2x2x1
jax: 0.10.0
libtpu: 0.0.40
codegen_flags: <defaults>
</compile_context>

<pallas_src>
import functools

import jax
import jax.numpy as jnp
from jax import lax
from jax.experimental import pallas as pl
from jax.experimental.pallas import tpu as pltpu

EPS = 1e-5


# ----------------------------------------------------------------------------
# Fused Bottleneck kernel
# ----------------------------------------------------------------------------
def _fused_bottleneck_kernel(*refs, TH, dil, H, W, NT, has_ds):
    """One grid step = one (image n, row-tile t).

    Stages (fused; intermediates stay in VMEM):
      1) 1x1 conv + BN + ReLU over the row tile plus a `dil`-row halo, written
         into a zero-initialised padded VMEM buffer (zero border == conv2 padding).
      2) dilated 3x3 conv as im2col (K = 9*planes) + one MXU matmul + BN + ReLU.
      3) 1x1 conv + BN + residual (identity or 1x1 projection + BN) + ReLU.
    """
    d = dil
    if has_ds:
        (x_ref, w1_ref, s1_ref, b1_ref, w2_ref, s2_ref, b2_ref,
         w3_ref, s3_ref, b3_ref, wd_ref, sd_ref, bd_ref,
         o_ref, y1_ref, col_ref) = refs
    else:
        (x_ref, w1_ref, s1_ref, b1_ref, w2_ref, s2_ref, b2_ref,
         w3_ref, s3_ref, b3_ref, o_ref, y1_ref, col_ref) = refs
        wd_ref = sd_ref = bd_ref = None

    t = pl.program_id(1)
    TH2 = TH + 2 * d
    P = w1_ref.shape[1]

    w1 = w1_ref[...].astype(jnp.float32)
    s1 = s1_ref[...]
    b1 = b1_ref[...]

    def stage1(xs):
        # xs: (R, W, Cin) -> (R, W, P); 1x1 conv == channel matmul on the MXU.
        y = jnp.einsum('hwc,cp->hwp', xs.astype(jnp.float32), w1,
                       preferred_element_type=jnp.float32)
        return jnp.maximum(y * s1 + b1, 0.0)

    # --- stage 1 into the zero-padded halo buffer ----------------------------
    y1_ref[...] = jnp.zeros_like(y1_ref)   # borders double as conv2 zero padding
    if NT == 1:
        y1_ref[d:d + H, d:d + W, :] = stage1(x_ref[0])
    else:
        if NT >= 3:
            @pl.when(jnp.logical_and(t > 0, t < NT - 1))
            def _interior():
                r0 = t * TH - d
                y1_ref[0:TH2, d:d + W, :] = stage1(x_ref[0, pl.ds(r0, TH2), :, :])

        @pl.when(t == 0)
        def _first():
            y1_ref[d:TH2, d:d + W, :] = stage1(x_ref[0, 0:TH + d, :, :])

        @pl.when(t == NT - 1)
        def _last():
            y1_ref[0:TH + d, d:d + W, :] = stage1(x_ref[0, H - (TH + d):H, :, :])

    # --- stage 2: dilated 3x3 as im2col + a single K = 9*P MXU matmul --------
    for ky in range(3):
        for kx in range(3):
            idx = ky * 3 + kx
            col_ref[:, :, idx * P:(idx + 1) * P] = \
                y1_ref[ky * d:ky * d + TH, kx * d:kx * d + W, :]
    y2 = jnp.einsum('hwk,kp->hwp', col_ref[...],
                    w2_ref[...].astype(jnp.float32),
                    preferred_element_type=jnp.float32)
    y2 = jnp.maximum(y2 * s2_ref[...] + b2_ref[...], 0.0)

    # --- stage 3: 1x1 conv + BN + residual + ReLU -----------------------------
    row0 = pl.multiple_of(t * TH, TH)
    xres = x_ref[0, pl.ds(row0, TH), :, :]
    y3 = jnp.einsum('hwp,pq->hwq', y2, w3_ref[...].astype(jnp.float32),
                    preferred_element_type=jnp.float32)
    y3 = y3 * s3_ref[...] + b3_ref[...]
    if has_ds:
        res = jnp.einsum('hwc,cq->hwq', xres.astype(jnp.float32),
                         wd_ref[...].astype(jnp.float32),
                         preferred_element_type=jnp.float32)
        res = res * sd_ref[...] + bd_ref[...]
    else:
        res = xres.astype(jnp.float32)
    o_ref[0] = jnp.maximum(y3 + res, 0.0).astype(o_ref.dtype)


# ----------------------------------------------------------------------------
# Wrapper
# ----------------------------------------------------------------------------
def fold_bn(gamma, beta, mean, var):
    scale = gamma / jnp.sqrt(var + EPS)
    bias = beta - mean * scale
    return scale.reshape(1, 1, -1).astype(jnp.float32), \
           bias.reshape(1, 1, -1).astype(jnp.float32)


def prepare_params(p_torch):
    """PyTorch-convention params (OIHW conv weights + BN stats) -> Pallas layouts."""
    p = {}
    p['w1'] = jnp.transpose(p_torch['w1'][:, :, 0, 0], (1, 0))                 # (Cin, P)
    w2_hwio = jnp.transpose(p_torch['w2'], (2, 3, 1, 0))                        # (3,3,P,P)
    p['w2'] = w2_hwio.reshape(-1, w2_hwio.shape[-1])                            # (9*P, P)
    p['w3'] = jnp.transpose(p_torch['w3'][:, :, 0, 0], (1, 0))                 # (P, Cout)
    p['s1'], p['b1'] = fold_bn(*p_torch['bn1'])
    p['s2'], p['b2'] = fold_bn(*p_torch['bn2'])
    p['s3'], p['b3'] = fold_bn(*p_torch['bn3'])
    if 'wd' in p_torch:
        p['wd'] = jnp.transpose(p_torch['wd'][:, :, 0, 0], (1, 0))             # (Cin, Cout)
        p['sd'], p['bd'] = fold_bn(*p_torch['bnd'])
    return p


def fused_bottleneck_block(x_nhwc, p, *, dilation=1, block_h=8):
    """Fused Bottleneck forward (stride=1; identity or 1x1-projection residual)."""
    N, H, W, Cin = x_nhwc.shape
    P = p['w1'].shape[1]
    Cout = p['w3'].shape[1]
    d = int(dilation)
    has_ds = 'wd' in p
    if not has_ds and Cin != Cout:
        raise ValueError("identity residual needs Cin == Cout "
                         "(pass a projection downsample)")

    # Row-tile choice: divides H, halo fits (d <= TH); fall back to whole image.
    TH = min(block_h, H)
    while TH > 1 and not (H % TH == 0 and d <= TH):
        TH -= 1
    if not (H % TH == 0 and d <= TH):
        TH = H
    NT = H // TH

    itemsize = jnp.dtype(x_nhwc.dtype).itemsize
    flops = 2 * N * H * W * (Cin * P + 9 * P * P + P * Cout
                             + (Cin * Cout if has_ds else 0))
    bytes_accessed = (x_nhwc.size + N * H * W * Cout) * itemsize + 4 * (
        p['w1'].size + p['w2'].size + p['w3'].size
        + (p['wd'].size if has_ds else 0))
    cost = pl.CostEstimate(flops=int(flops), transcendentals=0,
                           bytes_accessed=int(bytes_accessed))

    kern = functools.partial(_fused_bottleneck_kernel,
                             TH=TH, dil=d, H=H, W=W, NT=NT, has_ds=has_ds)

    full2 = lambda n, t: (0, 0)
    full3 = lambda n, t: (0, 0, 0)
    in_specs = [
        # Whole image per n; block index is t-invariant so it stays VMEM-resident
        # across the row tiles of one image.
        pl.BlockSpec((1, H, W, Cin), lambda n, t: (n, 0, 0, 0)),
        pl.BlockSpec((Cin, P), full2),
        pl.BlockSpec((1, 1, P), full3), pl.BlockSpec((1, 1, P), full3),
        pl.BlockSpec((9 * P, P), full2),
        pl.BlockSpec((1, 1, P), full3), pl.BlockSpec((1, 1, P), full3),
        pl.BlockSpec((P, Cout), full2),
        pl.BlockSpec((1, 1, Cout), full3), pl.BlockSpec((1, 1, Cout), full3),
    ]
    args = [x_nhwc, p['w1'], p['s1'], p['b1'], p['w2'], p['s2'], p['b2'],
            p['w3'], p['s3'], p['b3']]
    if has_ds:
        in_specs += [pl.BlockSpec((Cin, Cout), full2),
                     pl.BlockSpec((1, 1, Cout), full3),
                     pl.BlockSpec((1, 1, Cout), full3)]
        args += [p['wd'], p['sd'], p['bd']]

    return pl.pallas_call(
        kern,
        out_shape=jax.ShapeDtypeStruct((N, H, W, Cout), x_nhwc.dtype),
        grid=(N, NT),
        in_specs=in_specs,
        out_specs=pl.BlockSpec((1, TH, W, Cout), lambda n, t: (n, t, 0, 0)),
        scratch_shapes=[
            pltpu.VMEM((TH + 2 * d, W + 2 * d, P), jnp.float32),  # stage-1 halo buf
            pltpu.VMEM((TH, W, 9 * P), jnp.float32),              # im2col (K = 9*P)
        ],
        compiler_params=pltpu.CompilerParams(
            dimension_semantics=("parallel", "arbitrary"),
            vmem_limit_bytes=32 * 1024 * 1024),
        cost_estimate=cost,
    )(*args)


# ----------------------------------------------------------------------------
# Pure-JAX reference (NCHW, lax convs) for verification
# ----------------------------------------------------------------------------
def reference_bottleneck(x_nchw, p, dilation=1):
    hp = lax.Precision.HIGHEST

    def bn(y, gamma, beta, mean, var):
        sh = (1, -1, 1, 1)
        return (y - mean.reshape(sh)) / jnp.sqrt(var.reshape(sh) + EPS) \
            * gamma.reshape(sh) + beta.reshape(sh)

    dn = ('NCHW', 'OIHW', 'NCHW')
    out = lax.conv_general_dilated(x_nchw, p['w1'], (1, 1), 'VALID',
                                   dimension_numbers=dn, precision=hp)
    out = jnp.maximum(bn(out, *p['bn1']), 0.0)
    out = lax.conv_general_dilated(out, p['w2'], (1, 1),
                                   [(dilation, dilation)] * 2,
                                   rhs_dilation=(dilation, dilation),
                                   dimension_numbers=dn, precision=hp)
    out = jnp.maximum(bn(out, *p['bn2']), 0.0)
    out = lax.conv_general_dilated(out, p['w3'], (1, 1), 'VALID',
                                   dimension_numbers=dn, precision=hp)
    out = bn(out, *p['bn3'])
    if 'wd' in p:
        res = lax.conv_general_dilated(x_nchw, p['wd'], (1, 1), 'VALID',
                                       dimension_numbers=dn, precision=hp)
        res = bn(res, *p['bnd'])
    else:
        res = x_nchw
    return jnp.maximum(out + res, 0.0)


# ----------------------------------------------------------------------------
# Main
# ----------------------------------------------------------------------------
if __name__ == "__main__":
    key = jax.random.PRNGKey(0)
    N, H, W = 2, 24, 24
    planes = 32
    inplanes = 64                 # != planes*4 -> block A uses a projection downsample
    expansion = 4
    cout = planes * expansion     # 128 -> lane-dense outputs
    dil_a, dil_b = 2, 4           # MG-unit style dilations (layer4, output_stride=16)

    ks = jax.random.split(key, 20)

    def conv_w(k, co, ci, kh, kw):
        return 0.1 * jax.random.normal(k, (co, ci, kh, kw), jnp.float32)

    def bn_params(k, c):
        k1, k2, k3, k4 = jax.random.split(k, 4)
        gamma = 1.0 + 0.1 * jax.random.normal(k1, (c,), jnp.float32)
        beta = 0.1 * jax.random.normal(k2, (c,), jnp.float32)
        mean = 0.1 * jax.random.normal(k3, (c,), jnp.float32)
        var = 1.0 + 0.1 * jax.random.uniform(k4, (c,), jnp.float32)
        return (gamma, beta, mean, var)

    # Block A: 64 -> 128 channels, dilation=2, projection downsample (stride=1)
    A = {
        'w1': conv_w(ks[0], planes, inplanes, 1, 1),
        'w2': conv_w(ks[1], planes, planes, 3, 3),
        'w3': conv_w(ks[2], cout, planes, 1, 1),
        'wd': conv_w(ks[3], cout, inplanes, 1, 1),
        'bn1': bn_params(ks[4], planes),
        'bn2': bn_params(ks[5], planes),
        'bn3': bn_params(ks[6], cout),
        'bnd': bn_params(ks[7], cout),
    }
    # Block B: 128 -> 128 channels, dilation=4, identity residual
    B = {
        'w1': conv_w(ks[8], planes, cout, 1, 1),
        'w2': conv_w(ks[9], planes, planes, 3, 3),
        'w3': conv_w(ks[10], cout, planes, 1, 1),
        'bn1': bn_params(ks[11], planes),
        'bn2': bn_params(ks[12], planes),
        'bn3': bn_params(ks[13], cout),
    }

    x_nhwc = jax.random.normal(ks[14], (N, H, W, inplanes), jnp.float32)

    pA = prepare_params(A)
    pB = prepare_params(B)

    # --- Pallas path (NHWC end-to-end; no layout transposes) -----------------
    yA = fused_bottleneck_block(x_nhwc, pA, dilation=dil_a)
    yB = fused_bottleneck_block(yA, pB, dilation=dil_b)
    yB = jax.block_until_ready(yB)

    # --- reference path (NCHW lax convs; transpose only for the reference) ---
    x_nchw = jnp.transpose(x_nhwc, (0, 3, 1, 2))
    rA = reference_bottleneck(x_nchw, A, dilation=dil_a)
    rB = reference_bottleneck(rA, B, dilation=dil_b)
    ref_nhwc = jnp.transpose(rB, (0, 2, 3, 1))

    assert yB.shape == (N, H, W, cout)
    err_f32 = float(jnp.max(jnp.abs(yB - ref_nhwc)))
    assert jnp.allclose(yB, ref_nhwc, atol=1e-3, rtol=1e-3), \
        f"f32 max err {err_f32}"

    # --- bf16 activation path (f32 accumulation inside the kernel) -----------
    zA = fused_bottleneck_block(x_nhwc.astype(jnp.bfloat16), pA, dilation=dil_a)
    zB = fused_bottleneck_block(zA, pB, dilation=dil_b)
    zB = jax.block_until_ready(zB)
    err_bf16 = float(jnp.max(jnp.abs(zB.astype(jnp.float32) - ref_nhwc)))
    assert zB.dtype == jnp.bfloat16 and err_bf16 < 0.25, \
        f"bf16 max err {err_bf16}"

    print("KERNEL_OK")
</pallas_src>

<mosaic_0001>
module attributes {stable_mosaic.version = 11 : i64} {
  func.func @_fused_bottleneck_kernel(%arg0: i32, %arg1: i32, %arg2: memref<1x24x24x64xf32, #tpu.memory_space<vmem>>, %arg3: memref<64x32xf32, #tpu.memory_space<vmem>>, %arg4: memref<1x1x32xf32, #tpu.memory_space<vmem>>, %arg5: memref<1x1x32xf32, #tpu.memory_space<vmem>>, %arg6: memref<288x32xf32, #tpu.memory_space<vmem>>, %arg7: memref<1x1x32xf32, #tpu.memory_space<vmem>>, %arg8: memref<1x1x32xf32, #tpu.memory_space<vmem>>, %arg9: memref<32x128xf32, #tpu.memory_space<vmem>>, %arg10: memref<1x1x128xf32, #tpu.memory_space<vmem>>, %arg11: memref<1x1x128xf32, #tpu.memory_space<vmem>>, %arg12: memref<64x128xf32, #tpu.memory_space<vmem>>, %arg13: memref<1x1x128xf32, #tpu.memory_space<vmem>>, %arg14: memref<1x1x128xf32, #tpu.memory_space<vmem>>, %arg15: memref<1x8x24x128xf32, #tpu.memory_space<vmem>>, %arg16: memref<12x28x32xf32, #tpu.memory_space<vmem>>, %arg17: memref<8x24x288xf32, #tpu.memory_space<vmem>>) attributes {dimension_semantics = [#tpu.dimension_semantics<parallel>, #tpu.dimension_semantics<arbitrary>], iteration_bounds = array<i64: 2, 3>, scalar_prefetch = 0 : i64, scratch_operands = 2 : i64, tpu.core_type = #tpu.core_type<tc>, window_params = [{transform_indices = @transform_0, window_bounds = array<i64: 1, 24, 24, 64>}, {pipeline_mode = #tpu.pipeline_mode<synchronous>, transform_indices = @transform_1, window_bounds = array<i64: 64, 32>}, {pipeline_mode = #tpu.pipeline_mode<synchronous>, transform_indices = @transform_2, window_bounds = array<i64: 1, 1, 32>}, {pipeline_mode = #tpu.pipeline_mode<synchronous>, transform_indices = @transform_3, window_bounds = array<i64: 1, 1, 32>}, {pipeline_mode = #tpu.pipeline_mode<synchronous>, transform_indices = @transform_4, window_bounds = array<i64: 288, 32>}, {pipeline_mode = #tpu.pipeline_mode<synchronous>, transform_indices = @transform_5, window_bounds = array<i64: 1, 1, 32>}, {pipeline_mode = #tpu.pipeline_mode<synchronous>, transform_indices = @transform_6, window_bounds = array<i64: 1, 1, 32>}, {pipeline_mode = #tpu.pipeline_mode<synchronous>, transform_indices = @transform_7, window_bounds = array<i64: 32, 128>}, {pipeline_mode = #tpu.pipeline_mode<synchronous>, transform_indices = @transform_8, window_bounds = array<i64: 1, 1, 128>}, {pipeline_mode = #tpu.pipeline_mode<synchronous>, transform_indices = @transform_9, window_bounds = array<i64: 1, 1, 128>}, {pipeline_mode = #tpu.pipeline_mode<synchronous>, transform_indices = @transform_10, window_bounds = array<i64: 64, 128>}, {pipeline_mode = #tpu.pipeline_mode<synchronous>, transform_indices = @transform_11, window_bounds = array<i64: 1, 1, 128>}, {pipeline_mode = #tpu.pipeline_mode<synchronous>, transform_indices = @transform_12, window_bounds = array<i64: 1, 1, 128>}, {transform_indices = @transform_13, window_bounds = array<i64: 1, 8, 24, 128>}]} {
    %c0 = arith.constant 0 : index
    %c0_0 = arith.constant 0 : index
    %0 = vector.load %arg3[%c0, %c0_0] : memref<64x32xf32, #tpu.memory_space<vmem>>, vector<64x32xf32>
    %c0_1 = arith.constant 0 : index
    %c0_2 = arith.constant 0 : index
    %c0_3 = arith.constant 0 : index
    %1 = vector.load %arg4[%c0_1, %c0_2, %c0_3] : memref<1x1x32xf32, #tpu.memory_space<vmem>>, vector<1x1x32xf32>
    %c0_4 = arith.constant 0 : index
    %c0_5 = arith.constant 0 : index
    %c0_6 = arith.constant 0 : index
    %2 = vector.load %arg5[%c0_4, %c0_5, %c0_6] : memref<1x1x32xf32, #tpu.memory_space<vmem>>, vector<1x1x32xf32>
    %cst = arith.constant 0.000000e+00 : f32
    %3 = vector.broadcast %cst : f32 to vector<12x28x32xf32>
    %c0_7 = arith.constant 0 : index
    %c0_8 = arith.constant 0 : index
    %c0_9 = arith.constant 0 : index
    %4 = vector.load %arg16[%c0_7, %c0_8, %c0_9] : memref<12x28x32xf32, #tpu.memory_space<vmem>>, vector<12x28x32xf32>
    tpu.vector_store %arg16[%c0_7, %c0_8, %c0_9], %3 {strides = array<i32>} : memref<12x28x32xf32, #tpu.memory_space<vmem>>, vector<12x28x32xf32>,
    %c0_i32 = arith.constant 0 : i32
    %5 = arith.cmpi sgt, %arg1, %c0_i32 : i32
    %c2_i32 = arith.constant 2 : i32
    %6 = arith.cmpi slt, %arg1, %c2_i32 : i32
    %7 = arith.andi %5, %6 : i1
    %8 = arith.extui %7 : i1 to i32
    %c0_i32_10 = arith.constant 0 : i32
    %9 = arith.cmpi ne, %8, %c0_i32_10 : i32
    scf.if %9 {
      %c8_i32_98 = arith.constant 8 : i32
      %72 = arith.muli %arg1, %c8_i32_98 : i32
      %c2_i32_99 = arith.constant 2 : i32
      %73 = arith.subi %72, %c2_i32_99 : i32
      %c0_100 = arith.constant 0 : index
      %74 = arith.index_cast %73 : i32 to index
      %c0_101 = arith.constant 0 : index
      %c0_102 = arith.constant 0 : index
      %75 = vector.load %arg2[%c0_100, %74, %c0_101, %c0_102] : memref<1x24x24x64xf32, #tpu.memory_space<vmem>>, vector<1x12x24x64xf32>
      %76 = vector.shape_cast %75 : vector<1x12x24x64xf32> to vector<12x24x64xf32>
      "tpu.trace_start"() <{level = 10 : i32, message = "hwc,cp->hwp"}> : () -> ()
      %cst_103 = arith.constant dense<0.000000e+00> : vector<12x24x32xf32>
      %77 = tpu.matmul %76, %0, %cst_103 {dimension_numbers = #tpu.dot_dimension_numbers<[2], [0], [0, 1], [1], [0, 0, 0, 1, 1, 1], [], []>} : vector<12x24x64xf32>, vector<64x32xf32>, vector<12x24x32xf32> -> vector<12x24x32xf32>
      "tpu.trace_stop"() : () -> ()
      %78 = vector.broadcast %1 : vector<1x1x32xf32> to vector<12x24x32xf32>
      %79 = arith.mulf %77, %78 : vector<12x24x32xf32>
      %80 = vector.broadcast %2 : vector<1x1x32xf32> to vector<12x24x32xf32>
      %81 = arith.addf %79, %80 : vector<12x24x32xf32>
      %cst_104 = arith.constant 0.000000e+00 : f32
      %82 = vector.broadcast %cst_104 : f32 to vector<12x24x32xf32>
      %83 = arith.maximumf %81, %82 : vector<12x24x32xf32>
      %c0_105 = arith.constant 0 : index
      %c2_106 = arith.constant 2 : index
      %c0_107 = arith.constant 0 : index
      %84 = vector.load %arg16[%c0_105, %c2_106, %c0_107] : memref<12x28x32xf32, #tpu.memory_space<vmem>>, vector<12x24x32xf32>
      tpu.vector_store %arg16[%c0_105, %c2_106, %c0_107], %83 {strides = array<i32>} : memref<12x28x32xf32, #tpu.memory_space<vmem>>, vector<12x24x32xf32>,
    } else {
    }
    %c0_i32_11 = arith.constant 0 : i32
    %10 = arith.cmpi eq, %arg1, %c0_i32_11 : i32
    %11 = arith.extui %10 : i1 to i32
    %c0_i32_12 = arith.constant 0 : i32
    %12 = arith.cmpi ne, %11, %c0_i32_12 : i32
    scf.if %12 {
      %c0_98 = arith.constant 0 : index
      %c0_99 = arith.constant 0 : index
      %c0_100 = arith.constant 0 : index
      %c0_101 = arith.constant 0 : index
      %72 = vector.load %arg2[%c0_98, %c0_99, %c0_100, %c0_101] : memref<1x24x24x64xf32, #tpu.memory_space<vmem>>, vector<1x10x24x64xf32>
      %73 = vector.shape_cast %72 : vector<1x10x24x64xf32> to vector<10x24x64xf32>
      "tpu.trace_start"() <{level = 10 : i32, message = "hwc,cp->hwp"}> : () -> ()
      %cst_102 = arith.constant dense<0.000000e+00> : vector<10x24x32xf32>
      %74 = tpu.matmul %73, %0, %cst_102 {dimension_numbers = #tpu.dot_dimension_numbers<[2], [0], [0, 1], [1], [0, 0, 0, 1, 1, 1], [], []>} : vector<10x24x64xf32>, vector<64x32xf32>, vector<10x24x32xf32> -> vector<10x24x32xf32>
      "tpu.trace_stop"() : () -> ()
      %75 = vector.broadcast %1 : vector<1x1x32xf32> to vector<10x24x32xf32>
      %76 = arith.mulf %74, %75 : vector<10x24x32xf32>
      %77 = vector.broadcast %2 : vector<1x1x32xf32> to vector<10x24x32xf32>
      %78 = arith.addf %76, %77 : vector<10x24x32xf32>
      %cst_103 = arith.constant 0.000000e+00 : f32
      %79 = vector.broadcast %cst_103 : f32 to vector<10x24x32xf32>
      %80 = arith.maximumf %78, %79 : vector<10x24x32xf32>
      %c2_104 = arith.constant 2 : index
      %c2_105 = arith.constant 2 : index
      %c0_106 = arith.constant 0 : index
      %81 = vector.load %arg16[%c2_104, %c2_105, %c0_106] : memref<12x28x32xf32, #tpu.memory_space<vmem>>, vector<10x24x32xf32>
      tpu.vector_store %arg16[%c2_104, %c2_105, %c0_106], %80 {strides = array<i32>} : memref<12x28x32xf32, #tpu.memory_space<vmem>>, vector<10x24x32xf32>,
    } else {
    }
    %c2_i32_13 = arith.constant 2 : i32
    %13 = arith.cmpi eq, %arg1, %c2_i32_13 : i32
    %14 = arith.extui %13 : i1 to i32
    %c0_i32_14 = arith.constant 0 : i32
    %15 = arith.cmpi ne, %14, %c0_i32_14 : i32
    scf.if %15 {
      %c0_98 = arith.constant 0 : index
      %c14 = arith.constant 14 : index
      %c0_99 = arith.constant 0 : index
      %c0_100 = arith.constant 0 : index
      %72 = vector.load %arg2[%c0_98, %c14, %c0_99, %c0_100] : memref<1x24x24x64xf32, #tpu.memory_space<vmem>>, vector<1x10x24x64xf32>
      %73 = vector.shape_cast %72 : vector<1x10x24x64xf32> to vector<10x24x64xf32>
      "tpu.trace_start"() <{level = 10 : i32, message = "hwc,cp->hwp"}> : () -> ()
      %cst_101 = arith.constant dense<0.000000e+00> : vector<10x24x32xf32>
      %74 = tpu.matmul %73, %0, %cst_101 {dimension_numbers = #tpu.dot_dimension_numbers<[2], [0], [0, 1], [1], [0, 0, 0, 1, 1, 1], [], []>} : vector<10x24x64xf32>, vector<64x32xf32>, vector<10x24x32xf32> -> vector<10x24x32xf32>
      "tpu.trace_stop"() : () -> ()
      %75 = vector.broadcast %1 : vector<1x1x32xf32> to vector<10x24x32xf32>
      %76 = arith.mulf %74, %75 : vector<10x24x32xf32>
      %77 = vector.broadcast %2 : vector<1x1x32xf32> to vector<10x24x32xf32>
      %78 = arith.addf %76, %77 : vector<10x24x32xf32>
      %cst_102 = arith.constant 0.000000e+00 : f32
      %79 = vector.broadcast %cst_102 : f32 to vector<10x24x32xf32>
      %80 = arith.maximumf %78, %79 : vector<10x24x32xf32>
      %c0_103 = arith.constant 0 : index
      %c2_104 = arith.constant 2 : index
      %c0_105 = arith.constant 0 : index
      %81 = vector.load %arg16[%c0_103, %c2_104, %c0_105] : memref<12x28x32xf32, #tpu.memory_space<vmem>>, vector<10x24x32xf32>
      tpu.vector_store %arg16[%c0_103, %c2_104, %c0_105], %80 {strides = array<i32>} : memref<12x28x32xf32, #tpu.memory_space<vmem>>, vector<10x24x32xf32>,
    } else {
    }
    %c0_15 = arith.constant 0 : index
    %c0_16 = arith.constant 0 : index
    %c0_17 = arith.constant 0 : index
    %16 = vector.load %arg16[%c0_15, %c0_16, %c0_17] : memref<12x28x32xf32, #tpu.memory_space<vmem>>, vector<8x24x32xf32>
    %c0_18 = arith.constant 0 : index
    %c0_19 = arith.constant 0 : index
    %c0_20 = arith.constant 0 : index
    %17 = vector.load %arg17[%c0_18, %c0_19, %c0_20] : memref<8x24x288xf32, #tpu.memory_space<vmem>>, vector<8x24x32xf32>
    tpu.vector_store %arg17[%c0_18, %c0_19, %c0_20], %16 {strides = array<i32>} : memref<8x24x288xf32, #tpu.memory_space<vmem>>, vector<8x24x32xf32>,
    %c0_21 = arith.constant 0 : index
    %c2 = arith.constant 2 : index
    %c0_22 = arith.constant 0 : index
    %18 = vector.load %arg16[%c0_21, %c2, %c0_22] : memref<12x28x32xf32, #tpu.memory_space<vmem>>, vector<8x24x32xf32>
    %c0_23 = arith.constant 0 : index
    %c0_24 = arith.constant 0 : index
    %c32 = arith.constant 32 : index
    %19 = vector.load %arg17[%c0_23, %c0_24, %c32] : memref<8x24x288xf32, #tpu.memory_space<vmem>>, vector<8x24x32xf32>
    tpu.vector_store %arg17[%c0_23, %c0_24, %c32], %18 {strides = array<i32>} : memref<8x24x288xf32, #tpu.memory_space<vmem>>, vector<8x24x32xf32>,
    %c0_25 = arith.constant 0 : index
    %c4 = arith.constant 4 : index
    %c0_26 = arith.constant 0 : index
    %20 = vector.load %arg16[%c0_25, %c4, %c0_26] : memref<12x28x32xf32, #tpu.memory_space<vmem>>, vector<8x24x32xf32>
    %c0_27 = arith.constant 0 : index
    %c0_28 = arith.constant 0 : index
    %c64 = arith.constant 64 : index
    %21 = vector.load %arg17[%c0_27, %c0_28, %c64] : memref<8x24x288xf32, #tpu.memory_space<vmem>>, vector<8x24x32xf32>
    tpu.vector_store %arg17[%c0_27, %c0_28, %c64], %20 {strides = array<i32>} : memref<8x24x288xf32, #tpu.memory_space<vmem>>, vector<8x24x32xf32>,
    %c2_29 = arith.constant 2 : index
    %c0_30 = arith.constant 0 : index
    %c0_31 = arith.constant 0 : index
    %22 = vector.load %arg16[%c2_29, %c0_30, %c0_31] : memref<12x28x32xf32, #tpu.memory_space<vmem>>, vector<8x24x32xf32>
    %c0_32 = arith.constant 0 : index
    %c0_33 = arith.constant 0 : index
    %c96 = arith.constant 96 : index
    %23 = vector.load %arg17[%c0_32, %c0_33, %c96] : memref<8x24x288xf32, #tpu.memory_space<vmem>>, vector<8x24x32xf32>
    tpu.vector_store %arg17[%c0_32, %c0_33, %c96], %22 {strides = array<i32>} : memref<8x24x288xf32, #tpu.memory_space<vmem>>, vector<8x24x32xf32>,
    %c2_34 = arith.constant 2 : index
    %c2_35 = arith.constant 2 : index
    %c0_36 = arith.constant 0 : index
    %24 = vector.load %arg16[%c2_34, %c2_35, %c0_36] : memref<12x28x32xf32, #tpu.memory_space<vmem>>, vector<8x24x32xf32>
    %c0_37 = arith.constant 0 : index
    %c0_38 = arith.constant 0 : index
    %c128 = arith.constant 128 : index
    %25 = vector.load %arg17[%c0_37, %c0_38, %c128] : memref<8x24x288xf32, #tpu.memory_space<vmem>>, vector<8x24x32xf32>
    tpu.vector_store %arg17[%c0_37, %c0_38, %c128], %24 {strides = array<i32>} : memref<8x24x288xf32, #tpu.memory_space<vmem>>, vector<8x24x32xf32>,
    %c2_39 = arith.constant 2 : index
    %c4_40 = arith.constant 4 : index
    %c0_41 = arith.constant 0 : index
    %26 = vector.load %arg16[%c2_39, %c4_40, %c0_41] : memref<12x28x32xf32, #tpu.memory_space<vmem>>, vector<8x24x32xf32>
    %c0_42 = arith.constant 0 : index
    %c0_43 = arith.constant 0 : index
    %c160 = arith.constant 160 : index
    %27 = vector.load %arg17[%c0_42, %c0_43, %c160] : memref<8x24x288xf32, #tpu.memory_space<vmem>>, vector<8x24x32xf32>
    tpu.vector_store %arg17[%c0_42, %c0_43, %c160], %26 {strides = array<i32>} : memref<8x24x288xf32, #tpu.memory_space<vmem>>, vector<8x24x32xf32>,
    %c4_44 = arith.constant 4 : index
    %c0_45 = arith.constant 0 : index
    %c0_46 = arith.constant 0 : index
    %28 = vector.load %arg16[%c4_44, %c0_45, %c0_46] : memref<12x28x32xf32, #tpu.memory_space<vmem>>, vector<8x24x32xf32>
    %c0_47 = arith.constant 0 : index
    %c0_48 = arith.constant 0 : index
    %c192 = arith.constant 192 : index
    %29 = vector.load %arg17[%c0_47, %c0_48, %c192] : memref<8x24x288xf32, #tpu.memory_space<vmem>>, vector<8x24x32xf32>
    tpu.vector_store %arg17[%c0_47, %c0_48, %c192], %28 {strides = array<i32>} : memref<8x24x288xf32, #tpu.memory_space<vmem>>, vector<8x24x32xf32>,
    %c4_49 = arith.constant 4 : index
    %c2_50 = arith.constant 2 : index
    %c0_51 = arith.constant 0 : index
    %30 = vector.load %arg16[%c4_49, %c2_50, %c0_51] : memref<12x28x32xf32, #tpu.memory_space<vmem>>, vector<8x24x32xf32>
    %c0_52 = arith.constant 0 : index
    %c0_53 = arith.constant 0 : index
    %c224 = arith.constant 224 : index
    %31 = vector.load %arg17[%c0_52, %c0_53, %c224] : memref<8x24x288xf32, #tpu.memory_space<vmem>>, vector<8x24x32xf32>
    tpu.vector_store %arg17[%c0_52, %c0_53, %c224], %30 {strides = array<i32>} : memref<8x24x288xf32, #tpu.memory_space<vmem>>, vector<8x24x32xf32>,
    %c4_54 = arith.constant 4 : index
    %c4_55 = arith.constant 4 : index
    %c0_56 = arith.constant 0 : index
    %32 = vector.load %arg16[%c4_54, %c4_55, %c0_56] : memref<12x28x32xf32, #tpu.memory_space<vmem>>, vector<8x24x32xf32>
    %c0_57 = arith.constant 0 : index
    %c0_58 = arith.constant 0 : index
    %c256 = arith.constant 256 : index
    %33 = vector.load %arg17[%c0_57, %c0_58, %c256] : memref<8x24x288xf32, #tpu.memory_space<vmem>>, vector<8x24x32xf32>
    tpu.vector_store %arg17[%c0_57, %c0_58, %c256], %32 {strides = array<i32>} : memref<8x24x288xf32, #tpu.memory_space<vmem>>, vector<8x24x32xf32>,
    %c0_59 = arith.constant 0 : index
    %c0_60 = arith.constant 0 : index
    %c0_61 = arith.constant 0 : index
    %34 = vector.load %arg17[%c0_59, %c0_60, %c0_61] : memref<8x24x288xf32, #tpu.memory_space<vmem>>, vector<8x24x288xf32>
    %c0_62 = arith.constant 0 : index
    %c0_63 = arith.constant 0 : index
    %35 = vector.load %arg6[%c0_62, %c0_63] : memref<288x32xf32, #tpu.memory_space<vmem>>, vector<288x32xf32>
    "tpu.trace_start"() <{level = 10 : i32, message = "hwk,kp->hwp"}> : () -> ()
    %cst_64 = arith.constant dense<0.000000e+00> : vector<8x24x32xf32>
    %36 = tpu.matmul %34, %35, %cst_64 {dimension_numbers = #tpu.dot_dimension_numbers<[2], [0], [0, 1], [1], [0, 0, 0, 1, 1, 1], [], []>} : vector<8x24x288xf32>, vector<288x32xf32>, vector<8x24x32xf32> -> vector<8x24x32xf32>
    "tpu.trace_stop"() : () -> ()
    %c0_65 = arith.constant 0 : index
    %c0_66 = arith.constant 0 : index
    %c0_67 = arith.constant 0 : index
    %37 = vector.load %arg7[%c0_65, %c0_66, %c0_67] : memref<1x1x32xf32, #tpu.memory_space<vmem>>, vector<1x1x32xf32>
    %38 = vector.broadcast %37 : vector<1x1x32xf32> to vector<8x24x32xf32>
    %39 = arith.mulf %36, %38 : vector<8x24x32xf32>
    %c0_68 = arith.constant 0 : index
    %c0_69 = arith.constant 0 : index
    %c0_70 = arith.constant 0 : index
    %40 = vector.load %arg8[%c0_68, %c0_69, %c0_70] : memref<1x1x32xf32, #tpu.memory_space<vmem>>, vector<1x1x32xf32>
    %41 = vector.broadcast %40 : vector<1x1x32xf32> to vector<8x24x32xf32>
    %42 = arith.addf %39, %41 : vector<8x24x32xf32>
    %cst_71 = arith.constant 0.000000e+00 : f32
    %43 = vector.broadcast %cst_71 : f32 to vector<8x24x32xf32>
    %44 = arith.maximumf %42, %43 : vector<8x24x32xf32>
    %c8_i32 = arith.constant 8 : i32
    %45 = arith.muli %arg1, %c8_i32 : i32
    %46 = tpu.assume_multiple %45, 8 : i32
    %c0_72 = arith.constant 0 : index
    %47 = arith.index_cast %46 : i32 to index
    %c0_73 = arith.constant 0 : index
    %c0_74 = arith.constant 0 : index
    %48 = vector.load %arg2[%c0_72, %47, %c0_73, %c0_74] : memref<1x24x24x64xf32, #tpu.memory_space<vmem>>, vector<1x8x24x64xf32>
    %49 = vector.shape_cast %48 : vector<1x8x24x64xf32> to vector<8x24x64xf32>
    %c0_75 = arith.constant 0 : index
    %c0_76 = arith.constant 0 : index
    %50 = vector.load %arg9[%c0_75, %c0_76] : memref<32x128xf32, #tpu.memory_space<vmem>>, vector<32x128xf32>
    "tpu.trace_start"() <{level = 10 : i32, message = "hwp,pq->hwq"}> : () -> ()
    %cst_77 = arith.constant dense<0.000000e+00> : vector<8x24x128xf32>
    %51 = tpu.matmul %44, %50, %cst_77 {dimension_numbers = #tpu.dot_dimension_numbers<[2], [0], [0, 1], [1], [0, 0, 0, 1, 1, 1], [], []>} : vector<8x24x32xf32>, vector<32x128xf32>, vector<8x24x128xf32> -> vector<8x24x128xf32>
    "tpu.trace_stop"() : () -> ()
    %c0_78 = arith.constant 0 : index
    %c0_79 = arith.constant 0 : index
    %c0_80 = arith.constant 0 : index
    %52 = vector.load %arg10[%c0_78, %c0_79, %c0_80] : memref<1x1x128xf32, #tpu.memory_space<vmem>>, vector<1x1x128xf32>
    %53 = vector.broadcast %52 : vector<1x1x128xf32> to vector<8x24x128xf32>
    %54 = arith.mulf %51, %53 : vector<8x24x128xf32>
    %c0_81 = arith.constant 0 : index
    %c0_82 = arith.constant 0 : index
    %c0_83 = arith.constant 0 : index
    %55 = vector.load %arg11[%c0_81, %c0_82, %c0_83] : memref<1x1x128xf32, #tpu.memory_space<vmem>>, vector<1x1x128xf32>
    %56 = vector.broadcast %55 : vector<1x1x128xf32> to vector<8x24x128xf32>
    %57 = arith.addf %54, %56 : vector<8x24x128xf32>
    %c0_84 = arith.constant 0 : index
    %c0_85 = arith.constant 0 : index
    %58 = vector.load %arg12[%c0_84, %c0_85] : memref<64x128xf32, #tpu.memory_space<vmem>>, vector<64x128xf32>
    "tpu.trace_start"() <{level = 10 : i32, message = "hwc,cq->hwq"}> : () -> ()
    %cst_86 = arith.constant dense<0.000000e+00> : vector<8x24x128xf32>
    %59 = tpu.matmul %49, %58, %cst_86 {dimension_numbers = #tpu.dot_dimension_numbers<[2], [0], [0, 1], [1], [0, 0, 0, 1, 1, 1], [], []>} : vector<8x24x64xf32>, vector<64x128xf32>, vector<8x24x128xf32> -> vector<8x24x128xf32>
    "tpu.trace_stop"() : () -> ()
    %c0_87 = arith.constant 0 : index
    %c0_88 = arith.constant 0 : index
    %c0_89 = arith.constant 0 : index
    %60 = vector.load %arg13[%c0_87, %c0_88, %c0_89] : memref<1x1x128xf32, #tpu.memory_space<vmem>>, vector<1x1x128xf32>
    %61 = vector.broadcast %60 : vector<1x1x128xf32> to vector<8x24x128xf32>
    %62 = arith.mulf %59, %61 : vector<8x24x128xf32>
    %c0_90 = arith.constant 0 : index
    %c0_91 = arith.constant 0 : index
    %c0_92 = arith.constant 0 : index
    %63 = vector.load %arg14[%c0_90, %c0_91, %c0_92] : memref<1x1x128xf32, #tpu.memory_space<vmem>>, vector<1x1x128xf32>
    %64 = vector.broadcast %63 : vector<1x1x128xf32> to vector<8x24x128xf32>
    %65 = arith.addf %62, %64 : vector<8x24x128xf32>
    %66 = arith.addf %57, %65 : vector<8x24x128xf32>
    %cst_93 = arith.constant 0.000000e+00 : f32
    %67 = vector.broadcast %cst_93 : f32 to vector<8x24x128xf32>
    %68 = arith.maximumf %66, %67 : vector<8x24x128xf32>
    %c0_94 = arith.constant 0 : index
    %c0_95 = arith.constant 0 : index
    %c0_96 = arith.constant 0 : index
    %c0_97 = arith.constant 0 : index
    %69 = vector.load %arg15[%c0_94, %c0_95, %c0_96, %c0_97] : memref<1x8x24x128xf32, #tpu.memory_space<vmem>>, vector<1x8x24x128xf32>
    %70 = vector.shape_cast %69 : vector<1x8x24x128xf32> to vector<8x24x128xf32>
    %71 = vector.shape_cast %68 : vector<8x24x128xf32> to vector<1x8x24x128xf32>
    tpu.vector_store %arg15[%c0_94, %c0_95, %c0_96, %c0_97], %71 {strides = array<i32>} : memref<1x8x24x128xf32, #tpu.memory_space<vmem>>, vector<1x8x24x128xf32>,
    return
  }
  func.func @transform_0(%arg0: i32, %arg1: i32) -> (i32, i32, i32, i32) {
    %c0_i32 = arith.constant 0 : i32
    %c0_i32_0 = arith.constant 0 : i32
    %c0_i32_1 = arith.constant 0 : i32
    %c0_i32_2 = arith.constant 0 : i32
    return %arg0, %c0_i32, %c0_i32_0, %c0_i32_1 : i32, i32, i32, i32
  }
  func.func @transform_1(%arg0: i32, %arg1: i32) -> (i32, i32) {
    %c0_i32 = arith.constant 0 : i32
    %c0_i32_0 = arith.constant 0 : i32
    %c0_i32_1 = arith.constant 0 : i32
    return %c0_i32, %c0_i32_0 : i32, i32
  }
  func.func @transform_2(%arg0: i32, %arg1: i32) -> (i32, i32, i32) {
    %c0_i32 = arith.constant 0 : i32
    %c0_i32_0 = arith.constant 0 : i32
    %c0_i32_1 = arith.constant 0 : i32
    %c0_i32_2 = arith.constant 0 : i32
    return %c0_i32, %c0_i32_0, %c0_i32_1 : i32, i32, i32
  }
  func.func @transform_3(%arg0: i32, %arg1: i32) -> (i32, i32, i32) {
    %c0_i32 = arith.constant 0 : i32
    %c0_i32_0 = arith.constant 0 : i32
    %c0_i32_1 = arith.constant 0 : i32
    %c0_i32_2 = arith.constant 0 : i32
    return %c0_i32, %c0_i32_0, %c0_i32_1 : i32, i32, i32
  }
  func.func @transform_4(%arg0: i32, %arg1: i32) -> (i32, i32) {
    %c0_i32 = arith.constant 0 : i32
    %c0_i32_0 = arith.constant 0 : i32
    %c0_i32_1 = arith.constant 0 : i32
    return %c0_i32, %c0_i32_0 : i32, i32
  }
  func.func @transform_5(%arg0: i32, %arg1: i32) -> (i32, i32, i32) {
    %c0_i32 = arith.constant 0 : i32
    %c0_i32_0 = arith.constant 0 : i32
    %c0_i32_1 = arith.constant 0 : i32
    %c0_i32_2 = arith.constant 0 : i32
    return %c0_i32, %c0_i32_0, %c0_i32_1 : i32, i32, i32
  }
  func.func @transform_6(%arg0: i32, %arg1: i32) -> (i32, i32, i32) {
    %c0_i32 = arith.constant 0 : i32
    %c0_i32_0 = arith.constant 0 : i32
    %c0_i32_1 = arith.constant 0 : i32
    %c0_i32_2 = arith.constant 0 : i32
    return %c0_i32, %c0_i32_0, %c0_i32_1 : i32, i32, i32
  }
  func.func @transform_7(%arg0: i32, %arg1: i32) -> (i32, i32) {
    %c0_i32 = arith.constant 0 : i32
    %c0_i32_0 = arith.constant 0 : i32
    %c0_i32_1 = arith.constant 0 : i32
    return %c0_i32, %c0_i32_0 : i32, i32
  }
  func.func @transform_8(%arg0: i32, %arg1: i32) -> (i32, i32, i32) {
    %c0_i32 = arith.constant 0 : i32
    %c0_i32_0 = arith.constant 0 : i32
    %c0_i32_1 = arith.constant 0 : i32
    %c0_i32_2 = arith.constant 0 : i32
    return %c0_i32, %c0_i32_0, %c0_i32_1 : i32, i32, i32
  }
  func.func @transform_9(%arg0: i32, %arg1: i32) -> (i32, i32, i32) {
    %c0_i32 = arith.constant 0 : i32
    %c0_i32_0 = arith.constant 0 : i32
    %c0_i32_1 = arith.constant 0 : i32
    %c0_i32_2 = arith.constant 0 : i32
    return %c0_i32, %c0_i32_0, %c0_i32_1 : i32, i32, i32
  }
  func.func @transform_10(%arg0: i32, %arg1: i32) -> (i32, i32) {
    %c0_i32 = arith.constant 0 : i32
    %c0_i32_0 = arith.constant 0 : i32
    %c0_i32_1 = arith.constant 0 : i32
    return %c0_i32, %c0_i32_0 : i32, i32
  }
  func.func @transform_11(%arg0: i32, %arg1: i32) -> (i32, i32, i32) {
    %c0_i32 = arith.constant 0 : i32
    %c0_i32_0 = arith.constant 0 : i32
    %c0_i32_1 = arith.constant 0 : i32
    %c0_i32_2 = arith.constant 0 : i32
    return %c0_i32, %c0_i32_0, %c0_i32_1 : i32, i32, i32
  }
  func.func @transform_12(%arg0: i32, %arg1: i32) -> (i32, i32, i32) {
    %c0_i32 = arith.constant 0 : i32
    %c0_i32_0 = arith.constant 0 : i32
    %c0_i32_1 = arith.constant 0 : i32
    %c0_i32_2 = arith.constant 0 : i32
    return %c0_i32, %c0_i32_0, %c0_i32_1 : i32, i32, i32
  }
  func.func @transform_13(%arg0: i32, %arg1: i32) -> (i32, i32, i32, i32) {
    %c0_i32 = arith.constant 0 : i32
    %c0_i32_0 = arith.constant 0 : i32
    %c0_i32_1 = arith.constant 0 : i32
    return %arg0, %arg1, %c0_i32, %c0_i32_0 : i32, i32, i32, i32
  }
}

</mosaic_0001>

<bundles_post_ra>
// kernel: tpu_custom_call.1
= control target key start
LH: loop header
LB: loop body
LE: loop exit
PB: predicated region body
PF: predicated region fallthrough
CT: control target
= control target key end

     0   :  { %s7926_s0 = inlined_call_operand.hbm [shape: f32[2,24,24,64], index: 0, kind: input, shape index: {}]   ;;  %s7927_s1 = inlined_call_operand.vmem [shape: f32[64,32], index: 1, kind: input, shape index: {}]   ;;  %s7928_s2 = inlined_call_operand.vmem [shape: f32[1,1,32], index: 2, kind: input, shape index: {}]   ;;  %s7929_s3 = inlined_call_operand.vmem [shape: f32[1,1,32], index: 3, kind: input, shape index: {}]   ;;  %s7930_s4 = inlined_call_operand.vmem [shape: f32[288,32], index: 4, kind: input, shape index: {}]   ;;  %s7931_s5 = inlined_call_operand.vmem [shape: f32[1,1,32], index: 5, kind: input, shape index: {}]   ;;  %s7932_s6 = inlined_call_operand.vmem [shape: f32[1,1,32], index: 6, kind: input, shape index: {}]   ;;  %s7933_s7 = inlined_call_operand.vmem [shape: f32[32,128], index: 7, kind: input, shape index: {}]   ;;  %s7934_s8 = inlined_call_operand.vmem [shape: f32[1,1,128], index: 8, kind: input, shape index: {}]   ;;  %s7935_s9 = inlined_call_operand.vmem [shape: f32[1,1,128], index: 9, kind: input, shape index: {}]   ;;  %s7936_s10 = inlined_call_operand.vmem [shape: f32[64,128], index: 10, kind: input, shape index: {}]   ;;  %s7937_s11 = inlined_call_operand.vmem [shape: f32[1,1,128], index: 11, kind: input, shape index: {}]   ;;  %s7938_s12 = inlined_call_operand.vmem [shape: f32[1,1,128], index: 12, kind: input, shape index: {}]   ;;  %s7939_s13 = inlined_call_operand.hbm [shape: f32[2,24,24,128], index: 13, kind: output, shape index: {}]  }
   0x1   :  { %7948 = sst [smem:[#allocation17_spill]] %s7934_s8 }
   0x2   :  { %7949 = sst [smem:[#allocation18_spill]] %s7935_s9 }
   0x3   :  { %7950 = sst [smem:[#allocation19_spill]] %s7937_s11 }
   0x4   :  { %7951 = sst [smem:[#allocation20_spill]] %s7938_s12 }
   0x5   :  { %7952 = sst [smem:[#allocation21_spill]] %s7939_s13 }
   0x6   :  { %18 = vsyncpa [#allocation5], 0 }
   0x7   :  { %20 = vsyncpa [#allocation5 + $0x1], 0 }
   0x8   :  { %21 = vsyncpa [#allocation6], 0 }
   0x9   :  { %23 = vsyncpa [#allocation6 + $0x1], 0  ;;  %s5808_s25 = smov 0   ;;  %s5810_s26 = smov 0  }
   0xa   :  { %s5812_s27 = smov 0   ;;  %s5814_s28 = smov 0  }
   0xb   :  { %s5816_s29 = smov 0   ;;  %s5818_s30 = smov 0  }
   0xc   :  { %s5820_s14 = smov 0   ;;  %s5822_s15 = smov 0  }
   0xd   :  { %s5824_s16 = smov 0   ;;  %s5826_s17 = smov 0  }
   0xe   :  { %s5828_s18 = smov 0  }
   0xf LB: > { %7953 = sst [smem:[#allocation10_spill]] %s5705_s30  ;;  %s4543_s19 = sadd.s32 4294967295, %s5725_s18   ;;  %s5725_s18 = sphi %s5828_s18, %s29_s18   ;;  %s5721_s17 = sphi %s5826_s17, %s7980_s17   ;;  %s5717_s16 = sphi %s5824_s16, %s7979_s16   ;;  %s5713_s15 = sphi %s5822_s15, %s7978_s15   ;;  %s5709_s14 = sphi %s5820_s14, %s7977_s14   ;;  %s5705_s30 = sphi %s5818_s30, %s7976_s30   ;;  %s5701_s29 = sphi %s5816_s29, %s7985_s29   ;;  %s5697_s28 = sphi %s5814_s28, %s7984_s28   ;;  %s5693_s27 = sphi %s5812_s27, %s7983_s27   ;;  %s5689_s26 = sphi %s5810_s26, %s7982_s26   ;;  %s5685_s25 = sphi %s5808_s25, %s7981_s25  }
  0x10   : > { %7954 = sst [smem:[#allocation11_spill]] %s5713_s15  ;;  %s4544_s20 = sadd.s32 4294967294, %s5725_s18  }
  0x11   : > { %7955 = sst [smem:[#allocation12_spill]] %s5717_s16  ;;  %s38_s21 = sadd.s32 1, %s5717_s16 }
  0x12   : > { %7956 = sst [smem:[#allocation13_spill]] %s5721_s17  ;;  %s41_s22 = sadd.s32 1, %s5721_s17 }
  0x13   : > { %p39_p0 = scmp.ge.s32.totalorder %s38_s21, 3  ;;  %s48_s23 = sadd.s32 1, %s5705_s30 }
  0x14   : > { %p55_p1 = scmp.ne.s32.totalorder %s5705_s30, %s5701_s29  ;;  %p56_p2 = scmp.eq.s32.totalorder %s5725_s18, 0 }
  0x15   : > { %s7987_s21 = smov (%p39_p0, %s38_s21), 0  ;;  %s7989_s22 = smov (!%p39_p0, %s41_s22), %s5721_s17 }
  0x16   : > { %7957 = sst [smem:[#allocation14_spill]] %s7987_s21  ;;  %p5872_p3 = por %p56_p2, %p55_p1 }
  0x17   : > { %p61_p4 = scmp.ne.s32.totalorder %s5701_s29, %s5697_s28  ;;  %p43_p5 = scmp.ge.s32.totalorder %s7989_s22, 2 }
  0x18   : > { %p62_p6 = scmp.eq.s32.totalorder %s4543_s19, 0  ;;  %s324_s13 = ssub.s32 %s5717_s16, %s7987_s21 }
  0x19   : > { %s328_s15 = sadd.s32 1, %s5693_s27  ;;  %s7991_s22 = smov (%p43_p5, %s7989_s22), 0 }
  0x1a   : > { %7959 = sst [smem:[#allocation15_spill]] %s7991_s22  ;;  %p5882_p7 = por %p62_p6, %p61_p4 }
  0x1b   : > { %p338_p8 = scmp.ne.s32.totalorder %s5693_s27, %s5689_s26  ;;  %s45_s9 = ssub.s32 %s5721_s17, %s7991_s22 }
  0x1c   : > { %p339_p9 = scmp.eq.s32.totalorder %s4543_s19, 5  ;;  %p46_p10 = scmp.eq.s32.totalorder %s45_s9, 0 }
  0x1d   : > { %s325_s28 = sor.u32 %s324_s13, %s45_s9  ;;  %p344_p13 = scmp.ne.s32.totalorder %s5689_s26, %s5685_s25 }
  0x1e   : > { %p326_p11 = scmp.eq.s32.totalorder %s325_s28, 0  ;;  %p5890_p12 = por %p339_p9, %p338_p8 }
  0x1f   : > { %s5895_s16 = scalar_select %p46_p10, %s5705_s30, %s48_s23  }
  0x20   : > { %s7961_s21 = scalar_select %p5890_p12, 1, 0 }
  0x21   : > { %7962 = sst [smem:[#allocation16_spill]] %s5895_s16  ;;  %p345_p0 = scmp.eq.s32.totalorder %s4544_s20, 5 }
  0x22   : > { %s5898_s11 = scalar_select %p326_p11, %s5693_s27, %s328_s15  }
  0x23   : > { %p5474_p1 = scmp.lt.s32.totalorder %s5725_s18, 6  ;;  %p5903_p2 = por %p345_p0, %p344_p13 }
  0x24   : > { %s401_s19 = sand.u32 1, %s5705_s30   ;;  %s5457_s9 = smul.u32 9216, %s5721_s17 }
  0x25   : > { %s7963_s8 = scalar_select %p5903_p2, 1, 0 }
  0x26   : > { %s5456_s22 = smul.u32 576, %s401_s19  ;;  %p5911_p4 = pnand %p5474_p1, %p5872_p3 }
  0x27   : > { %s5918_s15 = scalar_lea.hbm %s7926_s0, %s5457_s9  ;;  %s5923_s24 = scalar_lea.sflag [#allocation5], %s401_s19 }
  0x28   : > { %s405_s20 = scalar_lea.vmem [#allocation4], %s5456_s22  ;;  %s5573_s17 = scalar_lea.hbm %s5918_s15, 9216 }
  0x29   : > { %s412_s16 = sshll.u32 %s405_s20, 4  ;;  %p5574_p3 = scmp.ne.s32.totalorder %s5918_s15, %s5573_s17  ;;  %s5920_s16 = int_to_ptr.vmem [resolvable:$true] %s412_s16 }
  0x2a   : > { %p5575_p6 = pneg %p5911_p4  ;;  %s5578_s23 = scalar_lea.hbm %s7926_s0, 18432 }
  0x2b   : > { %p5579_p10 = scmp.lt.u32.totalorder %s5918_s15, %s7926_s0  ;;  %p5580_p11 = scmp.lt.u32.totalorder %s5578_s23, %s5573_s17 }
  0x2c   : > { %p5576_p8 = pnand %p5575_p6, %p5574_p3  ;;  %p5582_p0 = scmp.lt.u32.totalorder %s5573_s17, %s5918_s15 }
  0x2d   : > { %p5581_p13 = por %p5580_p11, %p5579_p10 }
  0x2e   : > { %p5577_p9 = pneg %p5576_p8 }
  0x2f   : > { %p5583_p1 = por %p5582_p0, %p5581_p13 }
  0x31   : > { %p5584_p5 = pnand %p5583_p1, %p5577_p9 }
  0x33   : > { %5587 = shalt.err (!%p5584_p5)
}
  0x34   : > { %s5588_s19 = scalar_lea.vmem %s5920_s16, 9216  ;;  %s5727_s20 = smov [#allocation4]  }
  0x35   : > { %p5589_p3 = scmp.ne.s32.totalorder %s5920_s16, %s5588_s19  ;;  %s5593_s9 = sshll.u32 %s5727_s20, 4  ;;  %s5594_s9 = int_to_ptr.vmem [resolvable:$false] %s5593_s9 }
  0x36   : > { %s5595_s30 = scalar_lea.vmem %s5594_s9, 18432  ;;  %p5596_p12 = scmp.lt.s32.totalorder %s5920_s16, %s5594_s9 }
  0x37   : > { %p5591_p8 = pnand %p5589_p3, %p5575_p6  ;;  %p5597_p10 = scmp.lt.s32.totalorder %s5595_s30, %s5588_s19 }
  0x39   : > { %p5592_p2 = pneg %p5591_p8  ;;  %p5598_p11 = por %p5597_p10, %p5596_p12 }
  0x3b   : > { %p5599_p13 = pnand %p5598_p11, %p5592_p2 }
  0x3d   : > { %5602 = shalt.err (!%p5599_p13)
}
  0x3e   : > { %s5728_s17 = smov 128   ;;  %s5729_s28 = smov 8  }
  0x3f   : > { %5469 = dma.hbm_to_vmem [thread:$0]  (!%p5911_p4), %s5918_s15, 9216, %s5920_s16, %s5923_s24, %s5728_s17, %s5728_s17, %s5729_s28  }
  0x40   : > { %p420_p5 = scmp.lt.s32.totalorder %s5725_s18, 7  ;;  %p7965_p6 = scmp.ge.s32.totalorder %s5725_s18, 1 }
  0x42   : > { %p421_p9 = pnand %p7965_p6, %p420_p5 }
  0x43   : > { %s426_s23 = sand.u32 (!%p421_p9), 1, %s5701_s29  }
  0x44   : > { %424 = sbr.rel (%p421_p9) target bundleno = 1798 (0x706), region = 72  ;;  %s427_s19 = scalar_lea.sflag (!%p421_p9), [#allocation5], %s426_s23 }
  0x45   : > { %s5458_s22 = smul.u32 (!%p421_p9), 576, %s426_s23 }
  0x47   : > { %s5955_s20 = scalar_lea.vmem (!%p421_p9), [#allocation4], %s5458_s22 }
  0x4b   : > { %5676 = dma.done.wait (%p5882_p7), %s427_s19, 9216  }
  0x4c   : > { %5678 = vsyncadd (%p5882_p7), %s427_s19, 4294958080  ;;  %s7947_s16 = sand.u32 1, %s5689_s26   ;;  %vm484_vm0 = vcmask 261120   ;;  %p534_p12 = scmp.gt.s32.totalorder %s5709_s14, 0  ;;  %vm488_vm1 = vcmask 257024   ;;  %v5730_v0 = vmov 0.0  }
  0x4d   : > { %s5965_s13 = smul.u32 192, %s7947_s16  ;;  %485 = vst.msk [vmem:[#allocation2] sm:$0xff] %vm484_vm0, %v5730_v0  ;;  %486 = vst.msk [vmem:[#allocation2 + $0x8] sm:$0xff] %vm484_vm0, %v5730_v0  ;;  %p535_p7 = scmp.lt.s32.totalorder %s5709_s14, 2  ;;  %v6023_v1 = vld [vmem:[%s7927_s1] sm:$0xff]  ;;  %v6028_v2 = vld [vmem:[%s7927_s1 + $0x8] sm:$0xff] }
  0x4e   : > { %487 = vst.msk [vmem:[#allocation2 + $0x10] sm:$0xff] %vm484_vm0, %v5730_v0  ;;  %490 = vst.msk [vmem:[#allocation2 + $0x20] sm:$0xff] %vm484_vm0, %v5730_v0  ;;  %v6033_v3 = vld [vmem:[%s7927_s1 + $0x10] sm:$0xff]  ;;  %v6038_v4 = vld [vmem:[%s7927_s1 + $0x18] sm:$0xff] }
  0x4f   : > { %491 = vst.msk [vmem:[#allocation2 + $0x28] sm:$0xff] %vm484_vm0, %v5730_v0  ;;  %492 = vst.msk [vmem:[#allocation2 + $0x30] sm:$0xff] %vm484_vm0, %v5730_v0  ;;  %p536_p2 = pnand %p535_p7, %p534_p12  ;;  %v6043_v5 = vld [vmem:[%s7927_s1 + $0x20] sm:$0xff]  ;;  %v6048_v6 = vld [vmem:[%s7927_s1 + $0x28] sm:$0xff]  ;;  %s6071_s12 = scalar_lea.vmem [#allocation7], %s5965_s13 }
  0x50   : > { %494 = vst.msk [vmem:[#allocation2 + $0x40] sm:$0xff] %vm484_vm0, %v5730_v0  ;;  %495 = vst.msk [vmem:[#allocation2 + $0x48] sm:$0xff] %vm484_vm0, %v5730_v0  ;;  %v6053_v7 = vld [vmem:[%s7927_s1 + $0x30] sm:$0xff]  ;;  %v6058_v8 = vld [vmem:[%s7927_s1 + $0x38] sm:$0xff]  ;;  %v5304_v11 = vpack.c.bf16 (!%p536_p2), %v6028_v2, %v6023_v1  ;;  %v5308_v12 = vpack.c.bf16 (!%p536_p2), %v6038_v4, %v6033_v3  ;;  %s4549_s15 = sshll.u32 (!%p536_p2), %s5709_s14, 3  ;;  %vm580_vm2 = vcmask (!%p536_p2), 523264   ;;  %v5312_v13 = vpack.c.bf16 (!%p536_p2), %v6048_v6, %v6043_v5 }
  0x51   : > { %496 = vst.msk [vmem:[#allocation2 + $0x50] sm:$0xff] %vm484_vm0, %v5730_v0  ;;  %498 = vst.msk [vmem:[#allocation2 + $0x60] sm:$0xff] %vm484_vm0, %v5730_v0  ;;  %v6063_v9 = vld [vmem:[%s7928_s2] sm:$0x1]  ;;  %s4550_s24 = sadd.s32 (!%p536_p2), 4294967294, %s4549_s15  ;;  %v5316_v16 = vpack.c.bf16 (!%p536_p2), %v6058_v8, %v6053_v7  ;;  %v935_v51 = vlaneseq (!%p536_p2) }
  0x52   : > { %499 = vst.msk [vmem:[#allocation2 + $0x68] sm:$0xff] %vm484_vm0, %v5730_v0  ;;  %500 = vst.msk [vmem:[#allocation2 + $0x70] sm:$0xff] %vm484_vm0, %v5730_v0  ;;  %v6068_v10 = vld [vmem:[%s7929_s3] sm:$0x1]  ;;  %5305 = vmatprep.subr.bf16.mxu0 (!%p536_p2), %v5304_v11  ;;  %5432 = vmatprep.subr.bf16.mxu1 (!%p536_p2), %v5304_v11  ;;  %s542_s9 = smul.u32 (!%p536_p2), 24, %s4550_s24 }
  0x53   : > { %502 = vst.msk [vmem:[#allocation2 + $0x80] sm:$0xff] %vm484_vm0, %v5730_v0  ;;  %503 = vst.msk [vmem:[#allocation2 + $0x88] sm:$0xff] %vm484_vm0, %v5730_v0  ;;  %5307 = vmatpush3.bf16.msra.mxu0 (!%p536_p2), %v5304_v11  ;;  %5436 = vmatpush3.bf16.msra.mxu1 (!%p536_p2), %v5304_v11  ;;  %v936_v52 = vshrl.u32 (!%p536_p2), %v935_v51, 7 }
  0x54   : > { %504 = vst.msk [vmem:[#allocation2 + $0x90] sm:$0xff] %vm484_vm0, %v5730_v0  ;;  %506 = vst.msk [vmem:[#allocation2 + $0xa0] sm:$0xff] %vm484_vm0, %v5730_v0  ;;  %5309 = vmatprep.subr.bf16.mxu0 (!%p536_p2), %v5308_v12  ;;  %5433 = vmatprep.subr.bf16.mxu1 (!%p536_p2), %v5308_v12  ;;  %s6081_s13 = scalar_lea.vmem (!%p536_p2), %s5955_s20, %s542_s9 [#allocation4] }
  0x55   : > { %507 = vst.msk [vmem:[#allocation2 + $0xa8] sm:$0xff] %vm484_vm0, %v5730_v0  ;;  %508 = vst.msk [vmem:[#allocation2 + $0xb0] sm:$0xff] %vm484_vm0, %v5730_v0  ;;  %v544_v14 = vld [vmem:[%s6081_s13] sm:$0xff] (!%p536_p2)  ;;  %v562_v15 = vld [vmem:[%s6081_s13 + $0x90] sm:$0xff] (!%p536_p2)  ;;  %v937_v53 = vsub.s32 (!%p536_p2), 0, %v936_v52 }
  0x56   : > { %510 = vst.msk [vmem:[#allocation2 + $0xc0] sm:$0xff] %vm484_vm0, %v5730_v0  ;;  %511 = vst.msk [vmem:[#allocation2 + $0xc8] sm:$0xff] %vm484_vm0, %v5730_v0  ;;  %4988 = vmatprep.mubr.msk.f32.mxu0 (!%p536_p2), %vm580_vm2, %v544_v14  ;;  %5015 = vmatprep.mubr.msk.f32.mxu1 (!%p536_p2), %vm580_vm2, %v562_v15  ;;  %v545_v17 = vld [vmem:[%s6081_s13 + $0x8] sm:$0xff] (!%p536_p2)  ;;  %v563_v18 = vld [vmem:[%s6081_s13 + $0x98] sm:$0xff] (!%p536_p2) }
  0x57   : > { %512 = vst.msk [vmem:[#allocation2 + $0xd0] sm:$0xff] %vm484_vm0, %v5730_v0  ;;  %514 = vst.msk [vmem:[#allocation2 + $0xe0] sm:$0xff] %vm484_vm0, %v5730_v0  ;;  %5311 = vmatpush3.bf16.msra.mxu0 (!%p536_p2), %v5308_v12  ;;  %5437 = vmatpush3.bf16.msra.mxu1 (!%p536_p2), %v5308_v12  ;;  %v546_v19 = vld [vmem:[%s6081_s13 + $0x10] sm:$0xff] (!%p536_p2)  ;;  %v564_v20 = vld [vmem:[%s6081_s13 + $0xa0] sm:$0xff] (!%p536_p2)  ;;  %v6158_v54 = vrot.slane (!%p536_p2), %v6063_v9, %v937_v53  ;;  %v6161_v55 = vrot.slane (!%p536_p2), %v6068_v10, %v937_v53 }
  0x58   : > { %515 = vst.msk [vmem:[#allocation2 + $0xe8] sm:$0xff] %vm484_vm0, %v5730_v0  ;;  %516 = vst.msk [vmem:[#allocation2 + $0xf0] sm:$0xff] %vm484_vm0, %v5730_v0  ;;  %5313 = vmatprep.subr.bf16.mxu0 (!%p536_p2), %v5312_v13  ;;  %5434 = vmatprep.subr.bf16.mxu1 (!%p536_p2), %v5312_v13  ;;  %v547_v21 = vld [vmem:[%s6081_s13 + $0x18] sm:$0xff] (!%p536_p2)  ;;  %v565_v22 = vld [vmem:[%s6081_s13 + $0xa8] sm:$0xff] (!%p536_p2) }
  0x59   : > { %518 = vst.msk [vmem:[#allocation2 + $0x100] sm:$0xff] %vm484_vm0, %v5730_v0  ;;  %519 = vst.msk [vmem:[#allocation2 + $0x108] sm:$0xff] %vm484_vm0, %v5730_v0  ;;  %v548_v23 = vld [vmem:[%s6081_s13 + $0x20] sm:$0xff] (!%p536_p2)  ;;  %v566_v24 = vld [vmem:[%s6081_s13 + $0xb0] sm:$0xff] (!%p536_p2) }
  0x5a   : > { %520 = vst.msk [vmem:[#allocation2 + $0x110] sm:$0xff] %vm484_vm0, %v5730_v0  ;;  %522 = vst.msk [vmem:[#allocation2 + $0x120] sm:$0xff] %vm484_vm0, %v5730_v0  ;;  %v549_v25 = vld [vmem:[%s6081_s13 + $0x28] sm:$0xff] (!%p536_p2)  ;;  %v567_v26 = vld [vmem:[%s6081_s13 + $0xb8] sm:$0xff] (!%p536_p2) }
  0x5b   : > { %523 = vst.msk [vmem:[#allocation2 + $0x128] sm:$0xff] %vm484_vm0, %v5730_v0  ;;  %524 = vst.msk [vmem:[#allocation2 + $0x130] sm:$0xff] %vm484_vm0, %v5730_v0  ;;  %5315 = vmatpush3.bf16.msra.mxu0 (!%p536_p2), %v5312_v13  ;;  %5438 = vmatpush3.bf16.msra.mxu1 (!%p536_p2), %v5312_v13  ;;  %v550_v27 = vld [vmem:[%s6081_s13 + $0x30] sm:$0xff] (!%p536_p2)  ;;  %v568_v28 = vld [vmem:[%s6081_s13 + $0xc0] sm:$0xff] (!%p536_p2) }
  0x5c   : > { %526 = vst.msk [vmem:[#allocation2 + $0x140] sm:$0xff] %vm484_vm0, %v5730_v0  ;;  %527 = vst.msk [vmem:[#allocation2 + $0x148] sm:$0xff] %vm484_vm0, %v5730_v0  ;;  %5317 = vmatprep.subr.bf16.mxu0 (!%p536_p2), %v5316_v16  ;;  %5435 = vmatprep.subr.bf16.mxu1 (!%p536_p2), %v5316_v16  ;;  %v551_v29 = vld [vmem:[%s6081_s13 + $0x38] sm:$0xff] (!%p536_p2)  ;;  %v569_v30 = vld [vmem:[%s6081_s13 + $0xc8] sm:$0xff] (!%p536_p2) }
  0x5d   : > { %528 = vst.msk [vmem:[#allocation2 + $0x150] sm:$0xff] %vm484_vm0, %v5730_v0  ;;  %530 = vst.msk [vmem:[#allocation2 + $0x160] sm:$0xff] %vm484_vm0, %v5730_v0  ;;  %v552_v31 = vld [vmem:[%s6081_s13 + $0x40] sm:$0xff] (!%p536_p2)  ;;  %v570_v32 = vld [vmem:[%s6081_s13 + $0xd0] sm:$0xff] (!%p536_p2) }
  0x5e   : > { %531 = vst.msk [vmem:[#allocation2 + $0x168] sm:$0xff] %vm484_vm0, %v5730_v0  ;;  %532 = vst.msk [vmem:[#allocation2 + $0x170] sm:$0xff] %vm484_vm0, %v5730_v0  ;;  %539 = sbr.rel (%p536_p2) target bundleno = 350 (0x15e), region = 80  ;;  %v553_v33 = vld [vmem:[%s6081_s13 + $0x48] sm:$0xff] (!%p536_p2)  ;;  %v571_v34 = vld [vmem:[%s6081_s13 + $0xd8] sm:$0xff] (!%p536_p2) }
  0x5f   : > { %489 = vst.msk [vmem:[#allocation2 + $0x18] sm:$0xf] %vm488_vm1, %v5730_v0  ;;  %493 = vst.msk [vmem:[#allocation2 + $0x38] sm:$0xf] %vm488_vm1, %v5730_v0  ;;  %5319 = vmatpush3.bf16.msra.mxu0 (!%p536_p2), %v5316_v16  ;;  %5439 = vmatpush3.bf16.msra.mxu1 (!%p536_p2), %v5316_v16  ;;  %v554_v35 = vld [vmem:[%s6081_s13 + $0x50] sm:$0xff] (!%p536_p2)  ;;  %v572_v36 = vld [vmem:[%s6081_s13 + $0xe0] sm:$0xff] (!%p536_p2) }
  0x60   : > { %497 = vst.msk [vmem:[#allocation2 + $0x58] sm:$0xf] %vm488_vm1, %v5730_v0  ;;  %501 = vst.msk [vmem:[#allocation2 + $0x78] sm:$0xf] %vm488_vm1, %v5730_v0  ;;  %v555_v37 = vld [vmem:[%s6081_s13 + $0x58] sm:$0xff] (!%p536_p2)  ;;  %v573_v38 = vld [vmem:[%s6081_s13 + $0xe8] sm:$0xff] (!%p536_p2) }
  0x61   : > { %505 = vst.msk [vmem:[#allocation2 + $0x98] sm:$0xf] %vm488_vm1, %v5730_v0  ;;  %509 = vst.msk [vmem:[#allocation2 + $0xb8] sm:$0xf] %vm488_vm1, %v5730_v0  ;;  %v556_v39 = vld [vmem:[%s6081_s13 + $0x60] sm:$0xff] (!%p536_p2)  ;;  %v574_v40 = vld [vmem:[%s6081_s13 + $0xf0] sm:$0xff] (!%p536_p2) }
  0x62   : > { %513 = vst.msk [vmem:[#allocation2 + $0xd8] sm:$0xf] %vm488_vm1, %v5730_v0  ;;  %517 = vst.msk [vmem:[#allocation2 + $0xf8] sm:$0xf] %vm488_vm1, %v5730_v0  ;;  %4989 = vmatmul.mubr.msk.f32.vlgmr.msra.gmra.mrb[0].mxu0 (!%p536_p2), %vm580_vm2, %v545_v17  ;;  %5016 = vmatmul.mubr.msk.f32.vlgmr.msra.gmra.mrb[0].mxu1 (!%p536_p2), %vm580_vm2, %v563_v18  ;;  %v557_v41 = vld [vmem:[%s6081_s13 + $0x68] sm:$0xff] (!%p536_p2)  ;;  %v575_v42 = vld [vmem:[%s6081_s13 + $0xf8] sm:$0xff] (!%p536_p2) }
  0x63   : > { %521 = vst.msk [vmem:[#allocation2 + $0x118] sm:$0xf] %vm488_vm1, %v5730_v0  ;;  %525 = vst.msk [vmem:[#allocation2 + $0x138] sm:$0xf] %vm488_vm1, %v5730_v0  ;;  %4991 = vmatprep.mubr.msk.f32.mxu0 (!%p536_p2), %vm580_vm2, %v546_v19  ;;  %5018 = vmatprep.mubr.msk.f32.mxu1 (!%p536_p2), %vm580_vm2, %v564_v20  ;;  %v558_v43 = vld [vmem:[%s6081_s13 + $0x70] sm:$0xff] (!%p536_p2)  ;;  %v576_v44 = vld [vmem:[%s6081_s13 + $0x100] sm:$0xff] (!%p536_p2) }
  0x64   : > { %529 = vst.msk [vmem:[#allocation2 + $0x158] sm:$0xf] %vm488_vm1, %v5730_v0  ;;  %533 = vst.msk [vmem:[#allocation2 + $0x178] sm:$0xf] %vm488_vm1, %v5730_v0  ;;  %v559_v45 = vld [vmem:[%s6081_s13 + $0x78] sm:$0xff] (!%p536_p2)  ;;  %v577_v46 = vld [vmem:[%s6081_s13 + $0x108] sm:$0xff] (!%p536_p2) }
  0x65   : > { %v560_v47 = vld [vmem:[%s6081_s13 + $0x80] sm:$0xff]  ;;  %v578_v48 = vld [vmem:[%s6081_s13 + $0x110] sm:$0xff]  ;;  %v561_v49 = vld [vmem:[%s6081_s13 + $0x88] sm:$0xff] }
  0x66   : > { %4992 = vmatmul.mubr.msk.f32.gmra.mrb[2].mxu0 %vm580_vm2, %v547_v21  ;;  %5019 = vmatmul.mubr.msk.f32.gmra.mrb[2].mxu1 %vm580_vm2, %v565_v22  ;;  %v579_v50 = vld [vmem:[%s6081_s13 + $0x118] sm:$0xff] }
  0x67   : > { %4994 = vmatprep.mubr.msk.f32.mxu0 %vm580_vm2, %v548_v23  ;;  %5021 = vmatprep.mubr.msk.f32.mxu1 %vm580_vm2, %v566_v24 }
  0x6a   : > { %4995 = vmatmul.mubr.msk.f32.gmra.mrb[4].mxu0 %vm580_vm2, %v549_v25  ;;  %5022 = vmatmul.mubr.msk.f32.gmra.mrb[4].mxu1 %vm580_vm2, %v567_v26 }
  0x6b   : > { %4997 = vmatprep.mubr.msk.f32.mxu0 %vm580_vm2, %v550_v27  ;;  %5024 = vmatprep.mubr.msk.f32.mxu1 %vm580_vm2, %v568_v28 }
  0x6e   : > { %4998 = vmatmul.mubr.msk.f32.gmra.mrb[6].mxu0 %vm580_vm2, %v551_v29  ;;  %5025 = vmatmul.mubr.msk.f32.gmra.mrb[6].mxu1 %vm580_vm2, %v569_v30 }
  0x6f   : > { %5000 = vmatprep.mubr.msk.f32.mxu0 %vm580_vm2, %v552_v31  ;;  %5027 = vmatprep.mubr.msk.f32.mxu1 %vm580_vm2, %v570_v32 }
  0x72   : > { %5001 = vmatmul.mubr.msk.f32.gmra.mrb[8].mxu0 %vm580_vm2, %v553_v33  ;;  %5028 = vmatmul.mubr.msk.f32.gmra.mrb[8].mxu1 %vm580_vm2, %v571_v34 }
  0x73   : > { %5003 = vmatprep.mubr.msk.f32.mxu0 %vm580_vm2, %v554_v35  ;;  %5030 = vmatprep.mubr.msk.f32.mxu1 %vm580_vm2, %v572_v36 }
  0x76   : > { %5004 = vmatmul.mubr.msk.f32.gmra.mrb[10].mxu0 %vm580_vm2, %v555_v37  ;;  %5031 = vmatmul.mubr.msk.f32.gmra.mrb[10].mxu1 %vm580_vm2, %v573_v38 }
  0x77   : > { %5006 = vmatprep.mubr.msk.f32.mxu0 %vm580_vm2, %v556_v39  ;;  %5033 = vmatprep.mubr.msk.f32.mxu1 %vm580_vm2, %v574_v40 }
  0x7a   : > { %5007 = vmatmul.mubr.msk.f32.gmra.mrb[12].mxu0 %vm580_vm2, %v557_v41  ;;  %5034 = vmatmul.mubr.msk.f32.gmra.mrb[12].mxu1 %vm580_vm2, %v575_v42 }
  0x7b   : > { %5009 = vmatprep.mubr.msk.f32.mxu0 %vm580_vm2, %v558_v43  ;;  %5036 = vmatprep.mubr.msk.f32.mxu1 %vm580_vm2, %v576_v44 }
  0x7e   : > { %5010 = vmatmul.mubr.msk.f32.gmra.mrb[14].mxu0 %vm580_vm2, %v559_v45  ;;  %5037 = vmatmul.mubr.msk.f32.gmra.mrb[14].mxu1 %vm580_vm2, %v577_v46 }
  0x7f   : > { %5012 = vmatprep.mubr.msk.f32.mxu0 %vm580_vm2, %v560_v47  ;;  %5039 = vmatprep.mubr.msk.f32.mxu1 %vm580_vm2, %v578_v48 }
  0x82   : > { %5013 = vmatmul.mubr.msk.f32.gmra.mrb[16].mxu0 %vm580_vm2, %v561_v49  ;;  %5040 = vmatmul.mubr.msk.f32.gmra.mrb[16].mxu1 %vm580_vm2, %v579_v50 }
 0x135   : > { %v4990_v56 = vpop.f32.mrb[0].mxu0  ;;  %v5017_v57 = vpop.f32.mrb[0].mxu1 }
 0x136   : > { %v941_v58 = vmul.f32 %v4990_v56, %v6158_v54  ;;  %v959_v59 = vmul.f32 %v5017_v57, %v6158_v54  ;;  %v755_v60 = vpop.f32.mrb[1].mxu0  ;;  %v845_v61 = vpop.f32.mrb[1].mxu1 }
 0x137   : > { %v940_v62 = vmul.f32 %v6158_v54, %v755_v60  ;;  %v958_v63 = vmul.f32 %v6158_v54, %v845_v61 }
 0x138   : > { %v983_v0 = vadd.f32 %v6161_v55, %v941_v58  ;;  %v1001_v11 = vadd.f32 %v6161_v55, %v959_v59 }
 0x139   : > { %v982_v12 = vadd.f32 %v6161_v55, %v940_v62  ;;  %v1000_v13 = vadd.f32 %v6161_v55, %v958_v63  ;;  %v4993_v14 = vpop.f32.mrb[2].mxu0  ;;  %v5020_v15 = vpop.f32.mrb[2].mxu1 }
 0x13a   : > { %v1019_v16 = vmax.f32 %v983_v0, 0.0  ;;  %v1037_v17 = vmax.f32 %v1001_v11, 0.0  ;;  %v943_v18 = vmul.f32 %v4993_v14, %v6158_v54  ;;  %v961_v19 = vmul.f32 %v5020_v15, %v6158_v54  ;;  %v765_v20 = vpop.f32.mrb[3].mxu0  ;;  %v855_v21 = vpop.f32.mrb[3].mxu1 }
 0x13b   : > { %v1018_v22 = vmax.f32 %v982_v12, 0.0  ;;  %v1036_v23 = vmax.f32 %v1000_v13, 0.0  ;;  %v942_v24 = vmul.f32 %v6158_v54, %v765_v20  ;;  %v960_v25 = vmul.f32 %v6158_v54, %v855_v21 }
 0x13c   : > { %1055 = vst.msk [vmem:[#allocation2 + $0xa] sm:$0xff] %vm484_vm0, %v1019_v16  ;;  %1073 = vst.msk [vmem:[#allocation2 + $0xca] sm:$0xff] %vm484_vm0, %v1037_v17  ;;  %v985_v26 = vadd.f32 %v6161_v55, %v943_v18  ;;  %v1003_v27 = vadd.f32 %v6161_v55, %v961_v19 }
 0x13d   : > { %1054 = vst.msk [vmem:[#allocation2 + $0x2] sm:$0xff] %vm484_vm0, %v1018_v22  ;;  %1072 = vst.msk [vmem:[#allocation2 + $0xc2] sm:$0xff] %vm484_vm0, %v1036_v23  ;;  %v984_v28 = vadd.f32 %v6161_v55, %v942_v24  ;;  %v1002_v29 = vadd.f32 %v6161_v55, %v960_v25  ;;  %v4996_v30 = vpop.f32.mrb[4].mxu0  ;;  %v5023_v31 = vpop.f32.mrb[4].mxu1 }
 0x13e   : > { %v1021_v32 = vmax.f32 %v985_v26, 0.0  ;;  %v1039_v33 = vmax.f32 %v1003_v27, 0.0  ;;  %v945_v34 = vmul.f32 %v4996_v30, %v6158_v54  ;;  %v963_v35 = vmul.f32 %v5023_v31, %v6158_v54  ;;  %v775_v36 = vpop.f32.mrb[5].mxu0  ;;  %v865_v37 = vpop.f32.mrb[5].mxu1 }
 0x13f   : > { %v1020_v38 = vmax.f32 %v984_v28, 0.0  ;;  %v1038_v39 = vmax.f32 %v1002_v29, 0.0  ;;  %v944_v40 = vmul.f32 %v6158_v54, %v775_v36  ;;  %v962_v41 = vmul.f32 %v6158_v54, %v865_v37 }
 0x140   : > { %1057 = vst.msk [vmem:[#allocation2 + $0x22] sm:$0xff] %vm484_vm0, %v1021_v32  ;;  %1075 = vst.msk [vmem:[#allocation2 + $0xe2] sm:$0xff] %vm484_vm0, %v1039_v33  ;;  %v987_v42 = vadd.f32 %v6161_v55, %v945_v34  ;;  %v1005_v43 = vadd.f32 %v6161_v55, %v963_v35 }
 0x141   : > { %1056 = vst.msk [vmem:[#allocation2 + $0x12] sm:$0xff] %vm484_vm0, %v1020_v38  ;;  %1074 = vst.msk [vmem:[#allocation2 + $0xd2] sm:$0xff] %vm484_vm0, %v1038_v39  ;;  %v986_v44 = vadd.f32 %v6161_v55, %v944_v40  ;;  %v1004_v45 = vadd.f32 %v6161_v55, %v962_v41  ;;  %v4999_v46 = vpop.f32.mrb[6].mxu0  ;;  %v5026_v47 = vpop.f32.mrb[6].mxu1 }
 0x142   : > { %v1023_v48 = vmax.f32 %v987_v42, 0.0  ;;  %v1041_v49 = vmax.f32 %v1005_v43, 0.0  ;;  %v947_v50 = vmul.f32 %v4999_v46, %v6158_v54  ;;  %v965_v51 = vmul.f32 %v5026_v47, %v6158_v54  ;;  %v785_v52 = vpop.f32.mrb[7].mxu0  ;;  %v875_v53 = vpop.f32.mrb[7].mxu1 }
 0x143   : > { %v1022_v56 = vmax.f32 %v986_v44, 0.0  ;;  %v1040_v57 = vmax.f32 %v1004_v45, 0.0  ;;  %v946_v58 = vmul.f32 %v6158_v54, %v785_v52  ;;  %v964_v59 = vmul.f32 %v6158_v54, %v875_v53 }
 0x144   : > { %1059 = vst.msk [vmem:[#allocation2 + $0x32] sm:$0xff] %vm484_vm0, %v1023_v48  ;;  %1077 = vst.msk [vmem:[#allocation2 + $0xf2] sm:$0xff] %vm484_vm0, %v1041_v49  ;;  %v989_v60 = vadd.f32 %v6161_v55, %v947_v50  ;;  %v1007_v61 = vadd.f32 %v6161_v55, %v965_v51 }
 0x145   : > { %1058 = vst.msk [vmem:[#allocation2 + $0x2a] sm:$0xff] %vm484_vm0, %v1022_v56  ;;  %1076 = vst.msk [vmem:[#allocation2 + $0xea] sm:$0xff] %vm484_vm0, %v1040_v57  ;;  %v988_v62 = vadd.f32 %v6161_v55, %v946_v58  ;;  %v1006_v63 = vadd.f32 %v6161_v55, %v964_v59  ;;  %v5002_v0 = vpop.f32.mrb[8].mxu0  ;;  %v5029_v11 = vpop.f32.mrb[8].mxu1 }
 0x146   : > { %v1025_v12 = vmax.f32 %v989_v60, 0.0  ;;  %v1043_v13 = vmax.f32 %v1007_v61, 0.0  ;;  %v949_v14 = vmul.f32 %v5002_v0, %v6158_v54  ;;  %v967_v15 = vmul.f32 %v5029_v11, %v6158_v54  ;;  %v795_v16 = vpop.f32.mrb[9].mxu0  ;;  %v885_v17 = vpop.f32.mrb[9].mxu1 }
 0x147   : > { %v1024_v18 = vmax.f32 %v988_v62, 0.0  ;;  %v1042_v19 = vmax.f32 %v1006_v63, 0.0  ;;  %v948_v20 = vmul.f32 %v6158_v54, %v795_v16  ;;  %v966_v21 = vmul.f32 %v6158_v54, %v885_v17 }
 0x148   : > { %1061 = vst.msk [vmem:[#allocation2 + $0x4a] sm:$0xff] %vm484_vm0, %v1025_v12  ;;  %1079 = vst.msk [vmem:[#allocation2 + $0x10a] sm:$0xff] %vm484_vm0, %v1043_v13  ;;  %v991_v22 = vadd.f32 %v6161_v55, %v949_v14  ;;  %v1009_v23 = vadd.f32 %v6161_v55, %v967_v15 }
 0x149   : > { %1060 = vst.msk [vmem:[#allocation2 + $0x42] sm:$0xff] %vm484_vm0, %v1024_v18  ;;  %1078 = vst.msk [vmem:[#allocation2 + $0x102] sm:$0xff] %vm484_vm0, %v1042_v19  ;;  %v990_v24 = vadd.f32 %v6161_v55, %v948_v20  ;;  %v1008_v25 = vadd.f32 %v6161_v55, %v966_v21  ;;  %v5005_v26 = vpop.f32.mrb[10].mxu0  ;;  %v5032_v27 = vpop.f32.mrb[10].mxu1 }
 0x14a   : > { %v1027_v28 = vmax.f32 %v991_v22, 0.0  ;;  %v1045_v29 = vmax.f32 %v1009_v23, 0.0  ;;  %v951_v30 = vmul.f32 %v5005_v26, %v6158_v54  ;;  %v969_v31 = vmul.f32 %v5032_v27, %v6158_v54  ;;  %v805_v32 = vpop.f32.mrb[11].mxu0  ;;  %v895_v33 = vpop.f32.mrb[11].mxu1 }
 0x14b   : > { %v1026_v34 = vmax.f32 %v990_v24, 0.0  ;;  %v1044_v35 = vmax.f32 %v1008_v25, 0.0  ;;  %v950_v36 = vmul.f32 %v6158_v54, %v805_v32  ;;  %v968_v37 = vmul.f32 %v6158_v54, %v895_v33 }
 0x14c   : > { %1063 = vst.msk [vmem:[#allocation2 + $0x62] sm:$0xff] %vm484_vm0, %v1027_v28  ;;  %1081 = vst.msk [vmem:[#allocation2 + $0x122] sm:$0xff] %vm484_vm0, %v1045_v29  ;;  %v993_v38 = vadd.f32 %v6161_v55, %v951_v30  ;;  %v1011_v39 = vadd.f32 %v6161_v55, %v969_v31 }
 0x14d   : > { %1062 = vst.msk [vmem:[#allocation2 + $0x52] sm:$0xff] %vm484_vm0, %v1026_v34  ;;  %1080 = vst.msk [vmem:[#allocation2 + $0x112] sm:$0xff] %vm484_vm0, %v1044_v35  ;;  %v992_v40 = vadd.f32 %v6161_v55, %v950_v36  ;;  %v1010_v41 = vadd.f32 %v6161_v55, %v968_v37  ;;  %v5008_v42 = vpop.f32.mrb[12].mxu0  ;;  %v5035_v43 = vpop.f32.mrb[12].mxu1 }
 0x14e   : > { %v1029_v44 = vmax.f32 %v993_v38, 0.0  ;;  %v1047_v45 = vmax.f32 %v1011_v39, 0.0  ;;  %v953_v46 = vmul.f32 %v5008_v42, %v6158_v54  ;;  %v971_v47 = vmul.f32 %v5035_v43, %v6158_v54  ;;  %v815_v48 = vpop.f32.mrb[13].mxu0  ;;  %v905_v49 = vpop.f32.mrb[13].mxu1 }
 0x14f   : > { %v1028_v50 = vmax.f32 %v992_v40, 0.0  ;;  %v1046_v51 = vmax.f32 %v1010_v41, 0.0  ;;  %v952_v52 = vmul.f32 %v6158_v54, %v815_v48  ;;  %v970_v53 = vmul.f32 %v6158_v54, %v905_v49 }
 0x150   : > { %1065 = vst.msk [vmem:[#allocation2 + $0x72] sm:$0xff] %vm484_vm0, %v1029_v44  ;;  %1083 = vst.msk [vmem:[#allocation2 + $0x132] sm:$0xff] %vm484_vm0, %v1047_v45  ;;  %v995_v56 = vadd.f32 %v6161_v55, %v953_v46  ;;  %v1013_v57 = vadd.f32 %v6161_v55, %v971_v47 }
 0x151   : > { %1064 = vst.msk [vmem:[#allocation2 + $0x6a] sm:$0xff] %vm484_vm0, %v1028_v50  ;;  %1082 = vst.msk [vmem:[#allocation2 + $0x12a] sm:$0xff] %vm484_vm0, %v1046_v51  ;;  %v994_v58 = vadd.f32 %v6161_v55, %v952_v52  ;;  %v1012_v59 = vadd.f32 %v6161_v55, %v970_v53  ;;  %v5011_v60 = vpop.f32.mrb[14].mxu0  ;;  %v5038_v61 = vpop.f32.mrb[14].mxu1 }
 0x152   : > { %v1031_v62 = vmax.f32 %v995_v56, 0.0  ;;  %v1049_v63 = vmax.f32 %v1013_v57, 0.0  ;;  %v955_v0 = vmul.f32 %v5011_v60, %v6158_v54  ;;  %v973_v11 = vmul.f32 %v5038_v61, %v6158_v54  ;;  %v825_v12 = vpop.f32.mrb[15].mxu0  ;;  %v915_v13 = vpop.f32.mrb[15].mxu1 }
 0x153   : > { %v1030_v14 = vmax.f32 %v994_v58, 0.0  ;;  %v1048_v15 = vmax.f32 %v1012_v59, 0.0  ;;  %v954_v16 = vmul.f32 %v6158_v54, %v825_v12  ;;  %v972_v17 = vmul.f32 %v6158_v54, %v915_v13 }
 0x154   : > { %1067 = vst.msk [vmem:[#allocation2 + $0x8a] sm:$0xff] %vm484_vm0, %v1031_v62  ;;  %1085 = vst.msk [vmem:[#allocation2 + $0x14a] sm:$0xff] %vm484_vm0, %v1049_v63  ;;  %v997_v18 = vadd.f32 %v6161_v55, %v955_v0  ;;  %v1015_v19 = vadd.f32 %v6161_v55, %v973_v11 }
 0x155   : > { %1066 = vst.msk [vmem:[#allocation2 + $0x82] sm:$0xff] %vm484_vm0, %v1030_v14  ;;  %1084 = vst.msk [vmem:[#allocation2 + $0x142] sm:$0xff] %vm484_vm0, %v1048_v15  ;;  %v996_v20 = vadd.f32 %v6161_v55, %v954_v16  ;;  %v1014_v21 = vadd.f32 %v6161_v55, %v972_v17  ;;  %v5014_v22 = vpop.f32.mrb[16].mxu0  ;;  %v5041_v23 = vpop.f32.mrb[16].mxu1 }
 0x156   : > { %v1033_v24 = vmax.f32 %v997_v18, 0.0  ;;  %v1051_v25 = vmax.f32 %v1015_v19, 0.0  ;;  %v957_v26 = vmul.f32 %v5014_v22, %v6158_v54  ;;  %v975_v27 = vmul.f32 %v5041_v23, %v6158_v54  ;;  %v835_v28 = vpop.f32.mrb[17].mxu0  ;;  %v925_v29 = vpop.f32.mrb[17].mxu1 }
 0x157   : > { %v1032_v30 = vmax.f32 %v996_v20, 0.0  ;;  %v1050_v31 = vmax.f32 %v1014_v21, 0.0  ;;  %v956_v32 = vmul.f32 %v6158_v54, %v835_v28  ;;  %v974_v33 = vmul.f32 %v6158_v54, %v925_v29 }
 0x158   : > { %1069 = vst.msk [vmem:[#allocation2 + $0xa2] sm:$0xff] %vm484_vm0, %v1033_v24  ;;  %1087 = vst.msk [vmem:[#allocation2 + $0x162] sm:$0xff] %vm484_vm0, %v1051_v25  ;;  %v999_v34 = vadd.f32 %v6161_v55, %v957_v26  ;;  %v1017_v35 = vadd.f32 %v6161_v55, %v975_v27 }
 0x159   : > { %1068 = vst.msk [vmem:[#allocation2 + $0x92] sm:$0xff] %vm484_vm0, %v1032_v30  ;;  %1086 = vst.msk [vmem:[#allocation2 + $0x152] sm:$0xff] %vm484_vm0, %v1050_v31  ;;  %v998_v36 = vadd.f32 %v6161_v55, %v956_v32  ;;  %v1016_v37 = vadd.f32 %v6161_v55, %v974_v33 }
 0x15a   : > { %v1035_v38 = vmax.f32 %v999_v34, 0.0  ;;  %v1053_v39 = vmax.f32 %v1017_v35, 0.0 }
 0x15b   : > { %v1034_v40 = vmax.f32 %v998_v36, 0.0  ;;  %v1052_v54 = vmax.f32 %v1016_v37, 0.0 }
 0x15c   : > { %1071 = vst.msk [vmem:[#allocation2 + $0xb2] sm:$0xff] %vm484_vm0, %v1035_v38  ;;  %1089 = vst.msk [vmem:[#allocation2 + $0x172] sm:$0xff] %vm484_vm0, %v1053_v39 }
 0x15d   : > { %1070 = vst.msk [vmem:[#allocation2 + $0xaa] sm:$0xff] %vm484_vm0, %v1034_v40  ;;  %1088 = vst.msk [vmem:[#allocation2 + $0x16a] sm:$0xff] %vm484_vm0, %v1052_v54 }
 0x15e PF: > { %p4587_p4 = scmp.ne.s32.totalorder %s5709_s14, 0 }
 0x15f   : > { %v5320_v55 = vpack.c.bf16 (!%p4587_p4), %v6028_v2, %v6023_v1  ;;  %v5324_v41 = vpack.c.bf16 (!%p4587_p4), %v6038_v4, %v6033_v3  ;;  %v1094_v42 = vld [vmem:[%s5955_s20] sm:$0xff] (!%p4587_p4)  ;;  %vm1124_vm3 = vcmask (!%p4587_p4), 523264   ;;  %v5328_v44 = vpack.c.bf16 (!%p4587_p4), %v6048_v6, %v6043_v5  ;;  %v1095_v46 = vld [vmem:[%s5955_s20 + $0x8] sm:$0xff] (!%p4587_p4)  ;;  %v1096_v48 = vld [vmem:[%s5955_s20 + $0x10] sm:$0xff] (!%p4587_p4) }
 0x160   : > { %1093 = sbr.rel (%p4587_p4) target bundleno = 617 (0x269), region = 84  ;;  %v1110_v43 = vld [vmem:[%s5955_s20 + $0x80] sm:$0xff] (!%p4587_p4)  ;;  %5058 = vmatprep.mubr.msk.f32.mxu0 (!%p4587_p4), %vm1124_vm3, %v1094_v42  ;;  %v5332_v45 = vpack.c.bf16 (!%p4587_p4), %v6058_v8, %v6053_v7  ;;  %v1111_v47 = vld [vmem:[%s5955_s20 + $0x88] sm:$0xff] (!%p4587_p4)  ;;  %v1112_v49 = vld [vmem:[%s5955_s20 + $0x90] sm:$0xff] (!%p4587_p4)  ;;  %v1431_v22 = vlaneseq (!%p4587_p4) }
 0x161   : > { %5321 = vmatprep.subr.bf16.mxu0 (!%p4587_p4), %v5320_v55  ;;  %5440 = vmatprep.subr.bf16.mxu1 (!%p4587_p4), %v5320_v55  ;;  %v1097_v50 = vld [vmem:[%s5955_s20 + $0x18] sm:$0xff] (!%p4587_p4)  ;;  %v1098_v52 = vld [vmem:[%s5955_s20 + $0x20] sm:$0xff] (!%p4587_p4)  ;;  %v1099_v56 = vld [vmem:[%s5955_s20 + $0x28] sm:$0xff] (!%p4587_p4) }
 0x162   : > { %5323 = vmatpush3.bf16.msra.mxu0 (!%p4587_p4), %v5320_v55  ;;  %5444 = vmatpush3.bf16.msra.mxu1 (!%p4587_p4), %v5320_v55  ;;  %v1113_v51 = vld [vmem:[%s5955_s20 + $0x98] sm:$0xff] (!%p4587_p4)  ;;  %v1114_v53 = vld [vmem:[%s5955_s20 + $0xa0] sm:$0xff] (!%p4587_p4)  ;;  %v1115_v57 = vld [vmem:[%s5955_s20 + $0xa8] sm:$0xff] (!%p4587_p4)  ;;  %v1432_v23 = vshrl.u32 (!%p4587_p4), %v1431_v22, 7 }
 0x163   : > { %5325 = vmatprep.subr.bf16.mxu0 (!%p4587_p4), %v5324_v41  ;;  %5441 = vmatprep.subr.bf16.mxu1 (!%p4587_p4), %v5324_v41  ;;  %v1100_v58 = vld [vmem:[%s5955_s20 + $0x30] sm:$0xff] (!%p4587_p4)  ;;  %v1101_v60 = vld [vmem:[%s5955_s20 + $0x38] sm:$0xff] (!%p4587_p4)  ;;  %v1102_v62 = vld [vmem:[%s5955_s20 + $0x40] sm:$0xff] (!%p4587_p4) }
 0x164   : > { %5082 = vmatprep.mubr.msk.f32.mxu1 (!%p4587_p4), %vm1124_vm3, %v1110_v43  ;;  %v1116_v59 = vld [vmem:[%s5955_s20 + $0xb0] sm:$0xff] (!%p4587_p4)  ;;  %v1117_v61 = vld [vmem:[%s5955_s20 + $0xb8] sm:$0xff] (!%p4587_p4)  ;;  %v1118_v63 = vld [vmem:[%s5955_s20 + $0xc0] sm:$0xff] (!%p4587_p4)  ;;  %v1433_v24 = vsub.s32 (!%p4587_p4), 0, %v1432_v23 }
 0x165   : > { %v1103_v0 = vld [vmem:[%s5955_s20 + $0x48] sm:$0xff] (!%p4587_p4)  ;;  %v1104_v12 = vld [vmem:[%s5955_s20 + $0x50] sm:$0xff] (!%p4587_p4)  ;;  %v1105_v14 = vld [vmem:[%s5955_s20 + $0x58] sm:$0xff] (!%p4587_p4) }
 0x166   : > { %5327 = vmatpush3.bf16.msra.mxu0 (!%p4587_p4), %v5324_v41  ;;  %5445 = vmatpush3.bf16.msra.mxu1 (!%p4587_p4), %v5324_v41  ;;  %v1119_v11 = vld [vmem:[%s5955_s20 + $0xc8] sm:$0xff] (!%p4587_p4)  ;;  %v1120_v13 = vld [vmem:[%s5955_s20 + $0xd0] sm:$0xff] (!%p4587_p4)  ;;  %v1121_v15 = vld [vmem:[%s5955_s20 + $0xd8] sm:$0xff] (!%p4587_p4)  ;;  %v6341_v25 = vrot.slane (!%p4587_p4), %v6063_v9, %v1433_v24  ;;  %v6344_v26 = vrot.slane (!%p4587_p4), %v6068_v10, %v1433_v24 }
 0x167   : > { %5329 = vmatprep.subr.bf16.mxu0 %v5328_v44  ;;  %5442 = vmatprep.subr.bf16.mxu1 %v5328_v44  ;;  %v1106_v16 = vld [vmem:[%s5955_s20 + $0x60] sm:$0xff]  ;;  %v1107_v18 = vld [vmem:[%s5955_s20 + $0x68] sm:$0xff]  ;;  %v1108_v20 = vld [vmem:[%s5955_s20 + $0x70] sm:$0xff] }
 0x168   : > { %v1122_v17 = vld [vmem:[%s5955_s20 + $0xe0] sm:$0xff]  ;;  %v1123_v19 = vld [vmem:[%s5955_s20 + $0xe8] sm:$0xff]  ;;  %v1109_v21 = vld [vmem:[%s5955_s20 + $0x78] sm:$0xff] }
 0x16a   : > { %5331 = vmatpush3.bf16.msra.mxu0 %v5328_v44  ;;  %5446 = vmatpush3.bf16.msra.mxu1 %v5328_v44 }
 0x16b   : > { %5333 = vmatprep.subr.bf16.mxu0 %v5332_v45  ;;  %5443 = vmatprep.subr.bf16.mxu1 %v5332_v45 }
 0x16e   : > { %5335 = vmatpush3.bf16.msra.mxu0 %v5332_v45  ;;  %5447 = vmatpush3.bf16.msra.mxu1 %v5332_v45 }
 0x171   : > { %5059 = vmatmul.mubr.msk.f32.vlgmr.msra.gmra.mrb[0].mxu0 %vm1124_vm3, %v1095_v46  ;;  %5083 = vmatmul.mubr.msk.f32.vlgmr.msra.gmra.mrb[0].mxu1 %vm1124_vm3, %v1111_v47 }
 0x172   : > { %5061 = vmatprep.mubr.msk.f32.mxu0 %vm1124_vm3, %v1096_v48  ;;  %5085 = vmatprep.mubr.msk.f32.mxu1 %vm1124_vm3, %v1112_v49 }
 0x175   : > { %5062 = vmatmul.mubr.msk.f32.gmra.mrb[2].mxu0 %vm1124_vm3, %v1097_v50  ;;  %5086 = vmatmul.mubr.msk.f32.gmra.mrb[2].mxu1 %vm1124_vm3, %v1113_v51 }
 0x176   : > { %5064 = vmatprep.mubr.msk.f32.mxu0 %vm1124_vm3, %v1098_v52  ;;  %5088 = vmatprep.mubr.msk.f32.mxu1 %vm1124_vm3, %v1114_v53 }
 0x179   : > { %5065 = vmatmul.mubr.msk.f32.gmra.mrb[4].mxu0 %vm1124_vm3, %v1099_v56  ;;  %5089 = vmatmul.mubr.msk.f32.gmra.mrb[4].mxu1 %vm1124_vm3, %v1115_v57 }
 0x17a   : > { %5067 = vmatprep.mubr.msk.f32.mxu0 %vm1124_vm3, %v1100_v58  ;;  %5091 = vmatprep.mubr.msk.f32.mxu1 %vm1124_vm3, %v1116_v59 }
 0x17d   : > { %5068 = vmatmul.mubr.msk.f32.gmra.mrb[6].mxu0 %vm1124_vm3, %v1101_v60  ;;  %5092 = vmatmul.mubr.msk.f32.gmra.mrb[6].mxu1 %vm1124_vm3, %v1117_v61 }
 0x17e   : > { %5070 = vmatprep.mubr.msk.f32.mxu0 %vm1124_vm3, %v1102_v62  ;;  %5094 = vmatprep.mubr.msk.f32.mxu1 %vm1124_vm3, %v1118_v63 }
 0x181   : > { %5071 = vmatmul.mubr.msk.f32.gmra.mrb[8].mxu0 %vm1124_vm3, %v1103_v0  ;;  %5095 = vmatmul.mubr.msk.f32.gmra.mrb[8].mxu1 %vm1124_vm3, %v1119_v11 }
 0x182   : > { %5073 = vmatprep.mubr.msk.f32.mxu0 %vm1124_vm3, %v1104_v12  ;;  %5097 = vmatprep.mubr.msk.f32.mxu1 %vm1124_vm3, %v1120_v13 }
 0x185   : > { %5074 = vmatmul.mubr.msk.f32.gmra.mrb[10].mxu0 %vm1124_vm3, %v1105_v14  ;;  %5098 = vmatmul.mubr.msk.f32.gmra.mrb[10].mxu1 %vm1124_vm3, %v1121_v15 }
 0x186   : > { %5076 = vmatprep.mubr.msk.f32.mxu0 %vm1124_vm3, %v1106_v16  ;;  %5100 = vmatprep.mubr.msk.f32.mxu1 %vm1124_vm3, %v1122_v17 }
 0x189   : > { %5077 = vmatmul.mubr.msk.f32.gmra.mrb[12].mxu0 %vm1124_vm3, %v1107_v18  ;;  %5101 = vmatmul.mubr.msk.f32.gmra.mrb[12].mxu1 %vm1124_vm3, %v1123_v19 }
 0x18a   : > { %5079 = vmatprep.mubr.msk.f32.mxu0 %vm1124_vm3, %v1108_v20 }
 0x18d   : > { %5080 = vmatmul.mubr.msk.f32.gmra.mrb[14].mxu0 %vm1124_vm3, %v1109_v21 }
 0x244   : > { %v5060_v27 = vpop.f32.mrb[0].mxu0  ;;  %v5084_v28 = vpop.f32.mrb[0].mxu1 }
 0x245   : > { %v1437_v29 = vmul.f32 %v5060_v27, %v6341_v25  ;;  %v1281_v30 = vpop.f32.mrb[1].mxu0  ;;  %v1453_v31 = vmul.f32 %v5084_v28, %v6341_v25  ;;  %v1361_v32 = vpop.f32.mrb[1].mxu1 }
 0x246   : > { %v1436_v33 = vmul.f32 %v6341_v25, %v1281_v30  ;;  %v1452_v34 = vmul.f32 %v6341_v25, %v1361_v32 }
 0x247   : > { %v1473_v35 = vadd.f32 %v6344_v26, %v1437_v29  ;;  %v1489_v36 = vadd.f32 %v6344_v26, %v1453_v31 }
 0x248   : > { %v1472_v37 = vadd.f32 %v6344_v26, %v1436_v33  ;;  %v5063_v38 = vpop.f32.mrb[2].mxu0  ;;  %v1488_v39 = vadd.f32 %v6344_v26, %v1452_v34  ;;  %v5087_v40 = vpop.f32.mrb[2].mxu1 }
 0x249   : > { %v1503_v54 = vmax.f32 %v1473_v35, 0.0  ;;  %v1519_v55 = vmax.f32 %v1489_v36, 0.0  ;;  %v1439_v41 = vmul.f32 %v5063_v38, %v6341_v25  ;;  %v1291_v42 = vpop.f32.mrb[3].mxu0  ;;  %v1455_v43 = vmul.f32 %v5087_v40, %v6341_v25  ;;  %v1371_v44 = vpop.f32.mrb[3].mxu1 }
 0x24a   : > { %v1502_v45 = vmax.f32 %v1472_v37, 0.0  ;;  %v1518_v46 = vmax.f32 %v1488_v39, 0.0  ;;  %v1438_v47 = vmul.f32 %v6341_v25, %v1291_v42  ;;  %v1454_v48 = vmul.f32 %v6341_v25, %v1371_v44 }
 0x24b   : > { %1534 = vst.msk [vmem:[#allocation2 + $0x4a] sm:$0xff] %vm484_vm0, %v1503_v54  ;;  %1550 = vst.msk [vmem:[#allocation2 + $0xf2] sm:$0xff] %vm484_vm0, %v1519_v55  ;;  %v1475_v49 = vadd.f32 %v6344_v26, %v1439_v41  ;;  %v1491_v50 = vadd.f32 %v6344_v26, %v1455_v43 }
 0x24c   : > { %1533 = vst.msk [vmem:[#allocation2 + $0x42] sm:$0xff] %vm484_vm0, %v1502_v45  ;;  %1549 = vst.msk [vmem:[#allocation2 + $0xea] sm:$0xff] %vm484_vm0, %v1518_v46  ;;  %v1474_v51 = vadd.f32 %v6344_v26, %v1438_v47  ;;  %v5066_v52 = vpop.f32.mrb[4].mxu0  ;;  %v1490_v53 = vadd.f32 %v6344_v26, %v1454_v48  ;;  %v5090_v56 = vpop.f32.mrb[4].mxu1 }
 0x24d   : > { %v1505_v57 = vmax.f32 %v1475_v49, 0.0  ;;  %v1521_v58 = vmax.f32 %v1491_v50, 0.0  ;;  %v1441_v59 = vmul.f32 %v5066_v52, %v6341_v25  ;;  %v1301_v60 = vpop.f32.mrb[5].mxu0  ;;  %v1457_v61 = vmul.f32 %v5090_v56, %v6341_v25  ;;  %v1381_v62 = vpop.f32.mrb[5].mxu1 }
 0x24e   : > { %v1504_v63 = vmax.f32 %v1474_v51, 0.0  ;;  %v1520_v0 = vmax.f32 %v1490_v53, 0.0  ;;  %v1440_v11 = vmul.f32 %v6341_v25, %v1301_v60  ;;  %v1456_v12 = vmul.f32 %v6341_v25, %v1381_v62 }
 0x24f   : > { %1536 = vst.msk [vmem:[#allocation2 + $0x62] sm:$0xff] %vm484_vm0, %v1505_v57  ;;  %1552 = vst.msk [vmem:[#allocation2 + $0x10a] sm:$0xff] %vm484_vm0, %v1521_v58  ;;  %v1477_v13 = vadd.f32 %v6344_v26, %v1441_v59  ;;  %v1493_v14 = vadd.f32 %v6344_v26, %v1457_v61 }
 0x250   : > { %1535 = vst.msk [vmem:[#allocation2 + $0x52] sm:$0xff] %vm484_vm0, %v1504_v63  ;;  %1551 = vst.msk [vmem:[#allocation2 + $0x102] sm:$0xff] %vm484_vm0, %v1520_v0  ;;  %v1476_v15 = vadd.f32 %v6344_v26, %v1440_v11  ;;  %v5069_v16 = vpop.f32.mrb[6].mxu0  ;;  %v1492_v17 = vadd.f32 %v6344_v26, %v1456_v12  ;;  %v5093_v18 = vpop.f32.mrb[6].mxu1 }
 0x251   : > { %v1507_v19 = vmax.f32 %v1477_v13, 0.0  ;;  %v1523_v20 = vmax.f32 %v1493_v14, 0.0  ;;  %v1443_v21 = vmul.f32 %v5069_v16, %v6341_v25  ;;  %v1311_v22 = vpop.f32.mrb[7].mxu0  ;;  %v1459_v23 = vmul.f32 %v5093_v18, %v6341_v25  ;;  %v1391_v24 = vpop.f32.mrb[7].mxu1 }
 0x252   : > { %v1506_v27 = vmax.f32 %v1476_v15, 0.0  ;;  %v1522_v28 = vmax.f32 %v1492_v17, 0.0  ;;  %v1442_v29 = vmul.f32 %v6341_v25, %v1311_v22  ;;  %v1458_v30 = vmul.f32 %v6341_v25, %v1391_v24 }
 0x253   : > { %1538 = vst.msk [vmem:[#allocation2 + $0x72] sm:$0xff] %vm484_vm0, %v1507_v19  ;;  %1554 = vst.msk [vmem:[#allocation2 + $0x122] sm:$0xff] %vm484_vm0, %v1523_v20  ;;  %v1479_v31 = vadd.f32 %v6344_v26, %v1443_v21  ;;  %v1495_v32 = vadd.f32 %v6344_v26, %v1459_v23 }
 0x254   : > { %1537 = vst.msk [vmem:[#allocation2 + $0x6a] sm:$0xff] %vm484_vm0, %v1506_v27  ;;  %1553 = vst.msk [vmem:[#allocation2 + $0x112] sm:$0xff] %vm484_vm0, %v1522_v28  ;;  %v1478_v33 = vadd.f32 %v6344_v26, %v1442_v29  ;;  %v5072_v34 = vpop.f32.mrb[8].mxu0  ;;  %v1494_v35 = vadd.f32 %v6344_v26, %v1458_v30  ;;  %v5096_v36 = vpop.f32.mrb[8].mxu1 }
 0x255   : > { %v1509_v37 = vmax.f32 %v1479_v31, 0.0  ;;  %v1525_v38 = vmax.f32 %v1495_v32, 0.0  ;;  %v1445_v39 = vmul.f32 %v5072_v34, %v6341_v25  ;;  %v1321_v40 = vpop.f32.mrb[9].mxu0  ;;  %v1461_v54 = vmul.f32 %v5096_v36, %v6341_v25  ;;  %v1401_v55 = vpop.f32.mrb[9].mxu1 }
 0x256   : > { %v1508_v41 = vmax.f32 %v1478_v33, 0.0  ;;  %v1524_v42 = vmax.f32 %v1494_v35, 0.0  ;;  %v1444_v43 = vmul.f32 %v6341_v25, %v1321_v40  ;;  %v1460_v44 = vmul.f32 %v6341_v25, %v1401_v55 }
 0x257   : > { %1540 = vst.msk [vmem:[#allocation2 + $0x8a] sm:$0xff] %vm484_vm0, %v1509_v37  ;;  %1556 = vst.msk [vmem:[#allocation2 + $0x132] sm:$0xff] %vm484_vm0, %v1525_v38  ;;  %v1481_v45 = vadd.f32 %v6344_v26, %v1445_v39  ;;  %v1497_v46 = vadd.f32 %v6344_v26, %v1461_v54 }
 0x258   : > { %1539 = vst.msk [vmem:[#allocation2 + $0x82] sm:$0xff] %vm484_vm0, %v1508_v41  ;;  %1555 = vst.msk [vmem:[#allocation2 + $0x12a] sm:$0xff] %vm484_vm0, %v1524_v42  ;;  %v1480_v47 = vadd.f32 %v6344_v26, %v1444_v43  ;;  %v5075_v48 = vpop.f32.mrb[10].mxu0  ;;  %v1496_v49 = vadd.f32 %v6344_v26, %v1460_v44  ;;  %v5099_v50 = vpop.f32.mrb[10].mxu1 }
 0x259   : > { %v1511_v51 = vmax.f32 %v1481_v45, 0.0  ;;  %v1527_v52 = vmax.f32 %v1497_v46, 0.0  ;;  %v1447_v53 = vmul.f32 %v5075_v48, %v6341_v25  ;;  %v1331_v56 = vpop.f32.mrb[11].mxu0  ;;  %v1463_v57 = vmul.f32 %v5099_v50, %v6341_v25  ;;  %v1411_v58 = vpop.f32.mrb[11].mxu1 }
 0x25a   : > { %v1510_v59 = vmax.f32 %v1480_v47, 0.0  ;;  %v1526_v60 = vmax.f32 %v1496_v49, 0.0  ;;  %v1446_v61 = vmul.f32 %v6341_v25, %v1331_v56  ;;  %v1462_v62 = vmul.f32 %v6341_v25, %v1411_v58 }
 0x25b   : > { %1542 = vst.msk [vmem:[#allocation2 + $0xa2] sm:$0xff] %vm484_vm0, %v1511_v51  ;;  %1558 = vst.msk [vmem:[#allocation2 + $0x14a] sm:$0xff] %vm484_vm0, %v1527_v52  ;;  %v1483_v63 = vadd.f32 %v6344_v26, %v1447_v53  ;;  %v1499_v0 = vadd.f32 %v6344_v26, %v1463_v57 }
 0x25c   : > { %1541 = vst.msk [vmem:[#allocation2 + $0x92] sm:$0xff] %vm484_vm0, %v1510_v59  ;;  %1557 = vst.msk [vmem:[#allocation2 + $0x142] sm:$0xff] %vm484_vm0, %v1526_v60  ;;  %v1482_v11 = vadd.f32 %v6344_v26, %v1446_v61  ;;  %v5078_v12 = vpop.f32.mrb[12].mxu0  ;;  %v1498_v13 = vadd.f32 %v6344_v26, %v1462_v62  ;;  %v5102_v14 = vpop.f32.mrb[12].mxu1 }
 0x25d   : > { %v1513_v15 = vmax.f32 %v1483_v63, 0.0  ;;  %v1529_v16 = vmax.f32 %v1499_v0, 0.0  ;;  %v1449_v17 = vmul.f32 %v5078_v12, %v6341_v25  ;;  %v1341_v18 = vpop.f32.mrb[13].mxu0  ;;  %v1465_v19 = vmul.f32 %v5102_v14, %v6341_v25  ;;  %v1421_v20 = vpop.f32.mrb[13].mxu1 }
 0x25e   : > { %v1512_v21 = vmax.f32 %v1482_v11, 0.0  ;;  %v1528_v22 = vmax.f32 %v1498_v13, 0.0  ;;  %v1448_v23 = vmul.f32 %v6341_v25, %v1341_v18  ;;  %v1464_v24 = vmul.f32 %v6341_v25, %v1421_v20 }
 0x25f   : > { %1544 = vst.msk [vmem:[#allocation2 + $0xb2] sm:$0xff] %vm484_vm0, %v1513_v15  ;;  %1560 = vst.msk [vmem:[#allocation2 + $0x162] sm:$0xff] %vm484_vm0, %v1529_v16  ;;  %v1485_v27 = vadd.f32 %v6344_v26, %v1449_v17  ;;  %v1501_v28 = vadd.f32 %v6344_v26, %v1465_v19 }
 0x260   : > { %1543 = vst.msk [vmem:[#allocation2 + $0xaa] sm:$0xff] %vm484_vm0, %v1512_v21  ;;  %1559 = vst.msk [vmem:[#allocation2 + $0x152] sm:$0xff] %vm484_vm0, %v1528_v22  ;;  %v1484_v29 = vadd.f32 %v6344_v26, %v1448_v23  ;;  %v5081_v30 = vpop.f32.mrb[14].mxu0  ;;  %v1500_v31 = vadd.f32 %v6344_v26, %v1464_v24 }
 0x261   : > { %v1515_v32 = vmax.f32 %v1485_v27, 0.0  ;;  %v1531_v33 = vmax.f32 %v1501_v28, 0.0  ;;  %v1451_v34 = vmul.f32 %v5081_v30, %v6341_v25  ;;  %v1351_v35 = vpop.f32.mrb[15].mxu0 }
 0x262   : > { %v1514_v36 = vmax.f32 %v1484_v29, 0.0  ;;  %v1530_v37 = vmax.f32 %v1500_v31, 0.0  ;;  %v1450_v38 = vmul.f32 %v6341_v25, %v1351_v35 }
 0x263   : > { %1546 = vst.msk [vmem:[#allocation2 + $0xca] sm:$0xff] %vm484_vm0, %v1515_v32  ;;  %1562 = vst.msk [vmem:[#allocation2 + $0x172] sm:$0xff] %vm484_vm0, %v1531_v33  ;;  %v1487_v39 = vadd.f32 %v6344_v26, %v1451_v34 }
 0x264   : > { %1545 = vst.msk [vmem:[#allocation2 + $0xc2] sm:$0xff] %vm484_vm0, %v1514_v36  ;;  %1561 = vst.msk [vmem:[#allocation2 + $0x16a] sm:$0xff] %vm484_vm0, %v1530_v37  ;;  %v1486_v40 = vadd.f32 %v6344_v26, %v1450_v38 }
 0x265   : > { %v1517_v54 = vmax.f32 %v1487_v39, 0.0 }
 0x266   : > { %v1516_v55 = vmax.f32 %v1486_v40, 0.0 }
 0x267   : > { %1548 = vst.msk [vmem:[#allocation2 + $0xe2] sm:$0xff] %vm484_vm0, %v1517_v54 }
 0x268   : > { %1547 = vst.msk [vmem:[#allocation2 + $0xd2] sm:$0xff] %vm484_vm0, %v1516_v55 }
 0x269 PF: > { %p4618_p0 = scmp.ne.s32.totalorder %s5709_s14, 2 }
 0x26a   : > { %v5336_v25 = vpack.c.bf16 (!%p4618_p0), %v6028_v2, %v6023_v1  ;;  %v5340_v41 = vpack.c.bf16 (!%p4618_p0), %v6038_v4, %v6033_v3  ;;  %v4619_v26 = vld [vmem:[%s5955_s20 + $0x150] sm:$0xff] (!%p4618_p0)  ;;  %vm1598_vm4 = vcmask (!%p4618_p0), 523264   ;;  %v5344_v43 = vpack.c.bf16 (!%p4618_p0), %v6048_v6, %v6043_v5  ;;  %v4620_v2 = vld [vmem:[%s5955_s20 + $0x158] sm:$0xff] (!%p4618_p0)  ;;  %v4621_v4 = vld [vmem:[%s5955_s20 + $0x160] sm:$0xff] (!%p4618_p0) }
 0x26b   : > { %1566 = sbr.rel (%p4618_p0) target bundleno = 884 (0x374), region = 88  ;;  %v4635_v42 = vld [vmem:[%s5955_s20 + $0x1d0] sm:$0xff] (!%p4618_p0)  ;;  %5119 = vmatprep.mubr.msk.f32.mxu0 (!%p4618_p0), %vm1598_vm4, %v4619_v26  ;;  %v5348_v1 = vpack.c.bf16 (!%p4618_p0), %v6058_v8, %v6053_v7  ;;  %v4636_v3 = vld [vmem:[%s5955_s20 + $0x1d8] sm:$0xff] (!%p4618_p0)  ;;  %v4637_v5 = vld [vmem:[%s5955_s20 + $0x1e0] sm:$0xff] (!%p4618_p0)  ;;  %v1905_v13 = vlaneseq (!%p4618_p0) }
 0x26c   : > { %5337 = vmatprep.subr.bf16.mxu0 (!%p4618_p0), %v5336_v25  ;;  %5448 = vmatprep.subr.bf16.mxu1 (!%p4618_p0), %v5336_v25  ;;  %v4622_v6 = vld [vmem:[%s5955_s20 + $0x168] sm:$0xff] (!%p4618_p0)  ;;  %v4623_v8 = vld [vmem:[%s5955_s20 + $0x170] sm:$0xff] (!%p4618_p0)  ;;  %v4624_v45 = vld [vmem:[%s5955_s20 + $0x178] sm:$0xff] (!%p4618_p0) }
 0x26d   : > { %5339 = vmatpush3.bf16.msra.mxu0 (!%p4618_p0), %v5336_v25  ;;  %5452 = vmatpush3.bf16.msra.mxu1 (!%p4618_p0), %v5336_v25  ;;  %v4638_v7 = vld [vmem:[%s5955_s20 + $0x1e8] sm:$0xff] (!%p4618_p0)  ;;  %v4639_v44 = vld [vmem:[%s5955_s20 + $0x1f0] sm:$0xff] (!%p4618_p0)  ;;  %v4640_v46 = vld [vmem:[%s5955_s20 + $0x1f8] sm:$0xff] (!%p4618_p0)  ;;  %v1906_v14 = vshrl.u32 (!%p4618_p0), %v1905_v13, 7 }
 0x26e   : > { %5341 = vmatprep.subr.bf16.mxu0 (!%p4618_p0), %v5340_v41  ;;  %5449 = vmatprep.subr.bf16.mxu1 (!%p4618_p0), %v5340_v41  ;;  %v4625_v47 = vld [vmem:[%s5955_s20 + $0x180] sm:$0xff] (!%p4618_p0)  ;;  %v4626_v49 = vld [vmem:[%s5955_s20 + $0x188] sm:$0xff] (!%p4618_p0)  ;;  %v4627_v51 = vld [vmem:[%s5955_s20 + $0x190] sm:$0xff] (!%p4618_p0) }
 0x26f   : > { %5143 = vmatprep.mubr.msk.f32.mxu1 (!%p4618_p0), %vm1598_vm4, %v4635_v42  ;;  %v4641_v48 = vld [vmem:[%s5955_s20 + $0x200] sm:$0xff] (!%p4618_p0)  ;;  %v4642_v50 = vld [vmem:[%s5955_s20 + $0x208] sm:$0xff] (!%p4618_p0)  ;;  %v4643_v52 = vld [vmem:[%s5955_s20 + $0x210] sm:$0xff] (!%p4618_p0)  ;;  %v1907_v15 = vsub.s32 (!%p4618_p0), 0, %v1906_v14 }
 0x270   : > { %v4628_v53 = vld [vmem:[%s5955_s20 + $0x198] sm:$0xff] (!%p4618_p0)  ;;  %v4629_v57 = vld [vmem:[%s5955_s20 + $0x1a0] sm:$0xff] (!%p4618_p0)  ;;  %v4630_v59 = vld [vmem:[%s5955_s20 + $0x1a8] sm:$0xff] (!%p4618_p0) }
 0x271   : > { %5343 = vmatpush3.bf16.msra.mxu0 (!%p4618_p0), %v5340_v41  ;;  %5453 = vmatpush3.bf16.msra.mxu1 (!%p4618_p0), %v5340_v41  ;;  %v4644_v56 = vld [vmem:[%s5955_s20 + $0x218] sm:$0xff] (!%p4618_p0)  ;;  %v4645_v58 = vld [vmem:[%s5955_s20 + $0x220] sm:$0xff] (!%p4618_p0)  ;;  %v4646_v60 = vld [vmem:[%s5955_s20 + $0x228] sm:$0xff] (!%p4618_p0)  ;;  %v6506_v16 = vrot.slane (!%p4618_p0), %v6063_v9, %v1907_v15  ;;  %v6509_v17 = vrot.slane (!%p4618_p0), %v6068_v10, %v1907_v15 }
 0x272   : > { %5345 = vmatprep.subr.bf16.mxu0 %v5344_v43  ;;  %5450 = vmatprep.subr.bf16.mxu1 %v5344_v43  ;;  %v4631_v61 = vld [vmem:[%s5955_s20 + $0x1b0] sm:$0xff]  ;;  %v4632_v63 = vld [vmem:[%s5955_s20 + $0x1b8] sm:$0xff]  ;;  %v4633_v11 = vld [vmem:[%s5955_s20 + $0x1c0] sm:$0xff] }
 0x273   : > { %v4647_v62 = vld [vmem:[%s5955_s20 + $0x230] sm:$0xff]  ;;  %v4648_v0 = vld [vmem:[%s5955_s20 + $0x238] sm:$0xff]  ;;  %v4634_v12 = vld [vmem:[%s5955_s20 + $0x1c8] sm:$0xff] }
 0x275   : > { %5347 = vmatpush3.bf16.msra.mxu0 %v5344_v43  ;;  %5454 = vmatpush3.bf16.msra.mxu1 %v5344_v43 }
 0x276   : > { %5349 = vmatprep.subr.bf16.mxu0 %v5348_v1  ;;  %5451 = vmatprep.subr.bf16.mxu1 %v5348_v1 }
 0x279   : > { %5351 = vmatpush3.bf16.msra.mxu0 %v5348_v1  ;;  %5455 = vmatpush3.bf16.msra.mxu1 %v5348_v1 }
 0x27c   : > { %5120 = vmatmul.mubr.msk.f32.vlgmr.msra.gmra.mrb[0].mxu0 %vm1598_vm4, %v4620_v2  ;;  %5144 = vmatmul.mubr.msk.f32.vlgmr.msra.gmra.mrb[0].mxu1 %vm1598_vm4, %v4636_v3 }
 0x27d   : > { %5122 = vmatprep.mubr.msk.f32.mxu0 %vm1598_vm4, %v4621_v4  ;;  %5146 = vmatprep.mubr.msk.f32.mxu1 %vm1598_vm4, %v4637_v5 }
 0x280   : > { %5123 = vmatmul.mubr.msk.f32.gmra.mrb[2].mxu0 %vm1598_vm4, %v4622_v6  ;;  %5147 = vmatmul.mubr.msk.f32.gmra.mrb[2].mxu1 %vm1598_vm4, %v4638_v7 }
 0x281   : > { %5125 = vmatprep.mubr.msk.f32.mxu0 %vm1598_vm4, %v4623_v8  ;;  %5149 = vmatprep.mubr.msk.f32.mxu1 %vm1598_vm4, %v4639_v44 }
 0x284   : > { %5126 = vmatmul.mubr.msk.f32.gmra.mrb[4].mxu0 %vm1598_vm4, %v4624_v45  ;;  %5150 = vmatmul.mubr.msk.f32.gmra.mrb[4].mxu1 %vm1598_vm4, %v4640_v46 }
 0x285   : > { %5128 = vmatprep.mubr.msk.f32.mxu0 %vm1598_vm4, %v4625_v47  ;;  %5152 = vmatprep.mubr.msk.f32.mxu1 %vm1598_vm4, %v4641_v48 }
 0x288   : > { %5129 = vmatmul.mubr.msk.f32.gmra.mrb[6].mxu0 %vm1598_vm4, %v4626_v49  ;;  %5153 = vmatmul.mubr.msk.f32.gmra.mrb[6].mxu1 %vm1598_vm4, %v4642_v50 }
 0x289   : > { %5131 = vmatprep.mubr.msk.f32.mxu0 %vm1598_vm4, %v4627_v51  ;;  %5155 = vmatprep.mubr.msk.f32.mxu1 %vm1598_vm4, %v4643_v52 }
 0x28c   : > { %5132 = vmatmul.mubr.msk.f32.gmra.mrb[8].mxu0 %vm1598_vm4, %v4628_v53  ;;  %5156 = vmatmul.mubr.msk.f32.gmra.mrb[8].mxu1 %vm1598_vm4, %v4644_v56 }
 0x28d   : > { %5134 = vmatprep.mubr.msk.f32.mxu0 %vm1598_vm4, %v4629_v57  ;;  %5158 = vmatprep.mubr.msk.f32.mxu1 %vm1598_vm4, %v4645_v58 }
 0x290   : > { %5135 = vmatmul.mubr.msk.f32.gmra.mrb[10].mxu0 %vm1598_vm4, %v4630_v59  ;;  %5159 = vmatmul.mubr.msk.f32.gmra.mrb[10].mxu1 %vm1598_vm4, %v4646_v60 }
 0x291   : > { %5137 = vmatprep.mubr.msk.f32.mxu0 %vm1598_vm4, %v4631_v61  ;;  %5161 = vmatprep.mubr.msk.f32.mxu1 %vm1598_vm4, %v4647_v62 }
 0x294   : > { %5138 = vmatmul.mubr.msk.f32.gmra.mrb[12].mxu0 %vm1598_vm4, %v4632_v63  ;;  %5162 = vmatmul.mubr.msk.f32.gmra.mrb[12].mxu1 %vm1598_vm4, %v4648_v0 }
 0x295   : > { %5140 = vmatprep.mubr.msk.f32.mxu0 %vm1598_vm4, %v4633_v11 }
 0x298   : > { %5141 = vmatmul.mubr.msk.f32.gmra.mrb[14].mxu0 %vm1598_vm4, %v4634_v12 }
 0x34f   : > { %v5121_v18 = vpop.f32.mrb[0].mxu0  ;;  %v5145_v19 = vpop.f32.mrb[0].mxu1 }
 0x350   : > { %v1911_v20 = vmul.f32 %v5121_v18, %v6506_v16  ;;  %v1755_v21 = vpop.f32.mrb[1].mxu0  ;;  %v1927_v22 = vmul.f32 %v5145_v19, %v6506_v16  ;;  %v1835_v23 = vpop.f32.mrb[1].mxu1 }
 0x351   : > { %v1910_v24 = vmul.f32 %v6506_v16, %v1755_v21  ;;  %v1926_v27 = vmul.f32 %v6506_v16, %v1835_v23 }
 0x352   : > { %v1947_v28 = vadd.f32 %v6509_v17, %v1911_v20  ;;  %v1963_v9 = vadd.f32 %v6509_v17, %v1927_v22 }
 0x353   : > { %v1946_v29 = vadd.f32 %v6509_v17, %v1910_v24  ;;  %v5124_v10 = vpop.f32.mrb[2].mxu0  ;;  %v1962_v30 = vadd.f32 %v6509_v17, %v1926_v27  ;;  %v5148_v31 = vpop.f32.mrb[2].mxu1 }
 0x354   : > { %v1977_v32 = vmax.f32 %v1947_v28, 0.0  ;;  %v1993_v33 = vmax.f32 %v1963_v9, 0.0  ;;  %v1913_v34 = vmul.f32 %v5124_v10, %v6506_v16  ;;  %v1765_v35 = vpop.f32.mrb[3].mxu0  ;;  %v1929_v36 = vmul.f32 %v5148_v31, %v6506_v16  ;;  %v1845_v37 = vpop.f32.mrb[3].mxu1 }
 0x355   : > { %v1976_v38 = vmax.f32 %v1946_v29, 0.0  ;;  %v1992_v39 = vmax.f32 %v1962_v30, 0.0  ;;  %v1912_v40 = vmul.f32 %v6506_v16, %v1765_v35  ;;  %v1928_v54 = vmul.f32 %v6506_v16, %v1845_v37 }
 0x356   : > { %2007 = vst.msk [vmem:[#allocation2 + $0xa] sm:$0xff] %vm484_vm0, %v1977_v32  ;;  %2023 = vst.msk [vmem:[#allocation2 + $0xb2] sm:$0xff] %vm484_vm0, %v1993_v33  ;;  %v1949_v55 = vadd.f32 %v6509_v17, %v1913_v34  ;;  %v1965_v25 = vadd.f32 %v6509_v17, %v1929_v36 }
 0x357   : > { %2006 = vst.msk [vmem:[#allocation2 + $0x2] sm:$0xff] %vm484_vm0, %v1976_v38  ;;  %2022 = vst.msk [vmem:[#allocation2 + $0xaa] sm:$0xff] %vm484_vm0, %v1992_v39  ;;  %v1948_v41 = vadd.f32 %v6509_v17, %v1912_v40  ;;  %v5127_v26 = vpop.f32.mrb[4].mxu0  ;;  %v1964_v42 = vadd.f32 %v6509_v17, %v1928_v54  ;;  %v5151_v43 = vpop.f32.mrb[4].mxu1 }
 0x358   : > { %v1979_v1 = vmax.f32 %v1949_v55, 0.0  ;;  %v1995_v2 = vmax.f32 %v1965_v25, 0.0  ;;  %v1915_v3 = vmul.f32 %v5127_v26, %v6506_v16  ;;  %v1775_v4 = vpop.f32.mrb[5].mxu0  ;;  %v1931_v5 = vmul.f32 %v5151_v43, %v6506_v16  ;;  %v1855_v6 = vpop.f32.mrb[5].mxu1 }
 0x359   : > { %v1978_v7 = vmax.f32 %v1948_v41, 0.0  ;;  %v1994_v8 = vmax.f32 %v1964_v42, 0.0  ;;  %v1914_v44 = vmul.f32 %v6506_v16, %v1775_v4  ;;  %v1930_v45 = vmul.f32 %v6506_v16, %v1855_v6 }
 0x35a   : > { %2009 = vst.msk [vmem:[#allocation2 + $0x22] sm:$0xff] %vm484_vm0, %v1979_v1  ;;  %2025 = vst.msk [vmem:[#allocation2 + $0xca] sm:$0xff] %vm484_vm0, %v1995_v2  ;;  %v1951_v46 = vadd.f32 %v6509_v17, %v1915_v3  ;;  %v1967_v47 = vadd.f32 %v6509_v17, %v1931_v5 }
 0x35b   : > { %2008 = vst.msk [vmem:[#allocation2 + $0x12] sm:$0xff] %vm484_vm0, %v1978_v7  ;;  %2024 = vst.msk [vmem:[#allocation2 + $0xc2] sm:$0xff] %vm484_vm0, %v1994_v8  ;;  %v1950_v48 = vadd.f32 %v6509_v17, %v1914_v44  ;;  %v5130_v49 = vpop.f32.mrb[6].mxu0  ;;  %v1966_v50 = vadd.f32 %v6509_v17, %v1930_v45  ;;  %v5154_v51 = vpop.f32.mrb[6].mxu1 }
 0x35c   : > { %v1981_v52 = vmax.f32 %v1951_v46, 0.0  ;;  %v1997_v53 = vmax.f32 %v1967_v47, 0.0  ;;  %v1917_v56 = vmul.f32 %v5130_v49, %v6506_v16  ;;  %v1785_v57 = vpop.f32.mrb[7].mxu0  ;;  %v1933_v58 = vmul.f32 %v5154_v51, %v6506_v16  ;;  %v1865_v59 = vpop.f32.mrb[7].mxu1 }
 0x35d   : > { %v1980_v60 = vmax.f32 %v1950_v48, 0.0  ;;  %v1996_v61 = vmax.f32 %v1966_v50, 0.0  ;;  %v1916_v62 = vmul.f32 %v6506_v16, %v1785_v57  ;;  %v1932_v63 = vmul.f32 %v6506_v16, %v1865_v59 }
 0x35e   : > { %2011 = vst.msk [vmem:[#allocation2 + $0x32] sm:$0xff] %vm484_vm0, %v1981_v52  ;;  %2027 = vst.msk [vmem:[#allocation2 + $0xe2] sm:$0xff] %vm484_vm0, %v1997_v53  ;;  %v1953_v0 = vadd.f32 %v6509_v17, %v1917_v56  ;;  %v1969_v11 = vadd.f32 %v6509_v17, %v1933_v58 }
 0x35f   : > { %2010 = vst.msk [vmem:[#allocation2 + $0x2a] sm:$0xff] %vm484_vm0, %v1980_v60  ;;  %2026 = vst.msk [vmem:[#allocation2 + $0xd2] sm:$0xff] %vm484_vm0, %v1996_v61  ;;  %v1952_v12 = vadd.f32 %v6509_v17, %v1916_v62  ;;  %v5133_v13 = vpop.f32.mrb[8].mxu0  ;;  %v1968_v14 = vadd.f32 %v6509_v17, %v1932_v63  ;;  %v5157_v15 = vpop.f32.mrb[8].mxu1 }
 0x360   : > { %v1983_v18 = vmax.f32 %v1953_v0, 0.0  ;;  %v1999_v19 = vmax.f32 %v1969_v11, 0.0  ;;  %v1919_v20 = vmul.f32 %v5133_v13, %v6506_v16  ;;  %v1795_v21 = vpop.f32.mrb[9].mxu0  ;;  %v1935_v22 = vmul.f32 %v5157_v15, %v6506_v16  ;;  %v1875_v23 = vpop.f32.mrb[9].mxu1 }
 0x361   : > { %v1982_v24 = vmax.f32 %v1952_v12, 0.0  ;;  %v1998_v27 = vmax.f32 %v1968_v14, 0.0  ;;  %v1918_v28 = vmul.f32 %v6506_v16, %v1795_v21  ;;  %v1934_v9 = vmul.f32 %v6506_v16, %v1875_v23 }
 0x362   : > { %2013 = vst.msk [vmem:[#allocation2 + $0x4a] sm:$0xff] %vm484_vm0, %v1983_v18  ;;  %2029 = vst.msk [vmem:[#allocation2 + $0xf2] sm:$0xff] %vm484_vm0, %v1999_v19  ;;  %v1955_v29 = vadd.f32 %v6509_v17, %v1919_v20  ;;  %v1971_v10 = vadd.f32 %v6509_v17, %v1935_v22 }
 0x363   : > { %2012 = vst.msk [vmem:[#allocation2 + $0x42] sm:$0xff] %vm484_vm0, %v1982_v24  ;;  %2028 = vst.msk [vmem:[#allocation2 + $0xea] sm:$0xff] %vm484_vm0, %v1998_v27  ;;  %v1954_v30 = vadd.f32 %v6509_v17, %v1918_v28  ;;  %v5136_v31 = vpop.f32.mrb[10].mxu0  ;;  %v1970_v32 = vadd.f32 %v6509_v17, %v1934_v9  ;;  %v5160_v33 = vpop.f32.mrb[10].mxu1 }
 0x364   : > { %v1985_v34 = vmax.f32 %v1955_v29, 0.0  ;;  %v2001_v35 = vmax.f32 %v1971_v10, 0.0  ;;  %v1921_v36 = vmul.f32 %v5136_v31, %v6506_v16  ;;  %v1805_v37 = vpop.f32.mrb[11].mxu0  ;;  %v1937_v38 = vmul.f32 %v5160_v33, %v6506_v16  ;;  %v1885_v39 = vpop.f32.mrb[11].mxu1 }
 0x365   : > { %v1984_v40 = vmax.f32 %v1954_v30, 0.0  ;;  %v2000_v54 = vmax.f32 %v1970_v32, 0.0  ;;  %v1920_v55 = vmul.f32 %v6506_v16, %v1805_v37  ;;  %v1936_v25 = vmul.f32 %v6506_v16, %v1885_v39 }
 0x366   : > { %2015 = vst.msk [vmem:[#allocation2 + $0x62] sm:$0xff] %vm484_vm0, %v1985_v34  ;;  %2031 = vst.msk [vmem:[#allocation2 + $0x10a] sm:$0xff] %vm484_vm0, %v2001_v35  ;;  %v1957_v41 = vadd.f32 %v6509_v17, %v1921_v36  ;;  %v1973_v26 = vadd.f32 %v6509_v17, %v1937_v38 }
 0x367   : > { %2014 = vst.msk [vmem:[#allocation2 + $0x52] sm:$0xff] %vm484_vm0, %v1984_v40  ;;  %2030 = vst.msk [vmem:[#allocation2 + $0x102] sm:$0xff] %vm484_vm0, %v2000_v54  ;;  %v1956_v42 = vadd.f32 %v6509_v17, %v1920_v55  ;;  %v5139_v43 = vpop.f32.mrb[12].mxu0  ;;  %v1972_v1 = vadd.f32 %v6509_v17, %v1936_v25  ;;  %v5163_v2 = vpop.f32.mrb[12].mxu1 }
 0x368   : > { %v1987_v3 = vmax.f32 %v1957_v41, 0.0  ;;  %v2003_v4 = vmax.f32 %v1973_v26, 0.0  ;;  %v1923_v5 = vmul.f32 %v5139_v43, %v6506_v16  ;;  %v1815_v6 = vpop.f32.mrb[13].mxu0  ;;  %v1939_v7 = vmul.f32 %v5163_v2, %v6506_v16  ;;  %v1895_v8 = vpop.f32.mrb[13].mxu1 }
 0x369   : > { %v1986_v44 = vmax.f32 %v1956_v42, 0.0  ;;  %v2002_v45 = vmax.f32 %v1972_v1, 0.0  ;;  %v1922_v46 = vmul.f32 %v6506_v16, %v1815_v6  ;;  %v1938_v47 = vmul.f32 %v6506_v16, %v1895_v8 }
 0x36a   : > { %2017 = vst.msk [vmem:[#allocation2 + $0x72] sm:$0xff] %vm484_vm0, %v1987_v3  ;;  %2033 = vst.msk [vmem:[#allocation2 + $0x122] sm:$0xff] %vm484_vm0, %v2003_v4  ;;  %v1959_v48 = vadd.f32 %v6509_v17, %v1923_v5  ;;  %v1975_v49 = vadd.f32 %v6509_v17, %v1939_v7 }
 0x36b   : > { %2016 = vst.msk [vmem:[#allocation2 + $0x6a] sm:$0xff] %vm484_vm0, %v1986_v44  ;;  %2032 = vst.msk [vmem:[#allocation2 + $0x112] sm:$0xff] %vm484_vm0, %v2002_v45  ;;  %v1958_v50 = vadd.f32 %v6509_v17, %v1922_v46  ;;  %v5142_v51 = vpop.f32.mrb[14].mxu0  ;;  %v1974_v52 = vadd.f32 %v6509_v17, %v1938_v47 }
 0x36c   : > { %v1989_v53 = vmax.f32 %v1959_v48, 0.0  ;;  %v2005_v56 = vmax.f32 %v1975_v49, 0.0  ;;  %v1925_v57 = vmul.f32 %v5142_v51, %v6506_v16  ;;  %v1825_v58 = vpop.f32.mrb[15].mxu0 }
 0x36d   : > { %v1988_v59 = vmax.f32 %v1958_v50, 0.0  ;;  %v2004_v60 = vmax.f32 %v1974_v52, 0.0  ;;  %v1924_v61 = vmul.f32 %v6506_v16, %v1825_v58 }
 0x36e   : > { %2019 = vst.msk [vmem:[#allocation2 + $0x8a] sm:$0xff] %vm484_vm0, %v1989_v53  ;;  %2035 = vst.msk [vmem:[#allocation2 + $0x132] sm:$0xff] %vm484_vm0, %v2005_v56  ;;  %v1961_v62 = vadd.f32 %v6509_v17, %v1925_v57 }
 0x36f   : > { %2018 = vst.msk [vmem:[#allocation2 + $0x82] sm:$0xff] %vm484_vm0, %v1988_v59  ;;  %2034 = vst.msk [vmem:[#allocation2 + $0x12a] sm:$0xff] %vm484_vm0, %v2004_v60  ;;  %v1960_v63 = vadd.f32 %v6509_v17, %v1924_v61 }
 0x370   : > { %v1991_v0 = vmax.f32 %v1961_v62, 0.0 }
 0x371   : > { %v1990_v11 = vmax.f32 %v1960_v63, 0.0 }
 0x372   : > { %2021 = vst.msk [vmem:[#allocation2 + $0xa2] sm:$0xff] %vm484_vm0, %v1991_v0 }
 0x373   : > { %2020 = vst.msk [vmem:[#allocation2 + $0x92] sm:$0xff] %vm484_vm0, %v1990_v11 }
 0x374 PF: > { %v6601_v16 = vld [vmem:[#allocation2 + $0x44] sm:$0xff]  ;;  %s5731_s30 = smov 32   ;;  %s5732_s17 = smov 64   ;;  %v5733_v18 = vmov 0.0|0.0   ;;  %v6624_v22 = vld [vmem:[#allocation2 + $0x50] sm:$0xff]  ;;  %v3124_v33 = vld [vmem:[%s7930_s4 + $0x18] sm:$0xff] }
 0x375   : > { %2616 = vrot.lane.b32.xlu0 %v6601_v16, %s5731_s30  ;;  %v2375_v13 = vld [vmem:[#allocation2 + $0x40] sm:$0xff]  ;;  %5352 = vmatprep.subr.bf16.mxu0 %v5733_v18  ;;  %v6615_v19 = vld [vmem:[#allocation2 + $0x8a] sm:$0xff]  ;;  %2068 = vst.msk [vmem:[#allocation3 + $0xc0] sm:$0xff] %vm484_vm0, %v6624_v22  ;;  %s5734_s28 = smov 96   ;;  %v3128_v26 = vld [vmem:[%s7930_s4 + $0x38] sm:$0xff]  ;;  %vm2204_vm5 = vcmask 523520  }
 0x376   : > { %v6603_v12 = vld [vmem:[#allocation2 + $0x80] sm:$0xff]  ;;  %2066 = vst.msk [vmem:[#allocation3 + $0x90] sm:$0xff] %vm484_vm0, %v2375_v13  ;;  %v2376_v20 = vld [vmem:[#allocation2 + $0x48] sm:$0xff]  ;;  %2551 = vst.msk [vmem:[#allocation3 + $0xb0] sm:$0xff] %vm484_vm0, %v6615_v19  ;;  %vm2349_vm6 = vcmask 785920   ;;  %vm2495_vm7 = vcmask 1048320  }
 0x377   : > { %2761 = vrot.lane.b32.xlu1 %v6603_v12, %s5732_s17  ;;  %v6609_v17 = vld [vmem:[#allocation2 + $0x82] sm:$0xff]  ;;  %2067 = vst.msk [vmem:[#allocation3 + $0xa8] sm:$0xff] %vm484_vm0, %v2376_v20  ;;  %v6641_v27 = vld [vmem:[#allocation2 + $0xaa] sm:$0xff]  ;;  %v6699_v42 = vld [vmem:[#allocation2 + $0x52] sm:$0xff]  ;;  %s4706_s9 = smul.u32 192, %s5709_s14  ;;  %vm4043_vm8 = vcmask 523264  }
 0x378   : > { %v2084_v14 = vld [vmem:[#allocation2 + $0x2] sm:$0xff]  ;;  %2550 = vst.msk [vmem:[#allocation3 + $0x98] sm:$0xff] %vm484_vm0, %v6609_v17  ;;  %v6643_v28 = vld [vmem:[#allocation2 + $0x4c] sm:$0xff]  ;;  %2554 = vst.msk [vmem:[#allocation3 + $0xf8] sm:$0xff] %vm484_vm0, %v6641_v27  ;;  %s7967_s22 = sld [smem:[#allocation19_spill]]  ;;  %s7968_s15 = sld [smem:[#allocation18_spill]] }
 0x379   : > { %v2229_v15 = vld [vmem:[#allocation2 + $0x4] sm:$0xff]  ;;  %2132 = vrot.lane.b32.xlu0 %v2084_v14, %s5731_s30  ;;  %v3123_v32 = vld [vmem:[%s7930_s4 + $0x10] sm:$0xff]  ;;  %2546 = vst.msk [vmem:[#allocation3 + $0x38] sm:$0xff] %vm484_vm0, %v6699_v42  ;;  %v3132_v50 = vld [vmem:[%s7930_s4 + $0x58] sm:$0xff]  ;;  %s7599_s13 = scalar_lea.vmem %s5955_s20, %s4706_s9 [#allocation4]  ;;  %s7970_s20 = sld [smem:[#allocation11_spill]] }
 0x37a   : > { %v6622_v21 = vld [vmem:[#allocation2 + $0x92] sm:$0xff]  ;;  %v6630_v23 = vld [vmem:[#allocation2 + $0xa2] sm:$0xff]  ;;  %v2085_v9 = vld [vmem:[#allocation2 + $0xa] sm:$0xff]  ;;  %v5356_v37 = vpack.c.bf16 %v3124_v33, %v3123_v32  ;;  %s4452_s23 = sshll.u32 %s6071_s12, 4  ;;  %s7971_s19 = sld [smem:[#allocation21_spill]]  ;;  %s7859_s23 = int_to_ptr.vmem [resolvable:$true] %s4452_s23 }
 0x37b   : > { %2277 = vrot.lane.b32.xlu1 %v2229_v15, %s5732_s17  ;;  %2552 = vst.msk [vmem:[#allocation3 + $0xc8] sm:$0xff] %vm484_vm0, %v6622_v21  ;;  %v6632_v24 = vld [vmem:[#allocation2 + $0x60] sm:$0xff]  ;;  %2553 = vst.msk [vmem:[#allocation3 + $0xe0] sm:$0xff] %vm484_vm0, %v6630_v23  ;;  %v3122_v10 = vld [vmem:[%s7930_s4 + $0x8] sm:$0xff]  ;;  %s7972_s24 = sand.u32 1, %s5689_s26   ;;  %p7973_p3 = scmp.ne.s32.totalorder %s7961_s21, 0 }
 0x37c   : > { %2069 = vst.msk [vmem:[#allocation3 + $0xd8] sm:$0xff] %vm484_vm0, %v6632_v24  ;;  %v3121_v29 = vld [vmem:[%s7930_s4] sm:$0xff]  ;;  %v6668_v35 = vld [vmem:[#allocation2 + $0x88] sm:$0xff]  ;;  %v6690_v25 = vld [vmem:[#allocation2 + $0x94] sm:$0xff]  ;;  %s7865_s9 = scalar_lea.sflag [#allocation6], %s7972_s24 }
 0x37d   : > { %2905 = vrot.lane.b32.xlu0 %v6609_v17, %s5734_s28  ;;  %v6653_v30 = vld [vmem:[#allocation2 + $0x84] sm:$0xff]  ;;  %v5353_v31 = vpack.c.bf16 %v3122_v10, %v3121_v29  ;;  %v2230_v36 = vld [vmem:[#allocation2 + $0xc] sm:$0xff]  ;;  %3027 = vst.msk [vmem:[#allocation3 + $0x40] sm:$0xff] %vm484_vm0, %v6690_v25  ;;  %v6708_v43 = vld [vmem:[#allocation2 + $0x54] sm:$0xff] }
 0x37e   : > { %v6664_v34 = vld [vmem:[#allocation2 + $0x42] sm:$0xff]  ;;  %3025 = vst.msk [vmem:[#allocation3 + $0x10] sm:$0xff] %vm484_vm0, %v6653_v30  ;;  %v6679_v40 = vld [vmem:[#allocation2 + $0x8c] sm:$0xff]  ;;  %v2231_v8 = vld [vmem:[#allocation2 + $0x14] sm:$0xff] }
 0x37f   : > { %2423 = vrot.lane.b32.xlu1 %v2375_v13, %s5734_s28  ;;  %2544 = vst.msk [vmem:[#allocation3 + $0x8] sm:$0xff] %vm484_vm0, %v6664_v34  ;;  %5354 = vmatpush1.bf16.msra.mxu0 %v5353_v31  ;;  %v3125_v38 = vld [vmem:[%s7930_s4 + $0x20] sm:$0xff]  ;;  %v3126_v39 = vld [vmem:[%s7930_s4 + $0x28] sm:$0xff]  ;;  %3026 = vst.msk [vmem:[#allocation3 + $0x28] sm:$0xff] %vm484_vm0, %v6679_v40 }
 0x380   : > { %5355 = vmatprep.subr.bf16.mxu0 %v5733_v18  ;;  %v6684_v54 = vld [vmem:[#allocation2 + $0x4a] sm:$0xff]  ;;  %v5359_v55 = vpack.c.bf16 %v3126_v39, %v3125_v38  ;;  %v2086_v1 = vld [vmem:[#allocation2 + $0x12] sm:$0xff]  ;;  %v6712_v4 = vld [vmem:[#allocation2 + $0x62] sm:$0xff] }
 0x381   : > { %2618 = vrot.lane.b32.xlu0 %v6643_v28, %s5731_s30  ;;  %2545 = vst.msk [vmem:[#allocation3 + $0x20] sm:$0xff] %vm484_vm0, %v6684_v54  ;;  %v3127_v41 = vld [vmem:[%s7930_s4 + $0x30] sm:$0xff]  ;;  %v6710_v2 = vld [vmem:[#allocation2 + $0xa4] sm:$0xff]  ;;  %2547 = vst.msk [vmem:[#allocation3 + $0x50] sm:$0xff] %vm484_vm0, %v6712_v4 }
 0x382   : > { %v5362_v3 = vpack.c.bf16 %v3128_v26, %v3127_v41  ;;  %3028 = vst.msk [vmem:[#allocation3 + $0x58] sm:$0xff] %vm484_vm0, %v6710_v2  ;;  %v3129_v5 = vld [vmem:[%s7930_s4 + $0x40] sm:$0xff]  ;;  %v3130_v6 = vld [vmem:[%s7930_s4 + $0x48] sm:$0xff]  ;;  %v6728_v7 = vld [vmem:[#allocation2 + $0x90] sm:$0xff] }
 0x383   : > { %2134 = vrot.lane.b32.xlu1 %v2085_v9, %s5731_s30  ;;  %5357 = vmatpush1.bf16.msra.mxu0 %v5356_v37  ;;  %v2036_v44 = vld [vmem:[#allocation2] sm:$0xff]  ;;  %v6730_v45 = vld [vmem:[#allocation2 + $0xac] sm:$0xff]  ;;  %v5365_v46 = vpack.c.bf16 %v3130_v6, %v3129_v5  ;;  %v3156_v57 = vld [vmem:[%s7930_s4 + $0x118] sm:$0xff] }
 0x384   : > { %5358 = vmatprep.subr.bf16.mxu0 %v5733_v18  ;;  %2060 = vst.msk [vmem:[#allocation3] sm:$0xff] %vm484_vm0, %v2036_v44  ;;  %v6733_v47 = vld [vmem:[#allocation2 + $0x6a] sm:$0xff]  ;;  %v3153_v48 = vld [vmem:[%s7930_s4 + $0x100] sm:$0xff]  ;;  %3029 = vst.msk [vmem:[#allocation3 + $0x70] sm:$0xff] %vm484_vm0, %v6730_v45 }
 0x385   : > { %2763 = vrot.lane.b32.xlu0 %v6668_v35, %s5732_s17  ;;  %v3131_v49 = vld [vmem:[%s7930_s4 + $0x50] sm:$0xff]  ;;  %v3154_v51 = vld [vmem:[%s7930_s4 + $0x108] sm:$0xff]  ;;  %2548 = vst.msk [vmem:[#allocation3 + $0x68] sm:$0xff] %vm484_vm0, %v6733_v47  ;;  %v3133_v59 = vld [vmem:[%s7930_s4 + $0x60] sm:$0xff] }
 0x386   : > { %v5400_v52 = vpack.c.bf16 %v3154_v51, %v3153_v48  ;;  %v3155_v53 = vld [vmem:[%s7930_s4 + $0x110] sm:$0xff]  ;;  %v2037_v56 = vld [vmem:[#allocation2 + $0x8] sm:$0xff]  ;;  %v5368_v58 = vpack.c.bf16 %v3132_v50, %v3131_v49  ;;  %v2039_v9 = vld [vmem:[#allocation2 + $0x20] sm:$0xff] }
 0x387   : > { %2279 = vrot.lane.b32.xlu1 %v2230_v36, %s5732_s17  ;;  %5360 = vmatpush1.bf16.msra.mxu0 %v5359_v55  ;;  %2061 = vst.msk [vmem:[#allocation3 + $0x18] sm:$0xff] %vm484_vm0, %v2037_v56  ;;  %v5404_v60 = vpack.c.bf16 %v3156_v57, %v3155_v53  ;;  %v3051_v61 = vld [vmem:[#allocation3 + $0x10] sm:$0xff]  ;;  %v6765_v62 = vld [vmem:[#allocation2 + $0x64] sm:$0xff]  ;;  %v3136_v31 = vld [vmem:[%s7930_s4 + $0x78] sm:$0xff] }
 0x388   : > { %5361 = vmatprep.subr.bf16.mxu0 %v5733_v18  ;;  %5401 = vmatprep.subr.bf16.mxu1 %v5400_v52  ;;  %v3134_v63 = vld [vmem:[%s7930_s4 + $0x68] sm:$0xff]  ;;  %v6771_v0 = vld [vmem:[#allocation2 + $0xb4] sm:$0xff]  ;;  %2063 = vst.msk [vmem:[#allocation3 + $0x48] sm:$0xff] %vm484_vm0, %v2039_v9  ;;  %v3057_v38 = vld [vmem:[#allocation3 + $0x40] sm:$0xff] }
 0x389   : > { %2907 = vrot.lane.b32.xlu0 %v6615_v19, %s5734_s28  ;;  %5403 = vmatpush3.bf16.msra.mxu1 %v5400_v52  ;;  %v6773_v11 = vld [vmem:[#allocation2 + $0x72] sm:$0xff]  ;;  %v6781_v15 = vld [vmem:[#allocation2 + $0xc4] sm:$0xff]  ;;  %3030 = vst.msk [vmem:[#allocation3 + $0x88] sm:$0xff] %vm484_vm0, %v6771_v0 }
 0x38a   : > { %v2038_v13 = vld [vmem:[#allocation2 + $0x10] sm:$0xff]  ;;  %2549 = vst.msk [vmem:[#allocation3 + $0x80] sm:$0xff] %vm484_vm0, %v6773_v11  ;;  %5405 = vmatprep.subr.bf16.mxu1 %v5404_v60  ;;  %5172 = vmatprep.mubr.msk.f32.mxu1 %vm484_vm0, %v3051_v61  ;;  %v6789_v29 = vld [vmem:[#allocation2 + $0x102] sm:$0xff]  ;;  %3031 = vst.msk [vmem:[#allocation3 + $0xa0] sm:$0xff] %vm484_vm0, %v6781_v15 }
 0x38b   : > { %2425 = vrot.lane.b32.xlu1 %v2376_v20, %s5734_s28  ;;  %5363 = vmatpush1.bf16.msra.mxu0 %v5362_v3  ;;  %v6779_v14 = vld [vmem:[#allocation2 + $0xf2] sm:$0xff]  ;;  %v2087_v20 = vld [vmem:[#allocation2 + $0x22] sm:$0xff]  ;;  %2062 = vst.msk [vmem:[#allocation3 + $0x30] sm:$0xff] %vm484_vm0, %v2038_v13  ;;  %2562 = vst.msk [vmem:[#allocation3 + $0x1b8] sm:$0xff] %vm484_vm0, %v6789_v29 }
 0x38c   : > { %5364 = vmatprep.subr.bf16.mxu0 %v5733_v18  ;;  %2561 = vst.msk [vmem:[#allocation3 + $0x1a0] sm:$0xff] %vm484_vm0, %v6779_v14  ;;  %v3135_v10 = vld [vmem:[%s7930_s4 + $0x70] sm:$0xff]  ;;  %v3054_v33 = vld [vmem:[#allocation3 + $0x28] sm:$0xff]  ;;  %v6817_v39 = vld [vmem:[#allocation2 + $0xa0] sm:$0xff] }
 0x38d   : > { %2620 = vrot.lane.b32.xlu0 %v6708_v43, %s5731_s30  ;;  %v6802_v32 = vld [vmem:[#allocation2 + $0xcc] sm:$0xff]  ;;  %5407 = vmatpush3.bf16.msra.mxu1 %v5404_v60  ;;  %v2232_v55 = vld [vmem:[#allocation2 + $0x24] sm:$0xff]  ;;  %v5374_v41 = vpack.c.bf16 %v3136_v31, %v3135_v10  ;;  %v3060_v3 = vld [vmem:[#allocation3 + $0x58] sm:$0xff] }
 0x38e   : > { %v2040_v36 = vld [vmem:[#allocation2 + $0x28] sm:$0xff]  ;;  %3032 = vst.msk [vmem:[#allocation3 + $0xb8] sm:$0xff] %vm484_vm0, %v6802_v32  ;;  %v3137_v26 = vld [vmem:[%s7930_s4 + $0x80] sm:$0xff]  ;;  %v6828_v5 = vld [vmem:[#allocation2 + $0xd4] sm:$0xff] }
 0x38f   : > { %2136 = vrot.lane.b32.xlu1 %v2086_v1, %s5731_s30  ;;  %5366 = vmatpush1.bf16.msra.mxu0 %v5365_v46  ;;  %v6807_v37 = vld [vmem:[#allocation2 + $0x10a] sm:$0xff]  ;;  %2064 = vst.msk [vmem:[#allocation3 + $0x60] sm:$0xff] %vm484_vm0, %v2040_v36  ;;  %3033 = vst.msk [vmem:[#allocation3 + $0xd0] sm:$0xff] %vm484_vm0, %v6828_v5  ;;  %v3140_v44 = vld [vmem:[%s7930_s4 + $0x98] sm:$0xff] }
 0x390   : > { %5367 = vmatprep.subr.bf16.mxu0 %v5733_v18  ;;  %2563 = vst.msk [vmem:[#allocation3 + $0x1d0] sm:$0xff] %vm484_vm0, %v6807_v37  ;;  %5173 = vmatmul.mubr.msk.f32.vlgmr.msra.gmra.mrb[0].mxu1 %vm484_vm0, %v3054_v33  ;;  %v3138_v1 = vld [vmem:[%s7930_s4 + $0x88] sm:$0xff]  ;;  %v2041_v50 = vld [vmem:[#allocation2 + $0x30] sm:$0xff]  ;;  %v3141_v51 = vld [vmem:[%s7930_s4 + $0xa0] sm:$0xff] }
 0x391   : > { %2765 = vrot.lane.b32.xlu0 %v6728_v7, %s5732_s17  ;;  %5175 = vmatprep.mubr.msk.f32.mxu1 %vm484_vm0, %v3057_v38  ;;  %v5377_v6 = vpack.c.bf16 %v3138_v1, %v3137_v26  ;;  %v6847_v46 = vld [vmem:[#allocation2 + $0x6c] sm:$0xff]  ;;  %2065 = vst.msk [vmem:[#allocation3 + $0x78] sm:$0xff] %vm484_vm0, %v2041_v50  ;;  %v3144_v61 = vld [vmem:[%s7930_s4 + $0xb8] sm:$0xff]  ;;  %v3145_v9 = vld [vmem:[%s7930_s4 + $0xc0] sm:$0xff] }
 0x392   : > { %v2088_v48 = vld [vmem:[#allocation2 + $0x2a] sm:$0xff]  ;;  %v6857_v53 = vld [vmem:[#allocation2 + $0x112] sm:$0xff] }
 0x393   : > { %2281 = vrot.lane.b32.xlu1 %v2231_v8, %s5732_s17  ;;  %5369 = vmatpush1.bf16.msra.mxu0 %v5368_v58  ;;  %v3139_v8 = vld [vmem:[%s7930_s4 + $0x90] sm:$0xff]  ;;  %v3142_v52 = vld [vmem:[%s7930_s4 + $0xa8] sm:$0xff]  ;;  %2564 = vst.msk [vmem:[#allocation3 + $0x1e8] sm:$0xff] %vm484_vm0, %v6857_v53  ;;  %v3148_v38 = vld [vmem:[%s7930_s4 + $0xd8] sm:$0xff] }
 0x394   : > { %5370 = vmatprep.subr.bf16.mxu0 %v5733_v18  ;;  %5176 = vmatmul.mubr.msk.f32.gmra.mrb[2].mxu1 %vm484_vm0, %v3060_v3  ;;  %v5380_v49 = vpack.c.bf16 %v3140_v44, %v3139_v8  ;;  %v2233_v56 = vld [vmem:[#allocation2 + $0x2c] sm:$0xff]  ;;  %v5383_v58 = vpack.c.bf16 %v3142_v52, %v3141_v51  ;;  %v6892_v10 = vld [vmem:[#allocation2 + $0x74] sm:$0xff]  ;;  %v3149_v3 = vld [vmem:[%s7930_s4 + $0xe0] sm:$0xff] }
 0x395   : > { %2909 = vrot.lane.b32.xlu0 %v6622_v21, %s5734_s28  ;;  %v3063_v57 = vld [vmem:[#allocation3 + $0x70] sm:$0xff]  ;;  %v2379_v13 = vld [vmem:[#allocation2 + $0x68] sm:$0xff]  ;;  %v3152_v51 = vld [vmem:[%s7930_s4 + $0xf8] sm:$0xff] }
 0x396   : > { %5178 = vmatprep.mubr.msk.f32.mxu1 %vm484_vm0, %v3063_v57  ;;  %v3143_v60 = vld [vmem:[%s7930_s4 + $0xb0] sm:$0xff]  ;;  %v6945_v57 = vld [vmem:[#allocation2 + $0xc0] sm:$0xff] }
 0x397   : > { %2427 = vrot.lane.b32.xlu1 %v6624_v22, %s5734_s28  ;;  %v5371_v22 = vpack.c.bf16 %v3134_v63, %v3133_v59  ;;  %v3066_v59 = vld [vmem:[#allocation3 + $0x88] sm:$0xff]  ;;  %v2089_v31 = vld [vmem:[#allocation2 + $0x32] sm:$0xff] }
 0x398   : > { %5179 = vmatmul.mubr.msk.f32.gmra.mrb[4].mxu1 %vm484_vm0, %v3066_v59  ;;  %v6875_v63 = vld [vmem:[#allocation2 + $0xe4] sm:$0xff]  ;;  %v3147_v36 = vld [vmem:[%s7930_s4 + $0xd0] sm:$0xff]  ;;  %v3072_v59 = vld [vmem:[#allocation3 + $0xb8] sm:$0xff] }
 0x399   : > { %2622 = vrot.lane.b32.xlu0 %v6765_v62, %s5731_s30  ;;  %5372 = vmatpush1.bf16.msra.mxu0 %v5371_v22  ;;  %3034 = vst.msk [vmem:[#allocation3 + $0xe8] sm:$0xff] %vm484_vm0, %v6875_v63  ;;  %v3146_v22 = vld [vmem:[%s7930_s4 + $0xc8] sm:$0xff]  ;;  %v2234_v26 = vld [vmem:[#allocation2 + $0x34] sm:$0xff]  ;;  %v5392_v1 = vpack.c.bf16 %v3148_v38, %v3147_v36 }
 0x39a   : > { %5373 = vmatprep.subr.bf16.mxu0 %v5733_v18  ;;  %v5389_v33 = vpack.c.bf16 %v3146_v22, %v3145_v9  ;;  %v6917_v8 = vld [vmem:[#allocation2 + $0xec] sm:$0xff]  ;;  %v7016_v9 = vld [vmem:[#allocation2 + $0x114] sm:$0xff] }
 0x39b   : > { %2138 = vrot.lane.b32.xlu1 %v2087_v20, %s5731_s30  ;;  %v5386_v20 = vpack.c.bf16 %v3144_v61, %v3143_v60  ;;  %3035 = vst.msk [vmem:[#allocation3 + $0x100] sm:$0xff] %vm484_vm0, %v6917_v8  ;;  %v6924_v44 = vld [vmem:[#allocation2 + $0xb2] sm:$0xff]  ;;  %v6973_v61 = vld [vmem:[#allocation2 + $0x104] sm:$0xff]  ;;  %3039 = vst.msk [vmem:[#allocation3 + $0x160] sm:$0xff] %vm484_vm0, %v7016_v9 }
 0x39c   : > { %v3151_v50 = vld [vmem:[%s7930_s4 + $0xf0] sm:$0xff]  ;;  %3037 = vst.msk [vmem:[#allocation3 + $0x130] sm:$0xff] %vm484_vm0, %v6973_v61 }
 0x39d   : > { %2767 = vrot.lane.b32.xlu0 %v6817_v39, %s5732_s17  ;;  %5375 = vmatpush1.bf16.msra.mxu0 %v5374_v41  ;;  %v6908_v41 = vld [vmem:[#allocation2 + $0xb0] sm:$0xff]  ;;  %v5398_v52 = vpack.c.bf16 %v3152_v51, %v3151_v50  ;;  %v2532_v50 = vld [vmem:[#allocation2 + $0xc2] sm:$0xff] }
 0x39e   : > { %5376 = vmatprep.subr.bf16.mxu0 %v5733_v18  ;;  %v6963_v60 = vld [vmem:[#allocation2 + $0x132] sm:$0xff]  ;;  %2556 = vst.msk [vmem:[#allocation3 + $0x128] sm:$0xff] %vm484_vm0, %v2532_v50 }
 0x39f   : > { %2283 = vrot.lane.b32.xlu1 %v2232_v55, %s5732_s17  ;;  %v6901_v55 = vld [vmem:[#allocation2 + $0x122] sm:$0xff]  ;;  %2567 = vst.msk [vmem:[#allocation3 + $0x230] sm:$0xff] %vm484_vm0, %v6963_v60  ;;  %v2047_v36 = vld [vmem:[#allocation2 + $0x70] sm:$0xff] }
 0x3a0   : > { %2565 = vst.msk [vmem:[#allocation3 + $0x200] sm:$0xff] %vm484_vm0, %v6901_v55  ;;  %2071 = vst.msk [vmem:[#allocation3 + $0x108] sm:$0xff] %vm484_vm0, %v2047_v36  ;;  %v2534_v50 = vld [vmem:[#allocation2 + $0xd2] sm:$0xff] }
 0x3a1   : > { %2911 = vrot.lane.b32.xlu0 %v6630_v23, %s5734_s28  ;;  %5378 = vmatpush1.bf16.msra.mxu0 %v5377_v6  ;;  %v3150_v6 = vld [vmem:[%s7930_s4 + $0xe8] sm:$0xff]  ;;  %2558 = vst.msk [vmem:[#allocation3 + $0x158] sm:$0xff] %vm484_vm0, %v2534_v50 }
 0x3a2   : > { %5379 = vmatprep.subr.bf16.mxu0 %v5733_v18  ;;  %v3081_v38 = vld [vmem:[#allocation3 + $0x100] sm:$0xff] }
 0x3a3   : > { %2429 = vrot.lane.b32.xlu1 %v6632_v24, %s5734_s28  ;;  %v6864_v24 = vld [vmem:[#allocation2 + $0xa8] sm:$0xff] }
 0x3a5   : > { %2624 = vrot.lane.b32.xlu0 %v6847_v46, %s5731_s30  ;;  %5381 = vmatpush1.bf16.msra.mxu0 %v5380_v49  ;;  %v5395_v49 = vpack.c.bf16 %v3150_v6, %v3149_v3  ;;  %v7046_v6 = vld [vmem:[#allocation2 + $0x124] sm:$0xff] }
 0x3a6   : > { %5382 = vmatprep.subr.bf16.mxu0 %v5733_v18  ;;  %3040 = vst.msk [vmem:[#allocation3 + $0x178] sm:$0xff] %vm484_vm0, %v7046_v6 }
 0x3a7   : > { %2140 = vrot.lane.b32.xlu1 %v2088_v48, %s5731_s30  ;;  %v2380_v48 = vld [vmem:[#allocation2 + $0x70] sm:$0xff] }
 0x3a9   : > { %2769 = vrot.lane.b32.xlu0 %v6864_v24, %s5732_s17  ;;  %5384 = vmatpush1.bf16.msra.mxu0 %v5383_v58  ;;  %v3069_v58 = vld [vmem:[#allocation3 + $0xa0] sm:$0xff] }
 0x3aa   : > { %5385 = vmatprep.subr.bf16.mxu0 %v5733_v18  ;;  %5181 = vmatprep.mubr.msk.f32.mxu1 %vm484_vm0, %v3069_v58 }
 0x3ab   : > { %2285 = vrot.lane.b32.xlu1 %v2233_v56, %s5732_s17  ;;  %v6937_v56 = vld [vmem:[#allocation2 + $0x12a] sm:$0xff]  ;;  %5182 = vmatmul.mubr.msk.f32.gmra.mrb[6].mxu1 %vm484_vm0, %v3072_v59  ;;  %v2048_v59 = vld [vmem:[#allocation2 + $0x80] sm:$0xff] }
 0x3ac   : > { %2566 = vst.msk [vmem:[#allocation3 + $0x218] sm:$0xff] %vm484_vm0, %v6937_v56  ;;  %2072 = vst.msk [vmem:[#allocation3 + $0x120] sm:$0xff] %vm484_vm0, %v2048_v59 }
 0x3ad   : > { %2913 = vrot.lane.b32.xlu0 %v6641_v27, %s5734_s28  ;;  %5387 = vmatpush1.bf16.msra.mxu0 %v5386_v20  ;;  %v6995_v20 = vld [vmem:[#allocation2 + $0x10c] sm:$0xff] }
 0x3ae   : > { %5388 = vmatprep.subr.bf16.mxu0 %v5733_v18  ;;  %3038 = vst.msk [vmem:[#allocation3 + $0x148] sm:$0xff] %vm484_vm0, %v6995_v20 }
 0x3af   : > { %2431 = vrot.lane.b32.xlu1 %v2379_v13, %s5734_s28  ;;  %v3078_v13 = vld [vmem:[#allocation3 + $0xe8] sm:$0xff] }
 0x3b1   : > { %2626 = vrot.lane.b32.xlu0 %v6892_v10, %s5731_s30  ;;  %5390 = vmatpush1.bf16.msra.mxu0 %v5389_v33 }
 0x3b2   : > { %5391 = vmatprep.subr.bf16.mxu0 %v5733_v18 }
 0x3b3   : > { %2142 = vrot.lane.b32.xlu1 %v2089_v31, %s5731_s30 }
 0x3b5   : > { %2771 = vrot.lane.b32.xlu0 %v6908_v41, %s5732_s17  ;;  %5393 = vmatpush1.bf16.msra.mxu0 %v5392_v1 }
 0x3b6   : > { %5394 = vmatprep.subr.bf16.mxu0 %v5733_v18 }
 0x3b7   : > { %2287 = vrot.lane.b32.xlu1 %v2234_v26, %s5732_s17 }
 0x3b9   : > { %2915 = vrot.lane.b32.xlu0 %v6924_v44, %s5734_s28  ;;  %5396 = vmatpush1.bf16.msra.mxu0 %v5395_v49 }
 0x3ba   : > { %5397 = vmatprep.subr.bf16.mxu0 %v5733_v18  ;;  %v6949_v18 = vld [vmem:[#allocation2 + $0xf4] sm:$0xff] }
 0x3bb   : > { %2433 = vrot.lane.b32.xlu1 %v2380_v48, %s5734_s28  ;;  %3036 = vst.msk [vmem:[#allocation3 + $0x118] sm:$0xff] %vm484_vm0, %v6949_v18 }
 0x3bd   : > { %2628 = vrot.lane.b32.xlu0 %v6653_v30, %s5731_s30  ;;  %5399 = vmatpush1.bf16.msra.mxu0 %v5398_v52 }
 0x3bf   : > { %2144 = vrot.lane.b32.xlu1 %v6664_v34, %s5731_s30  ;;  %v6957_v34 = vld [vmem:[#allocation2 + $0xc2] sm:$0xff] }
 0x3c1   : > { %2773 = vrot.lane.b32.xlu0 %v6945_v57, %s5732_s17 }
 0x3c2   : > { %v3084_v3 = vld [vmem:[#allocation3 + $0x118] sm:$0xff] }
 0x3c3   : > { %2289 = vrot.lane.b32.xlu1 %v6601_v16, %s5732_s17  ;;  %v6971_v16 = vld [vmem:[#allocation2 + $0xc8] sm:$0xff] }
 0x3c5   : > { %2917 = vrot.lane.b32.xlu0 %v6957_v34, %s5734_s28 }
 0x3c7   : > { %2435 = vrot.lane.b32.xlu1 %v6603_v12, %s5734_s28  ;;  %v6981_v12 = vld [vmem:[#allocation2 + $0xca] sm:$0xff] }
 0x3c9   : > { %2630 = vrot.lane.b32.xlu0 %v6679_v40, %s5731_s30 }
 0x3cb   : > { %2146 = vrot.lane.b32.xlu1 %v6684_v54, %s5731_s30  ;;  %v6991_v54 = vld [vmem:[#allocation2 + $0xd0] sm:$0xff] }
 0x3cd   : > { %2775 = vrot.lane.b32.xlu0 %v6971_v16, %s5732_s17 }
 0x3cf   : > { %2291 = vrot.lane.b32.xlu1 %v6643_v28, %s5732_s17  ;;  %v3075_v28 = vld [vmem:[#allocation3 + $0xd0] sm:$0xff] }
 0x3d0   : > { %5184 = vmatprep.mubr.msk.f32.mxu1 %vm484_vm0, %v3075_v28 }
 0x3d1   : > { %2919 = vrot.lane.b32.xlu0 %v6981_v12, %s5734_s28  ;;  %5185 = vmatmul.mubr.msk.f32.gmra.mrb[8].mxu1 %vm484_vm0, %v3078_v13 }
 0x3d2   : > { %5187 = vmatprep.mubr.msk.f32.mxu1 %vm484_vm0, %v3081_v38  ;;  %v3087_v38 = vld [vmem:[#allocation3 + $0x130] sm:$0xff] }
 0x3d3   : > { %2437 = vrot.lane.b32.xlu1 %v6668_v35, %s5734_s28  ;;  %v7003_v35 = vld [vmem:[#allocation2 + $0xd2] sm:$0xff] }
 0x3d5   : > { %2632 = vrot.lane.b32.xlu0 %v6690_v25, %s5731_s30  ;;  %5188 = vmatmul.mubr.msk.f32.gmra.mrb[10].mxu1 %vm484_vm0, %v3084_v3  ;;  %v3090_v3 = vld [vmem:[#allocation3 + $0x148] sm:$0xff] }
 0x3d6   : > { %5190 = vmatprep.mubr.msk.f32.mxu1 %vm484_vm0, %v3087_v38  ;;  %v2536_v38 = vld [vmem:[#allocation2 + $0xea] sm:$0xff] }
 0x3d7   : > { %2148 = vrot.lane.b32.xlu1 %v6699_v42, %s5731_s30  ;;  %v2046_v42 = vld [vmem:[#allocation2 + $0x68] sm:$0xff]  ;;  %2560 = vst.msk [vmem:[#allocation3 + $0x188] sm:$0xff] %vm484_vm0, %v2536_v38 }
 0x3d8   : > { %2070 = vst.msk [vmem:[#allocation3 + $0xf0] sm:$0xff] %vm484_vm0, %v2046_v42  ;;  %v7074_v42 = vld [vmem:[#allocation2 + $0x12c] sm:$0xff] }
 0x3d9   : > { %2777 = vrot.lane.b32.xlu0 %v6991_v54, %s5732_s17  ;;  %3041 = vst.msk [vmem:[#allocation3 + $0x190] sm:$0xff] %vm484_vm0, %v7074_v42  ;;  %5191 = vmatmul.mubr.msk.f32.gmra.mrb[12].mxu1 %vm484_vm0, %v3090_v3 }
 0x3db   : > { %2293 = vrot.lane.b32.xlu1 %v6708_v43, %s5732_s17  ;;  %v7014_v43 = vld [vmem:[#allocation2 + $0xe0] sm:$0xff] }
 0x3dd   : > { %2921 = vrot.lane.b32.xlu0 %v7003_v35, %s5734_s28 }
 0x3df   : > { %2439 = vrot.lane.b32.xlu1 %v6728_v7, %s5734_s28  ;;  %v7024_v7 = vld [vmem:[#allocation2 + $0xe2] sm:$0xff] }
 0x3e1   : > { %2634 = vrot.lane.b32.xlu0 %v6710_v2, %s5731_s30 }
 0x3e3   : > { %2150 = vrot.lane.b32.xlu1 %v6712_v4, %s5731_s30  ;;  %v2531_v4 = vld [vmem:[#allocation2 + $0xb2] sm:$0xff] }
 0x3e4   : > { %2555 = vst.msk [vmem:[#allocation3 + $0x110] sm:$0xff] %vm484_vm0, %v2531_v4 }
 0x3e5   : > { %2779 = vrot.lane.b32.xlu0 %v7014_v43, %s5732_s17 }
 0x3e7   : > { %2295 = vrot.lane.b32.xlu1 %v6765_v62, %s5732_s17  ;;  %v2617_v22 = vpop.permute.xlu0 %2616 }
 0x3e8   : > { %2688 = vst.msk [vmem:[#allocation3 + $0x8] sm:$0xff] %vm2204_vm5, %v2617_v22 }
 0x3e9   : > { %v2762_v31 = vpop.permute.xlu1 %2761  ;;  %2923 = vrot.lane.b32.xlu0 %v7024_v7, %s5734_s28 }
 0x3ea   : > { %2833 = vst.msk [vmem:[#allocation3 + $0x8] sm:$0xff] %vm2349_vm6, %v2762_v31  ;;  %v2533_v31 = vld [vmem:[#allocation2 + $0xca] sm:$0xff] }
 0x3eb   : > { %2441 = vrot.lane.b32.xlu1 %v6817_v39, %s5734_s28  ;;  %v2133_v62 = vpop.permute.xlu0 %2132  ;;  %v7040_v39 = vld [vmem:[#allocation2 + $0xe8] sm:$0xff]  ;;  %2557 = vst.msk [vmem:[#allocation3 + $0x140] sm:$0xff] %vm484_vm0, %v2533_v31 }
 0x3ec   : > { %2205 = vst.msk [vmem:[#allocation3] sm:$0xff] %vm2204_vm5, %v2133_v62 }
 0x3ed   : > { %v2278_v33 = vpop.permute.xlu1 %2277  ;;  %2636 = vrot.lane.b32.xlu0 %v6730_v45, %s5731_s30 }
 0x3ee   : > { %2350 = vst.msk [vmem:[#allocation3] sm:$0xff] %vm2349_vm6, %v2278_v33 }
 0x3ef   : > { %2152 = vrot.lane.b32.xlu1 %v6733_v47, %s5731_s30  ;;  %v2906_v26 = vpop.permute.xlu0 %2905  ;;  %v7054_v47 = vld [vmem:[#allocation2 + $0xea] sm:$0xff] }
 0x3f0   : > { %2977 = vst.msk [vmem:[#allocation3 + $0x8] sm:$0xff] %vm2495_vm7, %v2906_v26 }
 0x3f1   : > { %v2424_v1 = vpop.permute.xlu1 %2423  ;;  %2781 = vrot.lane.b32.xlu0 %v7040_v39, %s5732_s17 }
 0x3f2   : > { %2496 = vst.msk [vmem:[#allocation3] sm:$0xff] %vm2495_vm7, %v2424_v1 }
 0x3f3   : > { %2297 = vrot.lane.b32.xlu1 %v6847_v46, %s5732_s17  ;;  %v2619_v48 = vpop.permute.xlu0 %2618 }
 0x3f4   : > { %2689 = vst.msk [vmem:[#allocation3 + $0x20] sm:$0xff] %vm2204_vm5, %v2619_v48  ;;  %v7102_v48 = vld [vmem:[#allocation2 + $0x134] sm:$0xff] }
 0x3f5   : > { %v2135_v49 = vpop.permute.xlu1 %2134  ;;  %2925 = vrot.lane.b32.xlu0 %v7054_v47, %s5734_s28  ;;  %3042 = vst.msk [vmem:[#allocation3 + $0x1a8] sm:$0xff] %vm484_vm0, %v7102_v48 }
 0x3f6   : > { %2206 = vst.msk [vmem:[#allocation3 + $0x18] sm:$0xff] %vm2204_vm5, %v2135_v49 }
 0x3f7   : > { %2443 = vrot.lane.b32.xlu1 %v6864_v24, %s5734_s28  ;;  %v2764_v51 = vpop.permute.xlu0 %2763  ;;  %v3050_v52 = vld [vmem:[#allocation3 + $0x8] sm:$0xff]  ;;  %v7070_v24 = vld [vmem:[#allocation2 + $0xf0] sm:$0xff] }
 0x3f8   : > { %2834 = vst.msk [vmem:[#allocation3 + $0x20] sm:$0xff] %vm2349_vm6, %v2764_v51  ;;  %3293 = vmatprep.mubr.f32.mxu0 %v3050_v52 }
 0x3f9   : > { %v2280_v46 = vpop.permute.xlu1 %2279  ;;  %v3049_v58 = vld [vmem:[#allocation3] sm:$0xff]  ;;  %2638 = vrot.lane.b32.xlu0 %v6771_v0, %s5731_s30 }
 0x3fa   : > { %2351 = vst.msk [vmem:[#allocation3 + $0x18] sm:$0xff] %vm2349_vm6, %v2280_v46  ;;  %3294 = vmatmul.mubr.f32.vlgmr.msra.gmra.mrb[0].mxu0 %v3049_v58 }
 0x3fb   : > { %2154 = vrot.lane.b32.xlu1 %v6773_v11, %s5731_s30  ;;  %v2908_v28 = vpop.permute.xlu0 %2907 }
 0x3fc   : > { %2978 = vst.msk [vmem:[#allocation3 + $0x20] sm:$0xff] %vm2495_vm7, %v2908_v28 }
 0x3fd   : > { %v2426_v13 = vpop.permute.xlu1 %2425  ;;  %2783 = vrot.lane.b32.xlu0 %v7070_v24, %s5732_s17 }
 0x3fe   : > { %2497 = vst.msk [vmem:[#allocation3 + $0x18] sm:$0xff] %vm2495_vm7, %v2426_v13 }
 0x3ff   : > { %2299 = vrot.lane.b32.xlu1 %v6892_v10, %s5732_s17  ;;  %v2621_v11 = vpop.permute.xlu0 %2620  ;;  %v2049_v10 = vld [vmem:[#allocation2 + $0x88] sm:$0xff] }
 0x400   : > { %2690 = vst.msk [vmem:[#allocation3 + $0x38] sm:$0xff] %vm2204_vm5, %v2621_v11 }
 0x401   : > { %v2137_v22 = vpop.permute.xlu1 %2136  ;;  %2927 = vrot.lane.b32.xlu0 %v6779_v14, %s5734_s28  ;;  %2073 = vst.msk [vmem:[#allocation3 + $0x138] sm:$0xff] %vm484_vm0, %v2049_v10 }
 0x402   : > { %2207 = vst.msk [vmem:[#allocation3 + $0x30] sm:$0xff] %vm2204_vm5, %v2137_v22 }
 0x403   : > { %2445 = vrot.lane.b32.xlu1 %v6908_v41, %s5734_s28  ;;  %v2766_v4 = vpop.permute.xlu0 %2765  ;;  %v3053_v33 = vld [vmem:[#allocation3 + $0x20] sm:$0xff] }
 0x404   : > { %2835 = vst.msk [vmem:[#allocation3 + $0x38] sm:$0xff] %vm2349_vm6, %v2766_v4  ;;  %3298 = vmatprep.mubr.f32.mxu0 %v3053_v33  ;;  %v7096_v41 = vld [vmem:[#allocation2 + $0x100] sm:$0xff] }
 0x405   : > { %v2282_v62 = vpop.permute.xlu1 %2281  ;;  %v3052_v36 = vld [vmem:[#allocation3 + $0x18] sm:$0xff]  ;;  %2640 = vrot.lane.b32.xlu0 %v6781_v15, %s5731_s30 }
 0x406   : > { %2352 = vst.msk [vmem:[#allocation3 + $0x30] sm:$0xff] %vm2349_vm6, %v2282_v62  ;;  %3299 = vmatmul.mubr.f32.gmra.mrb[2].mxu0 %v3052_v36  ;;  %v3096_v36 = vld [vmem:[#allocation3 + $0x178] sm:$0xff] }
 0x407   : > { %2156 = vrot.lane.b32.xlu1 %v6609_v17, %s5731_s30  ;;  %v2910_v26 = vpop.permute.xlu0 %2909 }
 0x408   : > { %2979 = vst.msk [vmem:[#allocation3 + $0x38] sm:$0xff] %vm2495_vm7, %v2910_v26 }
 0x409   : > { %v2428_v1 = vpop.permute.xlu1 %2427  ;;  %2785 = vrot.lane.b32.xlu0 %v7096_v41, %s5732_s17 }
 0x40a   : > { %2498 = vst.msk [vmem:[#allocation3 + $0x30] sm:$0xff] %vm2495_vm7, %v2428_v1 }
 0x40b   : > { %2301 = vrot.lane.b32.xlu1 %v6653_v30, %s5732_s17  ;;  %v2623_v17 = vpop.permute.xlu0 %2622  ;;  %v2050_v30 = vld [vmem:[#allocation2 + $0x90] sm:$0xff] }
 0x40c   : > { %2691 = vst.msk [vmem:[#allocation3 + $0x50] sm:$0xff] %vm2204_vm5, %v2623_v17 }
 0x40d   : > { %v2139_v49 = vpop.permute.xlu1 %2138  ;;  %2929 = vrot.lane.b32.xlu0 %v6789_v29, %s5734_s28  ;;  %2074 = vst.msk [vmem:[#allocation3 + $0x150] sm:$0xff] %vm484_vm0, %v2050_v30  ;;  %v7124_v29 = vld [vmem:[#allocation2 + $0x108] sm:$0xff]  ;;  %v2053_v30 = vld [vmem:[#allocation2 + $0xb0] sm:$0xff] }
 0x40e   : > { %2208 = vst.msk [vmem:[#allocation3 + $0x48] sm:$0xff] %vm2204_vm5, %v2139_v49 }
 0x40f   : > { %2447 = vrot.lane.b32.xlu1 %v6945_v57, %s5734_s28  ;;  %v2768_v51 = vpop.permute.xlu0 %2767  ;;  %v3056_v52 = vld [vmem:[#allocation3 + $0x38] sm:$0xff]  ;;  %2077 = vst.msk [vmem:[#allocation3 + $0x198] sm:$0xff] %vm484_vm0, %v2053_v30 }
 0x410   : > { %2836 = vst.msk [vmem:[#allocation3 + $0x50] sm:$0xff] %vm2349_vm6, %v2768_v51  ;;  %3303 = vmatprep.mubr.f32.mxu0 %v3056_v52 }
 0x411   : > { %v2284_v46 = vpop.permute.xlu1 %2283  ;;  %v3055_v58 = vld [vmem:[#allocation3 + $0x30] sm:$0xff]  ;;  %2642 = vrot.lane.b32.xlu0 %v6802_v32, %s5731_s30 }
 0x412   : > { %2353 = vst.msk [vmem:[#allocation3 + $0x48] sm:$0xff] %vm2349_vm6, %v2284_v46  ;;  %3304 = vmatmul.mubr.f32.gmra.mrb[4].mxu0 %v3055_v58 }
 0x413   : > { %2158 = vrot.lane.b32.xlu1 %v6615_v19, %s5731_s30  ;;  %v2912_v57 = vpop.permute.xlu0 %2911  ;;  %v2535_v19 = vld [vmem:[#allocation2 + $0xe2] sm:$0xff] }
 0x414   : > { %2980 = vst.msk [vmem:[#allocation3 + $0x50] sm:$0xff] %vm2495_vm7, %v2912_v57 }
 0x415   : > { %v2430_v59 = vpop.permute.xlu1 %2429  ;;  %2787 = vrot.lane.b32.xlu0 %v7124_v29, %s5732_s17  ;;  %2559 = vst.msk [vmem:[#allocation3 + $0x170] sm:$0xff] %vm484_vm0, %v2535_v19 }
 0x416   : > { %2499 = vst.msk [vmem:[#allocation3 + $0x48] sm:$0xff] %vm2495_vm7, %v2430_v59  ;;  %v3102_v59 = vld [vmem:[#allocation3 + $0x1a8] sm:$0xff] }
 0x417   : > { %2303 = vrot.lane.b32.xlu1 %v6679_v40, %s5732_s17  ;;  %v2625_v28 = vpop.permute.xlu0 %2624  ;;  %v2051_v40 = vld [vmem:[#allocation2 + $0xa0] sm:$0xff] }
 0x418   : > { %2692 = vst.msk [vmem:[#allocation3 + $0x68] sm:$0xff] %vm2204_vm5, %v2625_v28 }
 0x419   : > { %v2141_v13 = vpop.permute.xlu1 %2140  ;;  %2931 = vrot.lane.b32.xlu0 %v6807_v37, %s5734_s28  ;;  %2075 = vst.msk [vmem:[#allocation3 + $0x168] sm:$0xff] %vm484_vm0, %v2051_v40  ;;  %v3093_v37 = vld [vmem:[#allocation3 + $0x160] sm:$0xff]  ;;  %v3020_v40 = vld [vmem:[#allocation2 + $0x14c] sm:$0xff] }
 0x41a   : > { %2209 = vst.msk [vmem:[#allocation3 + $0x60] sm:$0xff] %vm2204_vm5, %v2141_v13  ;;  %5193 = vmatprep.mubr.msk.f32.mxu1 %vm484_vm0, %v3093_v37 }
 0x41b   : > { %2449 = vrot.lane.b32.xlu1 %v6971_v16, %s5734_s28  ;;  %v2770_v11 = vpop.permute.xlu0 %2769  ;;  %v3059_v31 = vld [vmem:[#allocation3 + $0x50] sm:$0xff]  ;;  %5194 = vmatmul.mubr.msk.f32.gmra.mrb[14].mxu1 %vm484_vm0, %v3096_v36  ;;  %3044 = vst.msk [vmem:[#allocation3 + $0x1d8] sm:$0xff] %vm484_vm0, %v3020_v40 }
 0x41c   : > { %2837 = vst.msk [vmem:[#allocation3 + $0x68] sm:$0xff] %vm2349_vm6, %v2770_v11  ;;  %3308 = vmatprep.mubr.f32.mxu0 %v3059_v31  ;;  %v7146_v16 = vld [vmem:[#allocation2 + $0x110] sm:$0xff]  ;;  %v2054_v31 = vld [vmem:[#allocation2 + $0xc0] sm:$0xff] }
 0x41d   : > { %v2286_v22 = vpop.permute.xlu1 %2285  ;;  %v3058_v4 = vld [vmem:[#allocation3 + $0x48] sm:$0xff]  ;;  %2644 = vrot.lane.b32.xlu0 %v6828_v5, %s5731_s30  ;;  %2078 = vst.msk [vmem:[#allocation3 + $0x1b0] sm:$0xff] %vm484_vm0, %v2054_v31 }
 0x41e   : > { %2354 = vst.msk [vmem:[#allocation3 + $0x60] sm:$0xff] %vm2349_vm6, %v2286_v22  ;;  %3309 = vmatmul.mubr.f32.gmra.mrb[6].mxu0 %v3058_v4 }
 0x41f   : > { %2160 = vrot.lane.b32.xlu1 %v6622_v21, %s5731_s30  ;;  %v2914_v62 = vpop.permute.xlu0 %2913 }
 0x420   : > { %2981 = vst.msk [vmem:[#allocation3 + $0x68] sm:$0xff] %vm2495_vm7, %v2914_v62 }
 0x421   : > { %v2432_v33 = vpop.permute.xlu1 %2431  ;;  %2789 = vrot.lane.b32.xlu0 %v7146_v16, %s5732_s17 }
 0x422   : > { %2500 = vst.msk [vmem:[#allocation3 + $0x60] sm:$0xff] %vm2495_vm7, %v2432_v33  ;;  %v3022_v33 = vld [vmem:[#allocation2 + $0x164] sm:$0xff] }
 0x423   : > { %2305 = vrot.lane.b32.xlu1 %v6690_v25, %s5732_s17  ;;  %v2627_v21 = vpop.permute.xlu0 %2626  ;;  %v2052_v25 = vld [vmem:[#allocation2 + $0xa8] sm:$0xff]  ;;  %3046 = vst.msk [vmem:[#allocation3 + $0x208] sm:$0xff] %vm484_vm0, %v3022_v33 }
 0x424   : > { %2693 = vst.msk [vmem:[#allocation3 + $0x80] sm:$0xff] %vm2204_vm5, %v2627_v21 }
 0x425   : > { %v2143_v10 = vpop.permute.xlu1 %2142  ;;  %2933 = vrot.lane.b32.xlu0 %v6857_v53, %s5734_s28  ;;  %2076 = vst.msk [vmem:[#allocation3 + $0x180] sm:$0xff] %vm484_vm0, %v2052_v25  ;;  %v7170_v53 = vld [vmem:[#allocation2 + $0x120] sm:$0xff] }
 0x426   : > { %2210 = vst.msk [vmem:[#allocation3 + $0x78] sm:$0xff] %vm2204_vm5, %v2143_v10 }
 0x427   : > { %2451 = vrot.lane.b32.xlu1 %v6991_v54, %s5734_s28  ;;  %v2772_v26 = vpop.permute.xlu0 %2771  ;;  %v3062_v3 = vld [vmem:[#allocation3 + $0x68] sm:$0xff] }
 0x428   : > { %2838 = vst.msk [vmem:[#allocation3 + $0x80] sm:$0xff] %vm2349_vm6, %v2772_v26  ;;  %3313 = vmatprep.mubr.f32.mxu0 %v3062_v3  ;;  %v2731_v3 = vld [vmem:[#allocation2 + $0x140] sm:$0xff] }
 0x429   : > { %v2288_v1 = vpop.permute.xlu1 %2287  ;;  %v3061_v17 = vld [vmem:[#allocation3 + $0x60] sm:$0xff]  ;;  %2646 = vrot.lane.b32.xlu0 %v6875_v63, %s5731_s30 }
 0x42a   : > { %2355 = vst.msk [vmem:[#allocation3 + $0x78] sm:$0xff] %vm2349_vm6, %v2288_v1  ;;  %3314 = vmatmul.mubr.f32.gmra.mrb[8].mxu0 %v3061_v17  ;;  %v3108_v1 = vld [vmem:[#allocation3 + $0x1d8] sm:$0xff] }
 0x42b   : > { %2162 = vrot.lane.b32.xlu1 %v6630_v23, %s5731_s30  ;;  %v2916_v54 = vpop.permute.xlu0 %2915 }
 0x42c   : > { %2982 = vst.msk [vmem:[#allocation3 + $0x80] sm:$0xff] %vm2495_vm7, %v2916_v54 }
 0x42d   : > { %v2434_v49 = vpop.permute.xlu1 %2433  ;;  %2791 = vrot.lane.b32.xlu0 %v7170_v53, %s5732_s17 }
 0x42e   : > { %2501 = vst.msk [vmem:[#allocation3 + $0x78] sm:$0xff] %vm2495_vm7, %v2434_v49  ;;  %v3114_v49 = vld [vmem:[#allocation3 + $0x208] sm:$0xff] }
 0x42f   : > { %2307 = vrot.lane.b32.xlu1 %v6710_v2, %s5732_s17  ;;  %v2629_v50 = vpop.permute.xlu0 %2628  ;;  %v3099_v2 = vld [vmem:[#allocation3 + $0x190] sm:$0xff] }
 0x430   : > { %2694 = vst.msk [vmem:[#allocation3 + $0x98] sm:$0xff] %vm2204_vm5, %v2629_v50  ;;  %5196 = vmatprep.mubr.msk.f32.mxu1 %vm484_vm0, %v3099_v2 }
 0x431   : > { %v2145_v51 = vpop.permute.xlu1 %2144  ;;  %2935 = vrot.lane.b32.xlu0 %v6901_v55, %s5734_s28  ;;  %v7191_v55 = vld [vmem:[#allocation2 + $0x128] sm:$0xff]  ;;  %5197 = vmatmul.mubr.msk.f32.gmra.mrb[16].mxu1 %vm484_vm0, %v3102_v59  ;;  %v3714_v59 = vld [vmem:[%s7933_s7 + $0x10] sm:$0xff] }
 0x432   : > { %2211 = vst.msk [vmem:[#allocation3 + $0x90] sm:$0xff] %vm2204_vm5, %v2145_v51 }
 0x433   : > { %2453 = vrot.lane.b32.xlu1 %v7014_v43, %s5734_s28  ;;  %v2774_v23 = vpop.permute.xlu0 %2773  ;;  %v3065_v52 = vld [vmem:[#allocation3 + $0x80] sm:$0xff] }
 0x434   : > { %2839 = vst.msk [vmem:[#allocation3 + $0x98] sm:$0xff] %vm2349_vm6, %v2774_v23  ;;  %3318 = vmatprep.mubr.f32.mxu0 %v3065_v52 }
 0x435   : > { %v2290_v46 = vpop.permute.xlu1 %2289  ;;  %v3064_v58 = vld [vmem:[#allocation3 + $0x78] sm:$0xff]  ;;  %2648 = vrot.lane.b32.xlu0 %v6917_v8, %s5731_s30 }
 0x436   : > { %2356 = vst.msk [vmem:[#allocation3 + $0x90] sm:$0xff] %vm2349_vm6, %v2290_v46  ;;  %3319 = vmatmul.mubr.f32.gmra.mrb[10].mxu0 %v3064_v58  ;;  %v3713_v46 = vld [vmem:[%s7933_s7 + $0x8] sm:$0xff] }
 0x437   : > { %2164 = vrot.lane.b32.xlu1 %v6641_v27, %s5731_s30  ;;  %v2918_v43 = vpop.permute.xlu0 %2917 }
 0x438   : > { %2983 = vst.msk [vmem:[#allocation3 + $0x98] sm:$0xff] %vm2495_vm7, %v2918_v43  ;;  %v2056_v43 = vld [vmem:[#allocation2 + $0xd0] sm:$0xff] }
 0x439   : > { %v2436_v57 = vpop.permute.xlu1 %2435  ;;  %2793 = vrot.lane.b32.xlu0 %v7191_v55, %s5732_s17  ;;  %2080 = vst.msk [vmem:[#allocation3 + $0x1e0] sm:$0xff] %vm484_vm0, %v2056_v43 }
 0x43a   : > { %2502 = vst.msk [vmem:[#allocation3 + $0x90] sm:$0xff] %vm2495_vm7, %v2436_v57 }
 0x43b   : > { %2309 = vrot.lane.b32.xlu1 %v6730_v45, %s5732_s17  ;;  %v2631_v27 = vpop.permute.xlu0 %2630  ;;  %v7214_v45 = vld [vmem:[#allocation2 + $0x130] sm:$0xff] }
 0x43c   : > { %2695 = vst.msk [vmem:[#allocation3 + $0xb0] sm:$0xff] %vm2204_vm5, %v2631_v27  ;;  %v3715_v27 = vld [vmem:[%s7933_s7 + $0x18] sm:$0xff] }
 0x43d   : > { %v2147_v28 = vpop.permute.xlu1 %2146  ;;  %2937 = vrot.lane.b32.xlu0 %v6937_v56, %s5734_s28  ;;  %v3019_v56 = vld [vmem:[#allocation2 + $0x144] sm:$0xff] }
 0x43e   : > { %2212 = vst.msk [vmem:[#allocation3 + $0xa8] sm:$0xff] %vm2204_vm5, %v2147_v28 }
 0x43f   : > { %2455 = vrot.lane.b32.xlu1 %v7040_v39, %s5734_s28  ;;  %v2776_v13 = vpop.permute.xlu0 %2775  ;;  %v3068_v11 = vld [vmem:[#allocation3 + $0x98] sm:$0xff]  ;;  %3043 = vst.msk [vmem:[#allocation3 + $0x1c0] sm:$0xff] %vm484_vm0, %v3019_v56 }
 0x440   : > { %2840 = vst.msk [vmem:[#allocation3 + $0xb0] sm:$0xff] %vm2349_vm6, %v2776_v13  ;;  %3323 = vmatprep.mubr.f32.mxu0 %v3068_v11 }
 0x441   : > { %v2292_v19 = vpop.permute.xlu1 %2291  ;;  %v3067_v22 = vld [vmem:[#allocation3 + $0x90] sm:$0xff]  ;;  %2650 = vrot.lane.b32.xlu0 %v6949_v18, %s5731_s30 }
 0x442   : > { %2357 = vst.msk [vmem:[#allocation3 + $0xa8] sm:$0xff] %vm2349_vm6, %v2292_v19  ;;  %3324 = vmatmul.mubr.f32.gmra.mrb[12].mxu0 %v3067_v22  ;;  %v5412_v19 = vpack.c.bf16 %v3715_v27, %v3714_v59 }
 0x443   : > { %2166 = vrot.lane.b32.xlu1 %v6924_v44, %s5731_s30  ;;  %v2920_v39 = vpop.permute.xlu0 %2919  ;;  %v3021_v44 = vld [vmem:[#allocation2 + $0x154] sm:$0xff] }
 0x444   : > { %2984 = vst.msk [vmem:[#allocation3 + $0xb0] sm:$0xff] %vm2495_vm7, %v2920_v39 }
 0x445   : > { %v2438_v4 = vpop.permute.xlu1 %2437  ;;  %2795 = vrot.lane.b32.xlu0 %v7214_v45, %s5732_s17  ;;  %3045 = vst.msk [vmem:[#allocation3 + $0x1f0] sm:$0xff] %vm484_vm0, %v3021_v44  ;;  %v2877_v44 = vld [vmem:[#allocation2 + $0x152] sm:$0xff] }
 0x446   : > { %2503 = vst.msk [vmem:[#allocation3 + $0xa8] sm:$0xff] %vm2495_vm7, %v2438_v4  ;;  %v3105_v36 = vld [vmem:[#allocation3 + $0x1c0] sm:$0xff] }
 0x447   : > { %2311 = vrot.lane.b32.xlu1 %v6771_v0, %s5732_s17  ;;  %v2633_v37 = vpop.permute.xlu0 %2632  ;;  %v3023_v0 = vld [vmem:[#allocation2 + $0x16c] sm:$0xff]  ;;  %5199 = vmatprep.mubr.msk.f32.mxu1 %vm484_vm0, %v3105_v36  ;;  %v2057_v4 = vld [vmem:[#allocation2 + $0xe0] sm:$0xff] }
 0x448   : > { %2696 = vst.msk [vmem:[#allocation3 + $0xc8] sm:$0xff] %vm2204_vm5, %v2633_v37  ;;  %5200 = vmatmul.mubr.msk.f32.gmra.mrb[18].mxu1 %vm484_vm0, %v3108_v1 }
 0x449   : > { %v2149_v62 = vpop.permute.xlu1 %2148  ;;  %2939 = vrot.lane.b32.xlu0 %v6963_v60, %s5734_s28  ;;  %3047 = vst.msk [vmem:[#allocation3 + $0x220] sm:$0xff] %vm484_vm0, %v3023_v0  ;;  %v2055_v60 = vld [vmem:[#allocation2 + $0xc8] sm:$0xff]  ;;  %2081 = vst.msk [vmem:[#allocation3 + $0x1f8] sm:$0xff] %vm484_vm0, %v2057_v4 }
 0x44a   : > { %2213 = vst.msk [vmem:[#allocation3 + $0xc0] sm:$0xff] %vm2204_vm5, %v2149_v62 }
 0x44b   : > { %2457 = vrot.lane.b32.xlu1 %v7070_v24, %s5734_s28  ;;  %v2778_v21 = vpop.permute.xlu0 %2777  ;;  %v3071_v38 = vld [vmem:[#allocation3 + $0xb0] sm:$0xff]  ;;  %2079 = vst.msk [vmem:[#allocation3 + $0x1c8] sm:$0xff] %vm484_vm0, %v2055_v60 }
 0x44c   : > { %2841 = vst.msk [vmem:[#allocation3 + $0xc8] sm:$0xff] %vm2349_vm6, %v2778_v21  ;;  %3328 = vmatprep.mubr.f32.mxu0 %v3071_v38  ;;  %v3024_v24 = vld [vmem:[#allocation2 + $0x174] sm:$0xff] }
 0x44d   : > { %v2294_v10 = vpop.permute.xlu1 %2293  ;;  %v3070_v26 = vld [vmem:[#allocation3 + $0xa8] sm:$0xff]  ;;  %2652 = vrot.lane.b32.xlu0 %v6973_v61, %s5731_s30  ;;  %3048 = vst.msk [vmem:[#allocation3 + $0x238] sm:$0xff] %vm484_vm0, %v3024_v24  ;;  %v3111_v17 = vld [vmem:[#allocation3 + $0x1f0] sm:$0xff] }
 0x44e   : > { %2358 = vst.msk [vmem:[#allocation3 + $0xc0] sm:$0xff] %vm2349_vm6, %v2294_v10  ;;  %3329 = vmatmul.mubr.f32.gmra.mrb[14].mxu0 %v3070_v26  ;;  %5202 = vmatprep.mubr.msk.f32.mxu1 %vm484_vm0, %v3111_v17  ;;  %v2875_v61 = vld [vmem:[#allocation2 + $0x142] sm:$0xff] }
 0x44f   : > { %2168 = vrot.lane.b32.xlu1 %v6957_v34, %s5731_s30  ;;  %v2922_v25 = vpop.permute.xlu0 %2921  ;;  %5203 = vmatmul.mubr.msk.f32.gmra.mrb[20].mxu1 %vm484_vm0, %v3114_v49 }
 0x450   : > { %2985 = vst.msk [vmem:[#allocation3 + $0xc8] sm:$0xff] %vm2495_vm7, %v2922_v25  ;;  %v3117_v34 = vld [vmem:[#allocation3 + $0x220] sm:$0xff]  ;;  %v2059_v25 = vld [vmem:[#allocation2 + $0xf0] sm:$0xff] }
 0x451   : > { %v2440_v54 = vpop.permute.xlu1 %2439  ;;  %2797 = vrot.lane.b32.xlu0 %v2731_v3, %s5732_s17  ;;  %5205 = vmatprep.mubr.msk.f32.mxu1 %vm484_vm0, %v3117_v34  ;;  %2083 = vst.msk [vmem:[#allocation3 + $0x228] sm:$0xff] %vm484_vm0, %v2059_v25 }
 0x452   : > { %2504 = vst.msk [vmem:[#allocation3 + $0xc0] sm:$0xff] %vm2495_vm7, %v2440_v54 }
 0x453   : > { %2313 = vrot.lane.b32.xlu1 %v6781_v15, %s5732_s17  ;;  %v2635_v50 = vpop.permute.xlu0 %2634  ;;  %v3712_v15 = vld [vmem:[%s7933_s7] sm:$0xff] }
 0x454   : > { %2697 = vst.msk [vmem:[#allocation3 + $0xe0] sm:$0xff] %vm2204_vm5, %v2635_v50  ;;  %v3120_v23 = vld [vmem:[#allocation3 + $0x238] sm:$0xff]  ;;  %v5408_v57 = vpack.c.bf16 %v3713_v46, %v3712_v15  ;;  %v2879_v50 = vld [vmem:[#allocation2 + $0x16a] sm:$0xff] }
 0x455   : > { %v2151_v51 = vpop.permute.xlu1 %2150  ;;  %2941 = vrot.lane.b32.xlu0 %v2875_v61, %s5734_s28  ;;  %5206 = vmatmul.mubr.msk.f32.gmra.mrb[22].mxu1 %vm484_vm0, %v3120_v23 }
 0x456   : > { %2214 = vst.msk [vmem:[#allocation3 + $0xd8] sm:$0xff] %vm2204_vm5, %v2151_v51  ;;  %5409 = vmatprep.subr.bf16.mxu1 %v5408_v57 }
 0x457   : > { %2459 = vrot.lane.b32.xlu1 %v7096_v41, %s5734_s28  ;;  %v2780_v52 = vpop.permute.xlu0 %2779  ;;  %v3074_v30 = vld [vmem:[#allocation3 + $0xc8] sm:$0xff]  ;;  %5411 = vmatpush3.bf16.msra.mxu1 %v5408_v57 }
 0x458   : > { %2842 = vst.msk [vmem:[#allocation3 + $0xe0] sm:$0xff] %vm2349_vm6, %v2780_v52  ;;  %3333 = vmatprep.mubr.f32.mxu0 %v3074_v30  ;;  %v2732_v41 = vld [vmem:[#allocation2 + $0x148] sm:$0xff]  ;;  %5413 = vmatprep.subr.bf16.mxu1 %v5412_v19 }
 0x459   : > { %v2296_v58 = vpop.permute.xlu1 %2295  ;;  %v3073_v2 = vld [vmem:[#allocation3 + $0xc0] sm:$0xff]  ;;  %2654 = vrot.lane.b32.xlu0 %v6995_v20, %s5731_s30 }
 0x45a   : > { %2359 = vst.msk [vmem:[#allocation3 + $0xd8] sm:$0xff] %vm2349_vm6, %v2296_v58  ;;  %3334 = vmatmul.mubr.f32.gmra.mrb[16].mxu0 %v3073_v2  ;;  %v2880_v58 = vld [vmem:[#allocation2 + $0x172] sm:$0xff] }
 0x45b   : > { %2170 = vrot.lane.b32.xlu1 %v6981_v12, %s5731_s30  ;;  %v2924_v28 = vpop.permute.xlu0 %2923  ;;  %v2876_v12 = vld [vmem:[#allocation2 + $0x14a] sm:$0xff]  ;;  %5415 = vmatpush3.bf16.msra.mxu1 %v5412_v19 }
 0x45c   : > { %2986 = vst.msk [vmem:[#allocation3 + $0xe0] sm:$0xff] %vm2495_vm7, %v2924_v28 }
 0x45d   : > { %v2442_v13 = vpop.permute.xlu1 %2441  ;;  %2799 = vrot.lane.b32.xlu0 %v2732_v41, %s5732_s17 }
 0x45e   : > { %2505 = vst.msk [vmem:[#allocation3 + $0xd8] sm:$0xff] %vm2495_vm7, %v2442_v13 }
 0x45f   : > { %2315 = vrot.lane.b32.xlu1 %v6802_v32, %s5732_s17  ;;  %v2637_v20 = vpop.permute.xlu0 %2636  ;;  %v2733_v32 = vld [vmem:[#allocation2 + $0x150] sm:$0xff] }
 0x460   : > { %2698 = vst.msk [vmem:[#allocation3 + $0xf8] sm:$0xff] %vm2204_vm5, %v2637_v20 }
 0x461   : > { %v2153_v11 = vpop.permute.xlu1 %2152  ;;  %2943 = vrot.lane.b32.xlu0 %v2876_v12, %s5734_s28 }
 0x462   : > { %2215 = vst.msk [vmem:[#allocation3 + $0xf0] sm:$0xff] %vm2204_vm5, %v2153_v11 }
 0x463   : > { %2461 = vrot.lane.b32.xlu1 %v7124_v29, %s5734_s28  ;;  %v2782_v22 = vpop.permute.xlu0 %2781  ;;  %v3077_v56 = vld [vmem:[#allocation3 + $0xe0] sm:$0xff] }
 0x464   : > { %2843 = vst.msk [vmem:[#allocation3 + $0xf8] sm:$0xff] %vm2349_vm6, %v2782_v22  ;;  %3338 = vmatprep.mubr.f32.mxu0 %v3077_v56 }
 0x465   : > { %v2298_v31 = vpop.permute.xlu1 %2297  ;;  %v3076_v39 = vld [vmem:[#allocation3 + $0xd8] sm:$0xff]  ;;  %2656 = vrot.lane.b32.xlu0 %v7016_v9, %s5731_s30 }
 0x466   : > { %2360 = vst.msk [vmem:[#allocation3 + $0xf0] sm:$0xff] %vm2349_vm6, %v2298_v31  ;;  %3339 = vmatmul.mubr.f32.gmra.mrb[18].mxu0 %v3076_v39 }
 0x467   : > { %2172 = vrot.lane.b32.xlu1 %v7003_v35, %s5731_s30  ;;  %v2926_v29 = vpop.permute.xlu0 %2925  ;;  %v7303_v35 = vpop.f32.mrb[0].mxu1 }
 0x468   : > { %2987 = vst.msk [vmem:[#allocation3 + $0xf8] sm:$0xff] %vm2495_vm7, %v2926_v29  ;;  %v7305_v0 = vpop.f32.mrb[1].mxu1 }
 0x469   : > { %v2444_v40 = vpop.permute.xlu1 %2443  ;;  %2801 = vrot.lane.b32.xlu0 %v2733_v32, %s5732_s17  ;;  %v7314_v10 = vpop.f32.mrb[2].mxu1 }
 0x46a   : > { %2506 = vst.msk [vmem:[#allocation3 + $0xf0] sm:$0xff] %vm2495_vm7, %v2444_v40  ;;  %v7316_v26 = vpop.f32.mrb[3].mxu1 }
 0x46b   : > { %2317 = vrot.lane.b32.xlu1 %v6828_v5, %s5732_s17  ;;  %v2639_v37 = vpop.permute.xlu0 %2638  ;;  %v2058_v5 = vld [vmem:[#allocation2 + $0xe8] sm:$0xff]  ;;  %v7328_v17 = vpop.f32.mrb[4].mxu1 }
 0x46c   : > { %2699 = vst.msk [vmem:[#allocation3 + $0x110] sm:$0xff] %vm2204_vm5, %v2639_v37  ;;  %v7331_v49 = vpop.f32.mrb[5].mxu1 }
 0x46d   : > { %v2155_v9 = vpop.permute.xlu1 %2154  ;;  %2945 = vrot.lane.b32.xlu0 %v2877_v44, %s5734_s28  ;;  %2082 = vst.msk [vmem:[#allocation3 + $0x210] sm:$0xff] %vm484_vm0, %v2058_v5 }
 0x46e   : > { %2216 = vst.msk [vmem:[#allocation3 + $0x108] sm:$0xff] %vm2204_vm5, %v2155_v9 }
 0x46f   : > { %2463 = vrot.lane.b32.xlu1 %v7146_v16, %s5734_s28  ;;  %v2784_v62 = vpop.permute.xlu0 %2783  ;;  %v3080_v33 = vld [vmem:[#allocation3 + $0xf8] sm:$0xff]  ;;  %v2734_v16 = vld [vmem:[#allocation2 + $0x160] sm:$0xff] }
 0x470   : > { %2844 = vst.msk [vmem:[#allocation3 + $0x110] sm:$0xff] %vm2349_vm6, %v2784_v62  ;;  %3343 = vmatprep.mubr.f32.mxu0 %v3080_v33 }
 0x471   : > { %v3079_v36 = vld [vmem:[#allocation3 + $0xf0] sm:$0xff]  ;;  %v2300_v21 = vpop.permute.xlu1 %2299  ;;  %2658 = vrot.lane.b32.xlu0 %v7046_v6, %s5731_s30  ;;  %v2878_v6 = vld [vmem:[#allocation2 + $0x162] sm:$0xff] }
 0x472   : > { %2361 = vst.msk [vmem:[#allocation3 + $0x108] sm:$0xff] %vm2349_vm6, %v2300_v21  ;;  %3344 = vmatmul.mubr.f32.gmra.mrb[20].mxu0 %v3079_v36 }
 0x473   : > { %2174 = vrot.lane.b32.xlu1 %v7024_v7, %s5731_s30  ;;  %v2928_v38 = vpop.permute.xlu0 %2927 }
 0x474   : > { %2988 = vst.msk [vmem:[#allocation3 + $0x110] sm:$0xff] %vm2495_vm7, %v2928_v38 }
 0x475   : > { %v2446_v1 = vpop.permute.xlu1 %2445  ;;  %2803 = vrot.lane.b32.xlu0 %v2734_v16, %s5732_s17 }
 0x476   : > { %2507 = vst.msk [vmem:[#allocation3 + $0x108] sm:$0xff] %vm2495_vm7, %v2446_v1 }
 0x477   : > { %2319 = vrot.lane.b32.xlu1 %v6875_v63, %s5732_s17  ;;  %v2641_v60 = vpop.permute.xlu0 %2640 }
 0x478   : > { %2700 = vst.msk [vmem:[#allocation3 + $0x128] sm:$0xff] %vm2204_vm5, %v2641_v60 }
 0x479   : > { %v2157_v7 = vpop.permute.xlu1 %2156  ;;  %2947 = vrot.lane.b32.xlu0 %v2878_v6, %s5734_s28 }
 0x47a   : > { %2217 = vst.msk [vmem:[#allocation3 + $0x120] sm:$0xff] %vm2204_vm5, %v2157_v7 }
 0x47b   : > { %2465 = vrot.lane.b32.xlu1 %v7170_v53, %s5734_s28  ;;  %v2786_v24 = vpop.permute.xlu0 %2785  ;;  %v3083_v3 = vld [vmem:[#allocation3 + $0x110] sm:$0xff]  ;;  %v2735_v53 = vld [vmem:[#allocation2 + $0x168] sm:$0xff] }
 0x47c   : > { %2845 = vst.msk [vmem:[#allocation3 + $0x128] sm:$0xff] %vm2349_vm6, %v2786_v24  ;;  %3348 = vmatprep.mubr.f32.mxu0 %v3083_v3 }
 0x47d   : > { %v2302_v63 = vpop.permute.xlu1 %2301  ;;  %v3082_v54 = vld [vmem:[#allocation3 + $0x108] sm:$0xff]  ;;  %2660 = vrot.lane.b32.xlu0 %v7074_v42, %s5731_s30 }
 0x47e   : > { %2362 = vst.msk [vmem:[#allocation3 + $0x120] sm:$0xff] %vm2349_vm6, %v2302_v63  ;;  %3349 = vmatmul.mubr.f32.gmra.mrb[22].mxu0 %v3082_v54  ;;  %v7365_v43 = vpop.f32.mrb[6].mxu1 }
 0x47f   : > { %2176 = vrot.lane.b32.xlu1 %v7054_v47, %s5731_s30  ;;  %v2930_v61 = vpop.permute.xlu0 %2929  ;;  %v7368_v41 = vpop.f32.mrb[7].mxu1 }
 0x480   : > { %2989 = vst.msk [vmem:[#allocation3 + $0x128] sm:$0xff] %vm2495_vm7, %v2930_v61 }
 0x481   : > { %v2448_v34 = vpop.permute.xlu1 %2447  ;;  %2805 = vrot.lane.b32.xlu0 %v2735_v53, %s5732_s17 }
 0x482   : > { %2508 = vst.msk [vmem:[#allocation3 + $0x120] sm:$0xff] %vm2495_vm7, %v2448_v34 }
 0x483   : > { %2321 = vrot.lane.b32.xlu1 %v6917_v8, %s5732_s17  ;;  %v2643_v51 = vpop.permute.xlu0 %2642  ;;  %v2736_v8 = vld [vmem:[#allocation2 + $0x170] sm:$0xff] }
 0x484   : > { %2701 = vst.msk [vmem:[#allocation3 + $0x140] sm:$0xff] %vm2204_vm5, %v2643_v51 }
 0x485   : > { %v2159_v42 = vpop.permute.xlu1 %2158  ;;  %2949 = vrot.lane.b32.xlu0 %v2879_v50, %s5734_s28 }
 0x486   : > { %2218 = vst.msk [vmem:[#allocation3 + $0x138] sm:$0xff] %vm2204_vm5, %v2159_v42  ;;  %v7409_v42 = vld [vmem:[%s7931_s5] ss:$0 sm:$0xff] }
 0x487   : > { %2467 = vrot.lane.b32.xlu1 %v7191_v55, %s5734_s28  ;;  %v2788_v47 = vpop.permute.xlu0 %2787  ;;  %v3086_v23 = vld [vmem:[#allocation3 + $0x128] sm:$0xff] }
 0x488   : > { %2846 = vst.msk [vmem:[#allocation3 + $0x140] sm:$0xff] %vm2349_vm6, %v2788_v47  ;;  %3353 = vmatprep.mubr.f32.mxu0 %v3086_v23 }
 0x489   : > { %v2304_v15 = vpop.permute.xlu1 %2303  ;;  %v3085_v46 = vld [vmem:[#allocation3 + $0x120] sm:$0xff]  ;;  %2662 = vrot.lane.b32.xlu0 %v7102_v48, %s5731_s30 }
 0x48a   : > { %2363 = vst.msk [vmem:[#allocation3 + $0x138] sm:$0xff] %vm2349_vm6, %v2304_v15  ;;  %3354 = vmatmul.mubr.f32.gmra.mrb[24].mxu0 %v3085_v46  ;;  %v7416_v15 = vld [vmem:[%s7932_s6] ss:$0 sm:$0xff] }
 0x48b   : > { %2178 = vrot.lane.b32.xlu1 %v6779_v14, %s5731_s30  ;;  %v2932_v52 = vpop.permute.xlu0 %2931  ;;  %s5460_s30 = smul.u32 24, %s5709_s14 }
 0x48c   : > { %2990 = vst.msk [vmem:[#allocation3 + $0x140] sm:$0xff] %vm2495_vm7, %v2932_v52 }
 0x48d   : > { %v2450_v55 = vpop.permute.xlu1 %2449  ;;  %2807 = vrot.lane.b32.xlu0 %v2736_v8, %s5732_s17 }
 0x48e   : > { %2509 = vst.msk [vmem:[#allocation3 + $0x138] sm:$0xff] %vm2495_vm7, %v2450_v55 }
 0x48f   : > { %2323 = vrot.lane.b32.xlu1 %v6949_v18, %s5732_s17  ;;  %v2645_v30 = vpop.permute.xlu0 %2644  ;;  %s7966_s17 = sld [smem:[#allocation17_spill]] }
 0x490   : > { %2702 = vst.msk [vmem:[#allocation3 + $0x158] sm:$0xff] %vm2204_vm5, %v2645_v30 }
 0x491   : > { %v2161_v48 = vpop.permute.xlu1 %2160  ;;  %2951 = vrot.lane.b32.xlu0 %v2880_v58, %s5734_s28 }
 0x492   : > { %2219 = vst.msk [vmem:[#allocation3 + $0x150] sm:$0xff] %vm2204_vm5, %v2161_v48 }
 0x493   : > { %2469 = vrot.lane.b32.xlu1 %v7214_v45, %s5734_s28  ;;  %v2790_v14 = vpop.permute.xlu0 %2789  ;;  %v3089_v2 = vld [vmem:[#allocation3 + $0x140] sm:$0xff] }
 0x494   : > { %2847 = vst.msk [vmem:[#allocation3 + $0x158] sm:$0xff] %vm2349_vm6, %v2790_v14  ;;  %3358 = vmatprep.mubr.f32.mxu0 %v3089_v2 }
 0x495   : > { %v2306_v57 = vpop.permute.xlu1 %2305  ;;  %v3088_v18 = vld [vmem:[#allocation3 + $0x138] sm:$0xff] }
 0x496   : > { %2364 = vst.msk [vmem:[#allocation3 + $0x150] sm:$0xff] %vm2349_vm6, %v2306_v57  ;;  %3359 = vmatmul.mubr.f32.gmra.mrb[26].mxu0 %v3088_v18 }
 0x497   : > { %v2934_v59 = vpop.permute.xlu0 %2933 }
 0x498   : > { %2991 = vst.msk [vmem:[#allocation3 + $0x158] sm:$0xff] %vm2495_vm7, %v2934_v59 }
 0x499   : > { %v2452_v27 = vpop.permute.xlu1 %2451 }
 0x49a   : > { %2510 = vst.msk [vmem:[#allocation3 + $0x150] sm:$0xff] %vm2495_vm7, %v2452_v27 }
 0x49b   : > { %v2647_v45 = vpop.permute.xlu0 %2646 }
 0x49c   : > { %2703 = vst.msk [vmem:[#allocation3 + $0x170] sm:$0xff] %vm2204_vm5, %v2647_v45 }
 0x49d   : > { %v2163_v28 = vpop.permute.xlu1 %2162 }
 0x49e   : > { %2220 = vst.msk [vmem:[#allocation3 + $0x168] sm:$0xff] %vm2204_vm5, %v2163_v28 }
 0x49f   : > { %v2792_v13 = vpop.permute.xlu0 %2791  ;;  %v3092_v19 = vld [vmem:[#allocation3 + $0x158] sm:$0xff] }
 0x4a0   : > { %2848 = vst.msk [vmem:[#allocation3 + $0x170] sm:$0xff] %vm2349_vm6, %v2792_v13  ;;  %3363 = vmatprep.mubr.f32.mxu0 %v3092_v19 }
 0x4a1   : > { %v2308_v12 = vpop.permute.xlu1 %2307  ;;  %v3091_v20 = vld [vmem:[#allocation3 + $0x150] sm:$0xff] }
 0x4a2   : > { %2365 = vst.msk [vmem:[#allocation3 + $0x168] sm:$0xff] %vm2349_vm6, %v2308_v12  ;;  %3364 = vmatmul.mubr.f32.gmra.mrb[28].mxu0 %v3091_v20 }
 0x4a3   : > { %v2936_v11 = vpop.permute.xlu0 %2935 }
 0x4a4   : > { %2992 = vst.msk [vmem:[#allocation3 + $0x170] sm:$0xff] %vm2495_vm7, %v2936_v11  ;;  %v7381_v32 = vpop.f32.mrb[8].mxu1 }
 0x4a5   : > { %v2454_v22 = vpop.permute.xlu1 %2453  ;;  %v7384_v44 = vpop.f32.mrb[9].mxu1 }
 0x4a6   : > { %2511 = vst.msk [vmem:[#allocation3 + $0x168] sm:$0xff] %vm2495_vm7, %v2454_v22 }
 0x4a7   : > { %v2649_v31 = vpop.permute.xlu0 %2648 }
 0x4a8   : > { %2704 = vst.msk [vmem:[#allocation3 + $0x188] sm:$0xff] %vm2204_vm5, %v2649_v31  ;;  %v7397_v3 = vpop.f32.mrb[10].mxu1 }
 0x4a9   : > { %v2165_v56 = vpop.permute.xlu1 %2164  ;;  %v7400_v54 = vpop.f32.mrb[11].mxu1 }
 0x4aa   : > { %2221 = vst.msk [vmem:[#allocation3 + $0x180] sm:$0xff] %vm2204_vm5, %v2165_v56 }
 0x4ab   : > { %v2794_v39 = vpop.permute.xlu0 %2793  ;;  %v3095_v4 = vld [vmem:[#allocation3 + $0x170] sm:$0xff] }
 0x4ac   : > { %2849 = vst.msk [vmem:[#allocation3 + $0x188] sm:$0xff] %vm2349_vm6, %v2794_v39  ;;  %3368 = vmatprep.mubr.f32.mxu0 %v3095_v4  ;;  %v7429_v19 = vpop.f32.mrb[12].mxu1 }
 0x4ad   : > { %v2310_v29 = vpop.permute.xlu1 %2309  ;;  %v3094_v40 = vld [vmem:[#allocation3 + $0x168] sm:$0xff]  ;;  %v7432_v11 = vpop.f32.mrb[13].mxu1 }
 0x4ae   : > { %2366 = vst.msk [vmem:[#allocation3 + $0x180] sm:$0xff] %vm2349_vm6, %v2310_v29  ;;  %3369 = vmatmul.mubr.f32.gmra.mrb[30].mxu0 %v3094_v40 }
 0x4af   : > { %v2938_v37 = vpop.permute.xlu0 %2937 }
 0x4b0   : > { %2993 = vst.msk [vmem:[#allocation3 + $0x188] sm:$0xff] %vm2495_vm7, %v2938_v37 }
 0x4b1   : > { %v2456_v9 = vpop.permute.xlu1 %2455 }
 0x4b2   : > { %2512 = vst.msk [vmem:[#allocation3 + $0x180] sm:$0xff] %vm2495_vm7, %v2456_v9 }
 0x4b3   : > { %v2651_v62 = vpop.permute.xlu0 %2650 }
 0x4b4   : > { %2705 = vst.msk [vmem:[#allocation3 + $0x1a0] sm:$0xff] %vm2204_vm5, %v2651_v62 }
 0x4b5   : > { %v2167_v33 = vpop.permute.xlu1 %2166 }
 0x4b6   : > { %2222 = vst.msk [vmem:[#allocation3 + $0x198] sm:$0xff] %vm2204_vm5, %v2167_v33 }
 0x4b7   : > { %v2796_v36 = vpop.permute.xlu0 %2795  ;;  %v3098_v5 = vld [vmem:[#allocation3 + $0x188] sm:$0xff] }
 0x4b8   : > { %2850 = vst.msk [vmem:[#allocation3 + $0x1a0] sm:$0xff] %vm2349_vm6, %v2796_v36  ;;  %3373 = vmatprep.mubr.f32.mxu0 %v3098_v5 }
 0x4b9   : > { %v2312_v21 = vpop.permute.xlu1 %2311  ;;  %v3097_v16 = vld [vmem:[#allocation3 + $0x180] sm:$0xff] }
 0x4ba   : > { %2367 = vst.msk [vmem:[#allocation3 + $0x198] sm:$0xff] %vm2349_vm6, %v2312_v21  ;;  %3374 = vmatmul.mubr.f32.gmra.mrb[32].mxu0 %v3097_v16 }
 0x4bb   : > { %v2940_v38 = vpop.permute.xlu0 %2939 }
 0x4bc   : > { %2994 = vst.msk [vmem:[#allocation3 + $0x1a0] sm:$0xff] %vm2495_vm7, %v2940_v38 }
 0x4bd   : > { %v2458_v1 = vpop.permute.xlu1 %2457 }
 0x4be   : > { %2513 = vst.msk [vmem:[#allocation3 + $0x198] sm:$0xff] %vm2495_vm7, %v2458_v1 }
 0x4bf   : > { %v2653_v6 = vpop.permute.xlu0 %2652 }
 0x4c0   : > { %2706 = vst.msk [vmem:[#allocation3 + $0x1b8] sm:$0xff] %vm2204_vm5, %v2653_v6 }
 0x4c1   : > { %v2169_v60 = vpop.permute.xlu1 %2168 }
 0x4c2   : > { %2223 = vst.msk [vmem:[#allocation3 + $0x1b0] sm:$0xff] %vm2204_vm5, %v2169_v60 }
 0x4c3   : > { %v2798_v7 = vpop.permute.xlu0 %2797  ;;  %v3101_v24 = vld [vmem:[#allocation3 + $0x1a0] sm:$0xff] }
 0x4c4   : > { %2851 = vst.msk [vmem:[#allocation3 + $0x1b8] sm:$0xff] %vm2349_vm6, %v2798_v7  ;;  %3378 = vmatprep.mubr.f32.mxu0 %v3101_v24 }
 0x4c5   : > { %v2314_v25 = vpop.permute.xlu1 %2313  ;;  %v3100_v63 = vld [vmem:[#allocation3 + $0x198] sm:$0xff] }
 0x4c6   : > { %2368 = vst.msk [vmem:[#allocation3 + $0x1b0] sm:$0xff] %vm2349_vm6, %v2314_v25  ;;  %3379 = vmatmul.mubr.f32.gmra.mrb[34].mxu0 %v3100_v63 }
 0x4c7   : > { %v2942_v53 = vpop.permute.xlu0 %2941 }
 0x4c8   : > { %2995 = vst.msk [vmem:[#allocation3 + $0x1b8] sm:$0xff] %vm2495_vm7, %v2942_v53 }
 0x4c9   : > { %v2460_v61 = vpop.permute.xlu1 %2459 }
 0x4ca   : > { %2514 = vst.msk [vmem:[#allocation3 + $0x1b0] sm:$0xff] %vm2495_vm7, %v2460_v61 }
 0x4cb   : > { %v2655_v34 = vpop.permute.xlu0 %2654 }
 0x4cc   : > { %2707 = vst.msk [vmem:[#allocation3 + $0x1d0] sm:$0xff] %vm2204_vm5, %v2655_v34 }
 0x4cd   : > { %v2171_v50 = vpop.permute.xlu1 %2170  ;;  %v3295_v51 = vpop.f32.mrb[0].mxu0 }
 0x4ce   : > { %2224 = vst.msk [vmem:[#allocation3 + $0x1c8] sm:$0xff] %vm2204_vm5, %v2171_v50  ;;  %v3481_v47 = vadd.f32 %v7305_v0, %v3295_v51  ;;  %v3297_v23 = vpop.f32.mrb[1].mxu0 }
 0x4cf   : > { %v2800_v8 = vpop.permute.xlu0 %2799  ;;  %v3104_v52 = vld [vmem:[#allocation3 + $0x1b8] sm:$0xff] }
 0x4d0   : > { %v3606_v46 = vmul.f32 %v7409_v42, %v3481_v47  ;;  %2852 = vst.msk [vmem:[#allocation3 + $0x1d0] sm:$0xff] %vm2349_vm6, %v2800_v8  ;;  %3383 = vmatprep.mubr.f32.mxu0 %v3104_v52 }
 0x4d1   : > { %v2316_v55 = vpop.permute.xlu1 %2315  ;;  %v3103_v58 = vld [vmem:[#allocation3 + $0x1b0] sm:$0xff] }
 0x4d2   : > { %2369 = vst.msk [vmem:[#allocation3 + $0x1c8] sm:$0xff] %vm2349_vm6, %v2316_v55  ;;  %3384 = vmatmul.mubr.f32.gmra.mrb[36].mxu0 %v3103_v58  ;;  %v3637_v0 = vadd.f32 %v7416_v15, %v3606_v46 }
 0x4d3   : > { %v2944_v30 = vpop.permute.xlu0 %2943 }
 0x4d4   : > { %v3661_v48 = vmax.f32 %v3637_v0, 0.0  ;;  %2996 = vst.msk [vmem:[#allocation3 + $0x1d0] sm:$0xff] %vm2495_vm7, %v2944_v30 }
 0x4d5   : > { %v2462_v14 = vpop.permute.xlu1 %2461 }
 0x4d6   : > { %2515 = vst.msk [vmem:[#allocation3 + $0x1c8] sm:$0xff] %vm2495_vm7, %v2462_v14  ;;  %5216 = vmatprep.mubr.msk.f32.mxu1 %vm484_vm0, %v3661_v48 }
 0x4d7   : > { %v2657_v2 = vpop.permute.xlu0 %2656 }
 0x4d8   : > { %2708 = vst.msk [vmem:[#allocation3 + $0x1e8] sm:$0xff] %vm2204_vm5, %v2657_v2 }
 0x4d9   : > { %v2173_v57 = vpop.permute.xlu1 %2172  ;;  %v3300_v18 = vpop.f32.mrb[2].mxu0 }
 0x4da   : > { %2225 = vst.msk [vmem:[#allocation3 + $0x1e0] sm:$0xff] %vm2204_vm5, %v2173_v57  ;;  %v3486_v59 = vadd.f32 %v7303_v35, %v3300_v18  ;;  %v3302_v27 = vpop.f32.mrb[3].mxu0 }
 0x4db   : > { %v2802_v28 = vpop.permute.xlu0 %2801  ;;  %v3107_v13 = vld [vmem:[#allocation3 + $0x1d0] sm:$0xff] }
 0x4dc   : > { %v3607_v45 = vmul.f32 %v7409_v42, %v3486_v59  ;;  %2853 = vst.msk [vmem:[#allocation3 + $0x1e8] sm:$0xff] %vm2349_vm6, %v2802_v28  ;;  %3388 = vmatprep.mubr.f32.mxu0 %v3107_v13 }
 0x4dd   : > { %v2318_v12 = vpop.permute.xlu1 %2317  ;;  %v3106_v20 = vld [vmem:[#allocation3 + $0x1c8] sm:$0xff] }
 0x4de   : > { %v3638_v22 = vadd.f32 %v7416_v15, %v3607_v45  ;;  %2370 = vst.msk [vmem:[#allocation3 + $0x1e0] sm:$0xff] %vm2349_vm6, %v2318_v12  ;;  %3389 = vmatmul.mubr.f32.gmra.mrb[38].mxu0 %v3106_v20 }
 0x4df   : > { %v2946_v31 = vpop.permute.xlu0 %2945 }
 0x4e0   : > { %v3662_v35 = vmax.f32 %v3638_v22, 0.0  ;;  %2997 = vst.msk [vmem:[#allocation3 + $0x1e8] sm:$0xff] %vm2495_vm7, %v2946_v31 }
 0x4e1   : > { %v2464_v56 = vpop.permute.xlu1 %2463 }
 0x4e2   : > { %2516 = vst.msk [vmem:[#allocation3 + $0x1e0] sm:$0xff] %vm2495_vm7, %v2464_v56  ;;  %5217 = vmatmul.mubr.msk.f32.vlgmr.msra.gmra.mrb[24].mxu1 %vm484_vm0, %v3662_v35 }
 0x4e3   : > { %v2659_v39 = vpop.permute.xlu0 %2658 }
 0x4e4   : > { %2709 = vst.msk [vmem:[#allocation3 + $0x200] sm:$0xff] %vm2204_vm5, %v2659_v39 }
 0x4e5   : > { %v2175_v4 = vpop.permute.xlu1 %2174  ;;  %v3305_v29 = vpop.f32.mrb[4].mxu0 }
 0x4e6   : > { %2226 = vst.msk [vmem:[#allocation3 + $0x1f8] sm:$0xff] %vm2204_vm5, %v2175_v4  ;;  %v3491_v40 = vadd.f32 %v7316_v26, %v3305_v29  ;;  %v3307_v37 = vpop.f32.mrb[5].mxu0 }
 0x4e7   : > { %v2804_v62 = vpop.permute.xlu0 %2803  ;;  %v3110_v33 = vld [vmem:[#allocation3 + $0x1e8] sm:$0xff] }
 0x4e8   : > { %v3608_v9 = vmul.f32 %v7409_v42, %v3491_v40  ;;  %2854 = vst.msk [vmem:[#allocation3 + $0x200] sm:$0xff] %vm2349_vm6, %v2804_v62  ;;  %3393 = vmatprep.mubr.f32.mxu0 %v3110_v33 }
 0x4e9   : > { %v2320_v36 = vpop.permute.xlu1 %2319  ;;  %v3109_v5 = vld [vmem:[#allocation3 + $0x1e0] sm:$0xff] }
 0x4ea   : > { %2371 = vst.msk [vmem:[#allocation3 + $0x1f8] sm:$0xff] %vm2349_vm6, %v2320_v36  ;;  %3394 = vmatmul.mubr.f32.gmra.mrb[40].mxu0 %v3109_v5  ;;  %v3639_v21 = vadd.f32 %v7416_v15, %v3608_v9 }
 0x4eb   : > { %v2948_v16 = vpop.permute.xlu0 %2947 }
 0x4ec   : > { %v3663_v38 = vmax.f32 %v3639_v21, 0.0  ;;  %2998 = vst.msk [vmem:[#allocation3 + $0x200] sm:$0xff] %vm2495_vm7, %v2948_v16 }
 0x4ed   : > { %v2466_v26 = vpop.permute.xlu1 %2465 }
 0x4ee   : > { %2517 = vst.msk [vmem:[#allocation3 + $0x1f8] sm:$0xff] %vm2495_vm7, %v2466_v26  ;;  %5219 = vmatprep.mubr.msk.f32.mxu1 %vm484_vm0, %v3663_v38  ;;  %v7453_v61 = vpop.f32.mrb[14].mxu1 }
 0x4ef   : > { %v2661_v1 = vpop.permute.xlu0 %2660  ;;  %v7456_v51 = vpop.f32.mrb[15].mxu1 }
 0x4f0   : > { %2710 = vst.msk [vmem:[#allocation3 + $0x218] sm:$0xff] %vm2204_vm5, %v2661_v1 }
 0x4f1   : > { %v2177_v6 = vpop.permute.xlu1 %2176  ;;  %v3310_v60 = vpop.f32.mrb[6].mxu0 }
 0x4f2   : > { %2227 = vst.msk [vmem:[#allocation3 + $0x210] sm:$0xff] %vm2204_vm5, %v2177_v6  ;;  %v3496_v7 = vadd.f32 %v7314_v10, %v3310_v60  ;;  %v3312_v24 = vpop.f32.mrb[7].mxu0 }
 0x4f3   : > { %v2806_v63 = vpop.permute.xlu0 %2805  ;;  %v3113_v53 = vld [vmem:[#allocation3 + $0x200] sm:$0xff] }
 0x4f4   : > { %v3609_v25 = vmul.f32 %v7409_v42, %v3496_v7  ;;  %2855 = vst.msk [vmem:[#allocation3 + $0x218] sm:$0xff] %vm2349_vm6, %v2806_v63  ;;  %3398 = vmatprep.mubr.f32.mxu0 %v3113_v53 }
 0x4f5   : > { %v2322_v34 = vpop.permute.xlu1 %2321  ;;  %v3112_v50 = vld [vmem:[#allocation3 + $0x1f8] sm:$0xff] }
 0x4f6   : > { %2372 = vst.msk [vmem:[#allocation3 + $0x210] sm:$0xff] %vm2349_vm6, %v2322_v34  ;;  %3399 = vmatmul.mubr.f32.gmra.mrb[42].mxu0 %v3112_v50  ;;  %v3640_v47 = vadd.f32 %v7416_v15, %v3609_v25 }
 0x4f7   : > { %v2950_v10 = vpop.permute.xlu0 %2949 }
 0x4f8   : > { %v3664_v23 = vmax.f32 %v3640_v47, 0.0  ;;  %2999 = vst.msk [vmem:[#allocation3 + $0x218] sm:$0xff] %vm2495_vm7, %v2950_v10 }
 0x4f9   : > { %v2468_v46 = vpop.permute.xlu1 %2467 }
 0x4fa   : > { %2518 = vst.msk [vmem:[#allocation3 + $0x210] sm:$0xff] %vm2495_vm7, %v2468_v46  ;;  %5220 = vmatmul.mubr.msk.f32.gmra.mrb[26].mxu1 %vm484_vm0, %v3664_v23  ;;  %v4035_v46 = vld [vmem:[%s7936_s10] sm:$0xff] }
 0x4fb   : > { %v2663_v8 = vpop.permute.xlu0 %2662 }
 0x4fc   : > { %2711 = vst.msk [vmem:[#allocation3 + $0x230] sm:$0xff] %vm2204_vm5, %v2663_v8  ;;  %v4036_v8 = vld [vmem:[%s7936_s10 + $0x8] sm:$0xff] }
 0x4fd   : > { %v2179_v52 = vpop.permute.xlu1 %2178  ;;  %v3315_v55 = vpop.f32.mrb[8].mxu0 }
 0x4fe   : > { %2228 = vst.msk [vmem:[#allocation3 + $0x228] sm:$0xff] %vm2204_vm5, %v2179_v52  ;;  %v3501_v58 = vadd.f32 %v7331_v49, %v3315_v55  ;;  %v3317_v0 = vpop.f32.mrb[9].mxu0  ;;  %v5416_v52 = vpack.c.bf16 %v4036_v8, %v4035_v46 }
 0x4ff   : > { %v2808_v48 = vpop.permute.xlu0 %2807  ;;  %v3116_v14 = vld [vmem:[#allocation3 + $0x218] sm:$0xff] }
 0x500   : > { %v3610_v30 = vmul.f32 %v7409_v42, %v3501_v58  ;;  %2856 = vst.msk [vmem:[#allocation3 + $0x230] sm:$0xff] %vm2349_vm6, %v2808_v48  ;;  %3403 = vmatprep.mubr.f32.mxu0 %v3116_v14  ;;  %5417 = vmatprep.subr.bf16.mxu1 %v5416_v52  ;;  %v4037_v14 = vld [vmem:[%s7936_s10 + $0x10] sm:$0xff] }
 0x501   : > { %v2324_v2 = vpop.permute.xlu1 %2323  ;;  %v3115_v57 = vld [vmem:[#allocation3 + $0x210] sm:$0xff]  ;;  %5419 = vmatpush3.bf16.msra.mxu1 %v5416_v52 }
 0x502   : > { %2373 = vst.msk [vmem:[#allocation3 + $0x228] sm:$0xff] %vm2349_vm6, %v2324_v2  ;;  %3404 = vmatmul.mubr.f32.gmra.mrb[44].mxu0 %v3115_v57  ;;  %v3641_v18 = vadd.f32 %v7416_v15, %v3610_v30  ;;  %v4038_v2 = vld [vmem:[%s7936_s10 + $0x18] sm:$0xff] }
 0x503   : > { %v2952_v59 = vpop.permute.xlu0 %2951  ;;  %v5420_v57 = vpack.c.bf16 %v4038_v2, %v4037_v14 }
 0x504   : > { %v3665_v27 = vmax.f32 %v3641_v18, 0.0  ;;  %3000 = vst.msk [vmem:[#allocation3 + $0x230] sm:$0xff] %vm2495_vm7, %v2952_v59  ;;  %v7475_v22 = vpop.f32.mrb[16].mxu1 }
 0x505   : > { %v2470_v49 = vpop.permute.xlu1 %2469  ;;  %v7477_v31 = vpop.f32.mrb[17].mxu1  ;;  %5421 = vmatprep.subr.bf16.mxu1 %v5420_v57 }
 0x506   : > { %2519 = vst.msk [vmem:[#allocation3 + $0x228] sm:$0xff] %vm2495_vm7, %v2470_v49  ;;  %5222 = vmatprep.mubr.msk.f32.mxu1 %vm484_vm0, %v3665_v27  ;;  %5423 = vmatpush3.bf16.msra.mxu1 %v5420_v57 }
 0x509   : > { %v3320_v45 = vpop.f32.mrb[10].mxu0 }
 0x50a   : > { %v3506_v28 = vadd.f32 %v7328_v17, %v3320_v45  ;;  %v3322_v13 = vpop.f32.mrb[11].mxu0 }
 0x50b   : > { %v3119_v20 = vld [vmem:[#allocation3 + $0x230] sm:$0xff]  ;;  %v4040_v13 = vld [vmem:[%s7936_s10 + $0x28] sm:$0xff] }
 0x50c   : > { %v3611_v12 = vmul.f32 %v7409_v42, %v3506_v28  ;;  %3408 = vmatprep.mubr.f32.mxu0 %v3119_v20  ;;  %v4039_v28 = vld [vmem:[%s7936_s10 + $0x20] sm:$0xff] }
 0x50d   : > { %v3118_v35 = vld [vmem:[#allocation3 + $0x228] sm:$0xff] }
 0x50e   : > { %3409 = vmatmul.mubr.f32.gmra.mrb[46].mxu0 %v3118_v35  ;;  %v3642_v56 = vadd.f32 %v7416_v15, %v3611_v12  ;;  %v5424_v12 = vpack.c.bf16 %v4040_v13, %v4039_v28 }
 0x510   : > { %v3666_v39 = vmax.f32 %v3642_v56, 0.0  ;;  %5425 = vmatprep.subr.bf16.mxu1 %v5424_v12 }
 0x511   : > { %5427 = vmatpush3.bf16.msra.mxu1 %v5424_v12 }
 0x512   : > { %5223 = vmatmul.mubr.msk.f32.gmra.mrb[28].mxu1 %vm484_vm0, %v3666_v39 }
 0x515   : > { %v3325_v4 = vpop.f32.mrb[12].mxu0 }
 0x516   : > { %v3511_v29 = vadd.f32 %v7368_v41, %v3325_v4  ;;  %v3327_v17 = vpop.f32.mrb[13].mxu0 }
 0x517   : > { %v4042_v17 = vld [vmem:[%s7936_s10 + $0x38] sm:$0xff] }
 0x518   : > { %v3612_v40 = vmul.f32 %v7409_v42, %v3511_v29  ;;  %v4041_v29 = vld [vmem:[%s7936_s10 + $0x30] sm:$0xff] }
 0x51a   : > { %v3643_v37 = vadd.f32 %v7416_v15, %v3612_v40  ;;  %v5428_v40 = vpack.c.bf16 %v4042_v17, %v4041_v29 }
 0x51b   : > { %v7486_v5 = vpop.f32.mrb[18].mxu1 }
 0x51c   : > { %v3667_v9 = vmax.f32 %v3643_v37, 0.0  ;;  %v7489_v16 = vpop.f32.mrb[19].mxu1  ;;  %5429 = vmatprep.subr.bf16.mxu1 %v5428_v40 }
 0x51d   : > { %5431 = vmatpush3.bf16.msra.mxu1 %v5428_v40 }
 0x51e   : > { %5225 = vmatprep.mubr.msk.f32.mxu1 %vm484_vm0, %v3667_v9 }
 0x521   : > { %v3330_v62 = vpop.f32.mrb[14].mxu0 }
 0x522   : > { %v3516_v33 = vadd.f32 %v7365_v43, %v3330_v62  ;;  %v3332_v36 = vpop.f32.mrb[15].mxu0  ;;  %v7495_v7 = vpop.f32.mrb[20].mxu1 }
 0x523   : > { %v7498_v24 = vpop.f32.mrb[21].mxu1 }
 0x524   : > { %v3613_v21 = vmul.f32 %v7409_v42, %v3516_v33 }
 0x526   : > { %v3644_v41 = vadd.f32 %v7416_v15, %v3613_v21 }
 0x528   : > { %v3668_v38 = vmax.f32 %v3644_v41, 0.0  ;;  %v7500_v25 = vpop.f32.mrb[22].mxu1 }
 0x529   : > { %v7502_v53 = vpop.f32.mrb[23].mxu1 }
 0x52a   : > { %5226 = vmatmul.mubr.msk.f32.gmra.mrb[30].mxu1 %vm484_vm0, %v3668_v38 }
 0x52d   : > { %v3335_v26 = vpop.f32.mrb[16].mxu0 }
 0x52e   : > { %v3521_v1 = vadd.f32 %v7384_v44, %v3335_v26  ;;  %v3337_v6 = vpop.f32.mrb[17].mxu0 }
 0x530   : > { %v3614_v60 = vmul.f32 %v7409_v42, %v3521_v1 }
 0x532   : > { %v3645_v43 = vadd.f32 %v7416_v15, %v3614_v60 }
 0x534   : > { %v3669_v63 = vmax.f32 %v3645_v43, 0.0 }
 0x536   : > { %5228 = vmatprep.mubr.msk.f32.mxu1 %vm484_vm0, %v3669_v63 }
 0x539   : > { %v3340_v34 = vpop.f32.mrb[18].mxu0 }
 0x53a   : > { %v3526_v50 = vadd.f32 %v7381_v32, %v3340_v34  ;;  %v3342_v44 = vpop.f32.mrb[19].mxu0 }
 0x53c   : > { %v3615_v47 = vmul.f32 %v7409_v42, %v3526_v50 }
 0x53e   : > { %v3646_v10 = vadd.f32 %v7416_v15, %v3615_v47 }
 0x540   : > { %v3670_v23 = vmax.f32 %v3646_v10, 0.0 }
 0x542   : > { %5229 = vmatmul.mubr.msk.f32.gmra.mrb[32].mxu1 %vm484_vm0, %v3670_v23 }
 0x545   : > { %v3345_v32 = vpop.f32.mrb[20].mxu0 }
 0x546   : > { %v3531_v55 = vadd.f32 %v7400_v54, %v3345_v32  ;;  %v3347_v58 = vpop.f32.mrb[21].mxu0 }
 0x548   : > { %v3616_v0 = vmul.f32 %v7409_v42, %v3531_v55 }
 0x54a   : > { %v3647_v30 = vadd.f32 %v7416_v15, %v3616_v0 }
 0x54c   : > { %v3671_v48 = vmax.f32 %v3647_v30, 0.0 }
 0x54e   : > { %5231 = vmatprep.mubr.msk.f32.mxu1 %vm484_vm0, %v3671_v48 }
 0x551   : > { %v3350_v54 = vpop.f32.mrb[22].mxu0 }
 0x552   : > { %v3536_v18 = vadd.f32 %v7397_v3, %v3350_v54  ;;  %v3352_v59 = vpop.f32.mrb[23].mxu0 }
 0x554   : > { %v3617_v27 = vmul.f32 %v7409_v42, %v3536_v18 }
 0x556   : > { %v3648_v49 = vadd.f32 %v7416_v15, %v3617_v27 }
 0x558   : > { %v3672_v45 = vmax.f32 %v3648_v49, 0.0 }
 0x55a   : > { %5232 = vmatmul.mubr.msk.f32.gmra.mrb[34].mxu1 %vm484_vm0, %v3672_v45 }
 0x55d   : > { %v3355_v3 = vpop.f32.mrb[24].mxu0 }
 0x55e   : > { %v3541_v20 = vadd.f32 %v7432_v11, %v3355_v3  ;;  %v3357_v35 = vpop.f32.mrb[25].mxu0 }
 0x560   : > { %v3618_v56 = vmul.f32 %v7409_v42, %v3541_v20 }
 0x562   : > { %v3649_v39 = vadd.f32 %v7416_v15, %v3618_v56 }
 0x564   : > { %v3673_v4 = vmax.f32 %v3649_v39, 0.0 }
 0x566   : > { %5234 = vmatprep.mubr.msk.f32.mxu1 %vm484_vm0, %v3673_v4 }
 0x569   : > { %v3360_v11 = vpop.f32.mrb[26].mxu0 }
 0x56a   : > { %v3546_v37 = vadd.f32 %v7429_v19, %v3360_v11  ;;  %v3362_v9 = vpop.f32.mrb[27].mxu0 }
 0x56c   : > { %v3619_v62 = vmul.f32 %v7409_v42, %v3546_v37 }
 0x56e   : > { %v3650_v33 = vadd.f32 %v7416_v15, %v3619_v62 }
 0x570   : > { %v3674_v36 = vmax.f32 %v3650_v33, 0.0 }
 0x572   : > { %5235 = vmatmul.mubr.msk.f32.gmra.mrb[36].mxu1 %vm484_vm0, %v3674_v36 }
 0x575   : > { %v3365_v21 = vpop.f32.mrb[28].mxu0 }
 0x576   : > { %v3551_v41 = vadd.f32 %v7456_v51, %v3365_v21  ;;  %v3367_v38 = vpop.f32.mrb[29].mxu0 }
 0x578   : > { %v3620_v26 = vmul.f32 %v7409_v42, %v3551_v41 }
 0x57a   : > { %v3651_v1 = vadd.f32 %v7416_v15, %v3620_v26 }
 0x57c   : > { %v3675_v6 = vmax.f32 %v3651_v1, 0.0 }
 0x57e   : > { %5237 = vmatprep.mubr.msk.f32.mxu1 %vm484_vm0, %v3675_v6  ;;  %v3690_v6 = vld [vmem:[%s7599_s13 + $0x10] sm:$0xff] }
 0x581   : > { %v3370_v19 = vpop.f32.mrb[30].mxu0 }
 0x582   : > { %v3556_v60 = vadd.f32 %v7453_v61, %v3370_v19  ;;  %v3372_v43 = vpop.f32.mrb[31].mxu0  ;;  %v3691_v19 = vld [vmem:[%s7599_s13 + $0x18] sm:$0xff] }
 0x583   : > { %v3694_v43 = vld [vmem:[%s7599_s13 + $0x30] sm:$0xff] }
 0x584   : > { %v3621_v63 = vmul.f32 %v7409_v42, %v3556_v60  ;;  %v3692_v60 = vld [vmem:[%s7599_s13 + $0x20] sm:$0xff] }
 0x586   : > { %v3652_v34 = vadd.f32 %v7416_v15, %v3621_v63  ;;  %v3695_v63 = vld [vmem:[%s7599_s13 + $0x38] sm:$0xff] }
 0x588   : > { %v3676_v50 = vmax.f32 %v3652_v34, 0.0  ;;  %v3696_v34 = vld [vmem:[%s7599_s13 + $0x40] sm:$0xff] }
 0x58a   : > { %5238 = vmatmul.mubr.msk.f32.gmra.mrb[38].mxu1 %vm484_vm0, %v3676_v50  ;;  %v3697_v50 = vld [vmem:[%s7599_s13 + $0x48] sm:$0xff] }
 0x58d   : > { %v3375_v51 = vpop.f32.mrb[32].mxu0 }
 0x58e   : > { %v3561_v44 = vadd.f32 %v7477_v31, %v3375_v51  ;;  %v3377_v47 = vpop.f32.mrb[33].mxu0  ;;  %v3698_v51 = vld [vmem:[%s7599_s13 + $0x50] sm:$0xff] }
 0x590   : > { %v3622_v10 = vmul.f32 %v7409_v42, %v3561_v44 }
 0x592   : > { %v3653_v23 = vadd.f32 %v7416_v15, %v3622_v10  ;;  %v3699_v10 = vld [vmem:[%s7599_s13 + $0x58] sm:$0xff] }
 0x594   : > { %v3677_v46 = vmax.f32 %v3653_v23, 0.0  ;;  %v3700_v23 = vld [vmem:[%s7599_s13 + $0x60] sm:$0xff] }
 0x596   : > { %5240 = vmatprep.mubr.msk.f32.mxu1 %vm484_vm0, %v3677_v46  ;;  %v3701_v46 = vld [vmem:[%s7599_s13 + $0x68] sm:$0xff] }
 0x599   : > { %v3380_v61 = vpop.f32.mrb[34].mxu0 }
 0x59a   : > { %v3566_v8 = vadd.f32 %v7475_v22, %v3380_v61  ;;  %v3382_v52 = vpop.f32.mrb[35].mxu0  ;;  %v3702_v61 = vld [vmem:[%s7599_s13 + $0x70] sm:$0xff] }
 0x59b   : > { %v3704_v52 = vld [vmem:[%s7599_s13 + $0x80] sm:$0xff] }
 0x59c   : > { %v3623_v32 = vmul.f32 %v7409_v42, %v3566_v8  ;;  %v3703_v8 = vld [vmem:[%s7599_s13 + $0x78] sm:$0xff] }
 0x59e   : > { %v3654_v55 = vadd.f32 %v7416_v15, %v3623_v32  ;;  %v3705_v32 = vld [vmem:[%s7599_s13 + $0x88] sm:$0xff] }
 0x5a0   : > { %v3678_v58 = vmax.f32 %v3654_v55, 0.0  ;;  %v3706_v55 = vld [vmem:[%s7599_s13 + $0x90] sm:$0xff] }
 0x5a2   : > { %5241 = vmatmul.mubr.msk.f32.gmra.mrb[40].mxu1 %vm484_vm0, %v3678_v58  ;;  %v3707_v58 = vld [vmem:[%s7599_s13 + $0x98] sm:$0xff] }
 0x5a5   : > { %v3385_v31 = vpop.f32.mrb[36].mxu0 }
 0x5a6   : > { %v3571_v0 = vadd.f32 %v7489_v16, %v3385_v31  ;;  %v3387_v30 = vpop.f32.mrb[37].mxu0  ;;  %v3708_v31 = vld [vmem:[%s7599_s13 + $0xa0] sm:$0xff] }
 0x5a7   : > { %v3710_v30 = vld [vmem:[%s7599_s13 + $0xb0] sm:$0xff] }
 0x5a8   : > { %v3624_v48 = vmul.f32 %v7409_v42, %v3571_v0  ;;  %v3709_v0 = vld [vmem:[%s7599_s13 + $0xa8] sm:$0xff] }
 0x5aa   : > { %v3655_v14 = vadd.f32 %v7416_v15, %v3624_v48 }
 0x5ac   : > { %v3679_v2 = vmax.f32 %v3655_v14, 0.0 }
 0x5ae   : > { %5243 = vmatprep.mubr.msk.f32.mxu1 %vm484_vm0, %v3679_v2  ;;  %v3711_v2 = vld [vmem:[%s7599_s13 + $0xb8] sm:$0xff] }
 0x5b1   : > { %v3390_v22 = vpop.f32.mrb[38].mxu0 }
 0x5b2   : > { %v3576_v57 = vadd.f32 %v7486_v5, %v3390_v22  ;;  %v3392_v54 = vpop.f32.mrb[39].mxu0 }
 0x5b4   : > { %v3625_v18 = vmul.f32 %v7409_v42, %v3576_v57 }
 0x5b5   : > { %v7571_v59 = vpop.f32.mrb[24].mxu1 }
 0x5b6   : > { %v7573_v27 = vpop.f32.mrb[25].mxu1  ;;  %v3656_v16 = vadd.f32 %v7416_v15, %v3625_v18 }
 0x5b8   : > { %v3680_v49 = vmax.f32 %v3656_v16, 0.0 }
 0x5ba   : > { %5244 = vmatmul.mubr.msk.f32.gmra.mrb[42].mxu1 %vm484_vm0, %v3680_v49 }
 0x5bd   : > { %v3395_v45 = vpop.f32.mrb[40].mxu0 }
 0x5be   : > { %v3581_v28 = vadd.f32 %v7498_v24, %v3395_v45  ;;  %v3397_v13 = vpop.f32.mrb[41].mxu0 }
 0x5c0   : > { %v3626_v12 = vmul.f32 %v7409_v42, %v3581_v28 }
 0x5c2   : > { %v3657_v5 = vadd.f32 %v7416_v15, %v3626_v12 }
 0x5c4   : > { %v3681_v3 = vmax.f32 %v3657_v5, 0.0 }
 0x5c6   : > { %5246 = vmatprep.mubr.msk.f32.mxu1 %vm484_vm0, %v3681_v3 }
 0x5c9   : > { %v3400_v20 = vpop.f32.mrb[42].mxu0 }
 0x5ca   : > { %v3586_v35 = vadd.f32 %v7495_v7, %v3400_v20  ;;  %v3402_v56 = vpop.f32.mrb[43].mxu0  ;;  %v7688_v20 = vld [vmem:[%s7966_s17] ss:$0 sm:$0xff]  ;;  %s5461_s17 = smul.u32 72, %s7970_s20  ;;  %s5735_s20 = smov [#allocation7]  }
 0x5cc   : > { %v3627_v39 = vmul.f32 %v7409_v42, %v3586_v35  ;;  %s4449_s14 = sadd.s32 %s5461_s17, %s5460_s30  ;;  %s5607_s30 = sshll.u32 %s5735_s20, 4  ;;  %s5608_s30 = int_to_ptr.vmem [resolvable:$false] %s5607_s30 }
 0x5cd   : > { %v7583_v4 = vpop.f32.mrb[26].mxu1  ;;  %s4761_s28 = sshll.u32 %s4449_s14, 7  ;;  %s5609_s17 = scalar_lea.vmem %s5608_s30, 6144 }
 0x5ce   : > { %v7585_v29 = vpop.f32.mrb[27].mxu1  ;;  %v3658_v24 = vadd.f32 %v7416_v15, %v3627_v39  ;;  %v7697_v39 = vld [vmem:[%s7967_s22] ss:$0 sm:$0xff]  ;;  %p5610_p11 = scmp.lt.s32.totalorder %s7859_s23, %s5608_s30 }
 0x5d0   : > { %v3682_v17 = vmax.f32 %v3658_v24, 0.0  ;;  %v3981_v24 = vmul.f32 %v7571_v59, %v7688_v20 }
 0x5d2   : > { %5247 = vmatmul.mubr.msk.f32.gmra.mrb[44].mxu1 %vm484_vm0, %v3682_v17  ;;  %v7704_v17 = vld [vmem:[%s7968_s15] ss:$0 sm:$0xff]  ;;  %s7857_s15 = scalar_lea.hbm %s7971_s19, %s4761_s28 }
 0x5d3   : > { %v4012_v59 = vadd.f32 %v7704_v17, %v3981_v24 }
 0x5d5   : > { %v3405_v40 = vpop.f32.mrb[44].mxu0 }
 0x5d6   : > { %v3591_v11 = vadd.f32 %v7502_v53, %v3405_v40  ;;  %v3407_v37 = vpop.f32.mrb[45].mxu0  ;;  %v3980_v40 = vmul.f32 %v7688_v20, %v7573_v27 }
 0x5d8   : > { %v3628_v7 = vmul.f32 %v7409_v42, %v3591_v11  ;;  %v4011_v27 = vadd.f32 %v7704_v17, %v3980_v40 }
 0x5da   : > { %v3659_v9 = vadd.f32 %v7416_v15, %v3628_v7 }
 0x5dc   : > { %v3683_v62 = vmax.f32 %v3659_v9, 0.0 }
 0x5de   : > { %5249 = vmatprep.mubr.msk.f32.mxu1 %vm484_vm0, %v3683_v62 }
 0x5e1   : > { %v3410_v33 = vpop.f32.mrb[46].mxu0 }
 0x5e2   : > { %v3596_v36 = vadd.f32 %v7500_v25, %v3410_v33  ;;  %v3412_v21 = vpop.f32.mrb[47].mxu0  ;;  %v3688_v25 = vld [vmem:[%s7599_s13] sm:$0xff]  ;;  %v3983_v33 = vmul.f32 %v7583_v4, %v7688_v20 }
 0x5e3   : > { %v3982_v21 = vmul.f32 %v7688_v20, %v7585_v29 }
 0x5e4   : > { %v3629_v41 = vmul.f32 %v7409_v42, %v3596_v36  ;;  %v3689_v42 = vld [vmem:[%s7599_s13 + $0x8] sm:$0xff]  ;;  %v4014_v4 = vadd.f32 %v7704_v17, %v3983_v33 }
 0x5e5   : > { %v7596_v38 = vpop.f32.mrb[28].mxu1 }
 0x5e6   : > { %v7601_v53 = vpop.f32.mrb[29].mxu1  ;;  %v3660_v26 = vadd.f32 %v7416_v15, %v3629_v41  ;;  %v3693_v15 = vld [vmem:[%s7599_s13 + $0x28] sm:$0xff]  ;;  %s7969_s13 = sld [smem:[#allocation20_spill]] }
 0x5e8   : > { %v3684_v1 = vmax.f32 %v3660_v26, 0.0 }
 0x5ea   : > { %5250 = vmatmul.mubr.msk.f32.gmra.mrb[46].mxu1 %vm484_vm0, %v3684_v1 }
 0x5eb   : > { %5268 = vmatprep.mubr.msk.f32.mxu1 %vm4043_vm8, %v3688_v25 }
 0x5ec   : > { %v7711_v37 = vld [vmem:[%s7969_s13] ss:$0 sm:$0xff]  ;;  %s5603_s13 = scalar_lea.vmem %s7859_s23, 3072 }
 0x5ed   : > { %p5604_p1 = scmp.ne.s32.totalorder %s7859_s23, %s5603_s13  ;;  %p5611_p13 = scmp.lt.s32.totalorder %s5609_s17, %s5603_s13 }
 0x5ee   : > { %5269 = vmatmul.mubr.msk.f32.vlgmr.msra.gmra.mrb[48].mxu1 %vm4043_vm8, %v3689_v42 }
 0x5ef   : > { %5271 = vmatprep.mubr.msk.f32.mxu1 %vm4043_vm8, %v3690_v6  ;;  %p5605_p8 = pnand %p5604_p1, %p7973_p3  ;;  %p5612_p5 = por %p5611_p13, %p5610_p11 }
 0x5f1   : > { %p5606_p10 = pneg %p5605_p8 }
 0x5f2   : > { %5272 = vmatmul.mubr.msk.f32.gmra.mrb[50].mxu1 %vm4043_vm8, %v3691_v19 }
 0x5f3   : > { %5274 = vmatprep.mubr.msk.f32.mxu1 %vm4043_vm8, %v3692_v60  ;;  %v3985_v60 = vmul.f32 %v7596_v38, %v7688_v20  ;;  %p5613_p6 = pnand %p5612_p5, %p5606_p10 }
 0x5f6   : > { %5275 = vmatmul.mubr.msk.f32.gmra.mrb[52].mxu1 %vm4043_vm8, %v3693_v15 }
 0x5f7   : > { %5277 = vmatprep.mubr.msk.f32.mxu1 %vm4043_vm8, %v3694_v43  ;;  %v4013_v43 = vadd.f32 %v7704_v17, %v3982_v21 }
 0x5fa   : > { %5278 = vmatmul.mubr.msk.f32.gmra.mrb[54].mxu1 %vm4043_vm8, %v3695_v63  ;;  %v3984_v63 = vmul.f32 %v7688_v20, %v7601_v53 }
 0x5fb   : > { %5280 = vmatprep.mubr.msk.f32.mxu1 %vm4043_vm8, %v3696_v34 }
 0x5fd   : > { %v7625_v44 = vpop.f32.mrb[30].mxu1 }
 0x5fe   : > { %v7627_v47 = vpop.f32.mrb[31].mxu1  ;;  %5281 = vmatmul.mubr.msk.f32.gmra.mrb[56].mxu1 %vm4043_vm8, %v3697_v50  ;;  %v3987_v53 = vmul.f32 %v7625_v44, %v7688_v20 }
 0x5ff   : > { %5283 = vmatprep.mubr.msk.f32.mxu1 %vm4043_vm8, %v3698_v51 }
 0x602   : > { %5284 = vmatmul.mubr.msk.f32.gmra.mrb[58].mxu1 %vm4043_vm8, %v3699_v10 }
 0x603   : > { %5286 = vmatprep.mubr.msk.f32.mxu1 %vm4043_vm8, %v3700_v23 }
 0x606   : > { %5287 = vmatmul.mubr.msk.f32.gmra.mrb[60].mxu1 %vm4043_vm8, %v3701_v46 }
 0x607   : > { %5289 = vmatprep.mubr.msk.f32.mxu1 %vm4043_vm8, %v3702_v61 }
 0x60a   : > { %5290 = vmatmul.mubr.msk.f32.gmra.mrb[62].mxu1 %vm4043_vm8, %v3703_v8  ;;  %v4016_v8 = vadd.f32 %v7704_v17, %v3985_v60 }
 0x60b   : > { %5292 = vmatprep.mubr.msk.f32.mxu1 %vm4043_vm8, %v3704_v52 }
 0x60e   : > { %5293 = vmatmul.mubr.msk.f32.gmra.mrb[64].mxu1 %vm4043_vm8, %v3705_v32 }
 0x60f   : > { %5295 = vmatprep.mubr.msk.f32.mxu1 %vm4043_vm8, %v3706_v55  ;;  %v4015_v55 = vadd.f32 %v7704_v17, %v3984_v63 }
 0x612   : > { %5296 = vmatmul.mubr.msk.f32.gmra.mrb[66].mxu1 %vm4043_vm8, %v3707_v58  ;;  %v3986_v58 = vmul.f32 %v7688_v20, %v7627_v47 }
 0x613   : > { %5298 = vmatprep.mubr.msk.f32.mxu1 %vm4043_vm8, %v3708_v31 }
 0x615   : > { %v7653_v48 = vpop.f32.mrb[32].mxu1 }
 0x616   : > { %v7655_v14 = vpop.f32.mrb[33].mxu1  ;;  %5299 = vmatmul.mubr.msk.f32.gmra.mrb[68].mxu1 %vm4043_vm8, %v3709_v0  ;;  %v3989_v47 = vmul.f32 %v7653_v48, %v7688_v20 }
 0x617   : > { %5301 = vmatprep.mubr.msk.f32.mxu1 %vm4043_vm8, %v3710_v30  ;;  %v3988_v33 = vmul.f32 %v7688_v20, %v7655_v14 }
 0x61a   : > { %5302 = vmatmul.mubr.msk.f32.gmra.mrb[70].mxu1 %vm4043_vm8, %v3711_v2 }
 0x62d   : > { %v7661_v22 = vpop.f32.mrb[34].mxu1 }
 0x62e   : > { %v7663_v57 = vpop.f32.mrb[35].mxu1  ;;  %v3991_v14 = vmul.f32 %v7661_v22, %v7688_v20 }
 0x62f   : > { %v3990_v60 = vmul.f32 %v7688_v20, %v7663_v57 }
 0x645   : > { %v7665_v54 = vpop.f32.mrb[36].mxu1 }
 0x646   : > { %v7667_v18 = vpop.f32.mrb[37].mxu1  ;;  %v3993_v57 = vmul.f32 %v7665_v54, %v7688_v20 }
 0x65d   : > { %v7669_v16 = vpop.f32.mrb[38].mxu1 }
 0x65e   : > { %v7671_v49 = vpop.f32.mrb[39].mxu1 }
 0x675   : > { %v7673_v45 = vpop.f32.mrb[40].mxu1 }
 0x676   : > { %v7675_v28 = vpop.f32.mrb[41].mxu1 }
 0x68d   : > { %v7677_v13 = vpop.f32.mrb[42].mxu1 }
 0x68e   : > { %v7679_v12 = vpop.f32.mrb[43].mxu1 }
 0x6a5   : > { %v7681_v5 = vpop.f32.mrb[44].mxu1 }
 0x6a6   : > { %v7683_v3 = vpop.f32.mrb[45].mxu1 }
 0x6bd   : > { %v7690_v35 = vpop.f32.mrb[46].mxu1 }
 0x6be   : > { %v7692_v56 = vpop.f32.mrb[47].mxu1 }
 0x6c1   : > { %v5270_v11 = vpop.f32.mrb[48].mxu1 }
 0x6c2   : > { %v4309_v7 = vmul.f32 %v5270_v11, %v7697_v39  ;;  %v4182_v9 = vpop.f32.mrb[49].mxu1 }
 0x6c3   : > { %v4308_v62 = vmul.f32 %v7697_v39, %v4182_v9 }
 0x6c4   : > { %v4340_v36 = vadd.f32 %v7711_v37, %v4309_v7  ;;  %v4018_v7 = vadd.f32 %v7704_v17, %v3987_v53 }
 0x6c5   : > { %v4339_v41 = vadd.f32 %v7711_v37, %v4308_v62  ;;  %v5273_v26 = vpop.f32.mrb[50].mxu1 }
 0x6c6   : > { %v4364_v1 = vadd.f32 %v4340_v36, %v4012_v59  ;;  %v4311_v25 = vmul.f32 %v5273_v26, %v7697_v39  ;;  %v4192_v42 = vpop.f32.mrb[51].mxu1  ;;  %v4017_v59 = vadd.f32 %v7704_v17, %v3986_v58 }
 0x6c7   : > { %v4363_v6 = vadd.f32 %v4339_v41, %v4011_v27  ;;  %v4310_v19 = vmul.f32 %v7697_v39, %v4192_v42  ;;  %v4020_v42 = vadd.f32 %v7704_v17, %v3989_v47 }
 0x6c8   : > { %v4388_v15 = vmax.f32 %v4364_v1, 0.0  ;;  %v4342_v29 = vadd.f32 %v7711_v37, %v4311_v25 }
 0x6c9   : > { %v4387_v34 = vmax.f32 %v4363_v6, 0.0  ;;  %v4341_v50 = vadd.f32 %v7711_v37, %v4310_v19  ;;  %v5276_v51 = vpop.f32.mrb[52].mxu1 }
 0x6ca   : > { %4412 = vst [vmem:[%s6071_s12 + $0x8] sm:$0xff] %v4388_v15  ;;  %v4366_v10 = vadd.f32 %v4342_v29, %v4014_v4  ;;  %v4313_v23 = vmul.f32 %v5276_v51, %v7697_v39  ;;  %v4202_v46 = vpop.f32.mrb[53].mxu1  ;;  %v4019_v4 = vadd.f32 %v7704_v17, %v3988_v33 }
 0x6cb   : > { %4411 = vst [vmem:[%s6071_s12] sm:$0xff] %v4387_v34  ;;  %v4365_v38 = vadd.f32 %v4341_v50, %v4013_v43  ;;  %v4312_v61 = vmul.f32 %v7697_v39, %v4202_v46 }
 0x6cc   : > { %v4390_v52 = vmax.f32 %v4366_v10, 0.0  ;;  %v4344_v32 = vadd.f32 %v7711_v37, %v4313_v23  ;;  %v4022_v10 = vadd.f32 %v7704_v17, %v3991_v14 }
 0x6cd   : > { %v4389_v31 = vmax.f32 %v4365_v38, 0.0  ;;  %v4343_v0 = vadd.f32 %v7711_v37, %v4312_v61  ;;  %v5279_v30 = vpop.f32.mrb[54].mxu1  ;;  %v4021_v38 = vadd.f32 %v7704_v17, %v3990_v60  ;;  %v3992_v61 = vmul.f32 %v7688_v20, %v7667_v18 }
 0x6ce   : > { %4414 = vst [vmem:[%s6071_s12 + $0x18] sm:$0xff] %v4390_v52  ;;  %v4368_v2 = vadd.f32 %v4344_v32, %v4016_v8  ;;  %v4315_v24 = vmul.f32 %v5279_v30, %v7697_v39  ;;  %v4212_v40 = vpop.f32.mrb[55].mxu1  ;;  %v3995_v18 = vmul.f32 %v7669_v16, %v7688_v20 }
 0x6cf   : > { %4413 = vst [vmem:[%s6071_s12 + $0x10] sm:$0xff] %v4389_v31  ;;  %v4367_v44 = vadd.f32 %v4343_v0, %v4015_v55  ;;  %v4314_v11 = vmul.f32 %v7697_v39, %v4212_v40  ;;  %v4024_v0 = vadd.f32 %v7704_v17, %v3993_v57  ;;  %v3994_v40 = vmul.f32 %v7688_v20, %v7671_v49 }
 0x6d0   : > { %v4392_v9 = vmax.f32 %v4368_v2, 0.0  ;;  %v4346_v62 = vadd.f32 %v7711_v37, %v4315_v24  ;;  %v4023_v24 = vadd.f32 %v7704_v17, %v3992_v61  ;;  %v4026_v33 = vadd.f32 %v7704_v17, %v3995_v18 }
 0x6d1   : > { %v4391_v36 = vmax.f32 %v4367_v44, 0.0  ;;  %v4345_v27 = vadd.f32 %v7711_v37, %v4314_v11  ;;  %v5282_v21 = vpop.f32.mrb[56].mxu1  ;;  %v3997_v49 = vmul.f32 %v7673_v45, %v7688_v20  ;;  %v4000_v61 = vmul.f32 %v7688_v20, %v7683_v3 }
 0x6d2   : > { %4416 = vst [vmem:[%s6071_s12 + $0x28] sm:$0xff] %v4392_v9  ;;  %v4370_v41 = vadd.f32 %v4346_v62, %v4018_v7  ;;  %v4317_v26 = vmul.f32 %v5282_v21, %v7697_v39  ;;  %v4222_v1 = vpop.f32.mrb[57].mxu1  ;;  %v4025_v21 = vadd.f32 %v7704_v17, %v3994_v40  ;;  %v4003_v3 = vmul.f32 %v7690_v35, %v7688_v20 }
 0x6d3   : > { %4415 = vst [vmem:[%s6071_s12 + $0x20] sm:$0xff] %v4391_v36  ;;  %v4369_v48 = vadd.f32 %v4345_v27, %v4017_v59  ;;  %v4316_v25 = vmul.f32 %v7697_v39, %v4222_v1 }
 0x6d4   : > { %v4394_v6 = vmax.f32 %v4370_v41, 0.0  ;;  %v4348_v19 = vadd.f32 %v7711_v37, %v4317_v26  ;;  %v3996_v41 = vmul.f32 %v7688_v20, %v7675_v28  ;;  %v3999_v28 = vmul.f32 %v7677_v13, %v7688_v20 }
 0x6d5   : > { %v4393_v15 = vmax.f32 %v4369_v48, 0.0  ;;  %v4347_v29 = vadd.f32 %v7711_v37, %v4316_v25  ;;  %v5285_v43 = vpop.f32.mrb[58].mxu1 }
 0x6d6   : > { %4418 = vst [vmem:[%s6071_s12 + $0x38] sm:$0xff] %v4394_v6  ;;  %v4372_v63 = vadd.f32 %v4348_v19, %v4020_v42  ;;  %v4319_v34 = vmul.f32 %v5285_v43, %v7697_v39  ;;  %v4232_v50 = vpop.f32.mrb[59].mxu1  ;;  %v4028_v19 = vadd.f32 %v7704_v17, %v3997_v49  ;;  %v4030_v57 = vadd.f32 %v7704_v17, %v3999_v28 }
 0x6d7   : > { %4417 = vst [vmem:[%s6071_s12 + $0x30] sm:$0xff] %v4393_v15  ;;  %v4371_v22 = vadd.f32 %v4347_v29, %v4019_v4  ;;  %v4318_v51 = vmul.f32 %v7697_v39, %v4232_v50  ;;  %v4027_v15 = vadd.f32 %v7704_v17, %v3996_v41  ;;  %v3998_v29 = vmul.f32 %v7688_v20, %v7679_v12 }
 0x6d8   : > { %v4396_v23 = vmax.f32 %v4372_v63, 0.0  ;;  %v4350_v46 = vadd.f32 %v7711_v37, %v4319_v34  ;;  %v4001_v12 = vmul.f32 %v7681_v5, %v7688_v20 }
 0x6d9   : > { %v4395_v8 = vmax.f32 %v4371_v22, 0.0  ;;  %v4349_v53 = vadd.f32 %v7711_v37, %v4318_v51  ;;  %v5288_v52 = vpop.f32.mrb[60].mxu1 }
 0x6da   : > { %4420 = vst [vmem:[%s6071_s12 + $0x48] sm:$0xff] %v4396_v23  ;;  %v4374_v32 = vadd.f32 %v4350_v46, %v4022_v10  ;;  %v4321_v55 = vmul.f32 %v5288_v52, %v7697_v39  ;;  %v4242_v58 = vpop.f32.mrb[61].mxu1 }
 0x6db   : > { %4419 = vst [vmem:[%s6071_s12 + $0x40] sm:$0xff] %v4395_v8  ;;  %v4373_v54 = vadd.f32 %v4349_v53, %v4021_v38  ;;  %v4320_v31 = vmul.f32 %v7697_v39, %v4242_v58  ;;  %v4029_v38 = vadd.f32 %v7704_v17, %v3998_v29 }
 0x6dc   : > { %v4398_v30 = vmax.f32 %v4374_v32, 0.0  ;;  %v4352_v2 = vadd.f32 %v7711_v37, %v4321_v55 }
 0x6dd   : > { %v4397_v44 = vmax.f32 %v4373_v54, 0.0  ;;  %v4351_v11 = vadd.f32 %v7711_v37, %v4320_v31  ;;  %v5291_v7 = vpop.f32.mrb[62].mxu1  ;;  %v4032_v31 = vadd.f32 %v7704_v17, %v4001_v12 }
 0x6de   : > { %4422 = vst [vmem:[%s6071_s12 + $0x58] sm:$0xff] %v4398_v30  ;;  %v4376_v47 = vadd.f32 %v4352_v2, %v4024_v0  ;;  %v4323_v9 = vmul.f32 %v5291_v7, %v7697_v39  ;;  %v4252_v62 = vpop.f32.mrb[63].mxu1  ;;  %v4031_v30 = vadd.f32 %v7704_v17, %v4000_v61  ;;  %v4002_v2 = vmul.f32 %v7688_v20, %v7692_v56 }
 0x6df   : > { %4421 = vst [vmem:[%s6071_s12 + $0x50] sm:$0xff] %v4397_v44  ;;  %v4375_v16 = vadd.f32 %v4351_v11, %v4023_v24  ;;  %v4322_v59 = vmul.f32 %v7697_v39, %v4252_v62  ;;  %v4034_v62 = vadd.f32 %v7704_v17, %v4003_v3 }
 0x6e0   : > { %v4400_v36 = vmax.f32 %v4376_v47, 0.0  ;;  %v4354_v27 = vadd.f32 %v7711_v37, %v4323_v9 }
 0x6e1   : > { %v4399_v26 = vmax.f32 %v4375_v16, 0.0  ;;  %v4353_v1 = vadd.f32 %v7711_v37, %v4322_v59  ;;  %v5294_v48 = vpop.f32.mrb[64].mxu1  ;;  %v4033_v16 = vadd.f32 %v7704_v17, %v4002_v2 }
 0x6e2   : > { %4424 = vst [vmem:[%s6071_s12 + $0x68] sm:$0xff] %v4400_v36  ;;  %v4378_v25 = vadd.f32 %v4354_v27, %v4026_v33  ;;  %v4325_v42 = vmul.f32 %v5294_v48, %v7697_v39  ;;  %v4262_v14 = vpop.f32.mrb[65].mxu1 }
 0x6e3   : > { %4423 = vst [vmem:[%s6071_s12 + $0x60] sm:$0xff] %v4399_v26  ;;  %v4377_v45 = vadd.f32 %v4353_v1, %v4025_v21  ;;  %v4324_v6 = vmul.f32 %v7697_v39, %v4262_v14 }
 0x6e4   : > { %v4402_v4 = vmax.f32 %v4378_v25, 0.0  ;;  %v4356_v60 = vadd.f32 %v7711_v37, %v4325_v42 }
 0x6e5   : > { %v4401_v43 = vmax.f32 %v4377_v45, 0.0  ;;  %v4355_v63 = vadd.f32 %v7711_v37, %v4324_v6  ;;  %v5297_v34 = vpop.f32.mrb[66].mxu1 }
 0x6e6   : > { %4426 = vst [vmem:[%s6071_s12 + $0x78] sm:$0xff] %v4402_v4  ;;  %v4380_v50 = vadd.f32 %v4356_v60, %v4028_v19  ;;  %v4327_v22 = vmul.f32 %v5297_v34, %v7697_v39  ;;  %v4272_v51 = vpop.f32.mrb[67].mxu1 }
 0x6e7   : > { %4425 = vst [vmem:[%s6071_s12 + $0x70] sm:$0xff] %v4401_v43  ;;  %v4379_v13 = vadd.f32 %v4355_v63, %v4027_v15  ;;  %v4326_v10 = vmul.f32 %v7697_v39, %v4272_v51 }
 0x6e8   : > { %v4404_v23 = vmax.f32 %v4380_v50, 0.0  ;;  %v4358_v46 = vadd.f32 %v7711_v37, %v4327_v22 }
 0x6e9   : > { %v4403_v8 = vmax.f32 %v4379_v13, 0.0  ;;  %v4357_v53 = vadd.f32 %v7711_v37, %v4326_v10  ;;  %v5300_v52 = vpop.f32.mrb[68].mxu1 }
 0x6ea   : > { %4428 = vst [vmem:[%s6071_s12 + $0x88] sm:$0xff] %v4404_v23  ;;  %v4382_v32 = vadd.f32 %v4358_v46, %v4030_v57  ;;  %v4329_v55 = vmul.f32 %v5300_v52, %v7697_v39  ;;  %v4282_v58 = vpop.f32.mrb[69].mxu1 }
 0x6eb   : > { %4427 = vst [vmem:[%s6071_s12 + $0x80] sm:$0xff] %v4403_v8  ;;  %v4381_v5 = vadd.f32 %v4357_v53, %v4029_v38  ;;  %v4328_v54 = vmul.f32 %v7697_v39, %v4282_v58 }
 0x6ec   : > { %v4406_v0 = vmax.f32 %v4382_v32, 0.0  ;;  %v4360_v18 = vadd.f32 %v7711_v37, %v4329_v55 }
 0x6ed   : > { %v4405_v24 = vmax.f32 %v4381_v5, 0.0  ;;  %v4359_v40 = vadd.f32 %v7711_v37, %v4328_v54  ;;  %v5303_v44 = vpop.f32.mrb[70].mxu1 }
 0x6ee   : > { %4430 = vst [vmem:[%s6071_s12 + $0x98] sm:$0xff] %v4406_v0  ;;  %v4384_v11 = vadd.f32 %v4360_v18, %v4032_v31  ;;  %v4331_v7 = vmul.f32 %v5303_v44, %v7697_v39  ;;  %v4292_v35 = vpop.f32.mrb[71].mxu1 }
 0x6ef   : > { %4429 = vst [vmem:[%s6071_s12 + $0x90] sm:$0xff] %v4405_v24  ;;  %v4383_v47 = vadd.f32 %v4359_v40, %v4031_v30  ;;  %v4330_v9 = vmul.f32 %v7697_v39, %v4292_v35 }
 0x6f0   : > { %v4408_v20 = vmax.f32 %v4384_v11, 0.0  ;;  %v4362_v56 = vadd.f32 %v7711_v37, %v4331_v7 }
 0x6f1   : > { %v4407_v59 = vmax.f32 %v4383_v47, 0.0  ;;  %v4361_v33 = vadd.f32 %v7711_v37, %v4330_v9 }
 0x6f2   : > { %4432 = vst [vmem:[%s6071_s12 + $0xa8] sm:$0xff] %v4408_v20  ;;  %v4386_v49 = vadd.f32 %v4362_v56, %v4034_v62 }
 0x6f3   : > { %4431 = vst [vmem:[%s6071_s12 + $0xa0] sm:$0xff] %v4407_v59  ;;  %v4385_v39 = vadd.f32 %v4361_v33, %v4033_v16 }
 0x6f4   : > { %v4410_v36 = vmax.f32 %v4386_v49, 0.0 }
 0x6f5   : > { %v4409_v17 = vmax.f32 %v4385_v39, 0.0 }
 0x6f6   : > { %4434 = vst [vmem:[%s6071_s12 + $0xb8] sm:$0xff] %v4410_v36 }
 0x6f7   : > { %4433 = vst [vmem:[%s6071_s12 + $0xb0] sm:$0xff] %v4409_v17 }
 0x6f8   : > { %5616 = shalt.err (!%p5613_p6)
}
 0x6f9   : > { %s5617_s12 = scalar_lea.hbm %s7857_s15, 3072  ;;  %s5621_s22 = scalar_lea.hbm %s7971_s19, 18432 }
 0x6fa   : > { %p5618_p9 = scmp.ne.s32.totalorder %s7857_s15, %s5617_s12  ;;  %p5622_p2 = scmp.lt.u32.totalorder %s7857_s15, %s7971_s19 }
 0x6fb   : > { %p5623_p4 = scmp.lt.u32.totalorder %s5621_s22, %s5617_s12  ;;  %p5625_p1 = scmp.lt.u32.totalorder %s5617_s12, %s7857_s15 }
 0x6fc   : > { %p5619_p12 = pnand %p5618_p9, %p7973_p3 }
 0x6fd   : > { %p5624_p0 = por %p5623_p4, %p5622_p2 }
 0x6fe   : > { %p5620_p7 = pneg %p5619_p12 }
 0x6ff   : > { %p5626_p8 = por %p5625_p1, %p5624_p0 }
 0x701   : > { %p5627_p10 = pnand %p5626_p8, %p5620_p7 }
 0x703   : > { %5630 = shalt.err (!%p5627_p10)
}
 0x704   : > { %s5736_s13 = smov 128   ;;  %s5737_s20 = smov 8  }
 0x705   : > { %5464 = dma.vmem_to_hbm [thread:$0]  (%p7973_p3), %s7859_s23, 3072, %s7857_s15, %s7865_s9, %s5736_s13, %s5736_s13, %s5737_s20  }
 0x706 PF: > { %p5475_p11 = scmp.ge.s32.totalorder %s5725_s18, 2  ;;  %s4467_s30 = sand.u32 1, %s5685_s25  }
 0x707   : > { %p7974_p13 = scmp.ne.s32.totalorder %s7963_s8, 0  ;;  %s4468_s17 = scalar_lea.sflag [#allocation6], %s4467_s30 }
 0x709   : > { %p5471_p5 = pnand %p5475_p11, %p7974_p13 }
 0x70b   : > { %5680 = dma.done.wait (!%p5471_p5), %s4468_s17, 3072  }
 0x70c   : > { %5682 = vsyncadd (!%p5471_p5), %s4468_s17, 4294964224  ;;  %s29_s18 = sadd.s32 1, %s5725_s18   ;;  %s7975_s21 = sld [smem:[#allocation10_spill]] }
 0x70d   : > { %p26_p6 = scmp.ge.s32.totalorder %s29_s18, 8   ;;  %s7976_s30 = sld [smem:[#allocation16_spill]] }
 0x70e   : > { %s7977_s14 = sld [smem:[#allocation12_spill]]  ;;  %s7978_s15 = sld [smem:[#allocation13_spill]] }
 0x70f   : > { %s7979_s16 = sld [smem:[#allocation14_spill]]  ;;  %s7980_s17 = sld [smem:[#allocation15_spill]] }
 0x710   : > { %s7981_s25 = smov %s5689_s26  ;;  %s7982_s26 = smov %s5693_s27 }
 0x711   : > { %s7983_s27 = smov %s5898_s11  ;;  %s7984_s28 = smov %s5701_s29 }
 0x712   : > { %s7985_s29 = smov %s7975_s21  ;;  %28 = sbr.rel (!%p26_p6) target bundleno = 15 (0xf), region = 135 }
 0x719   :  { %4473 = vsyncpa [#allocation5], 1 }
 0x71a   :  { %4475 = vsyncpa [#allocation5 + $0x1], 1 }
 0x71b   :  { %4476 = vsyncpa [#allocation6], 1 }
 0x71c   :  { %4478 = vsyncpa [#allocation6 + $0x1], 1 }

</bundles_post_ra>
